<compile_context>
chip_gen: v5e
topology: v5e:2x2
jax: 0.10.0
libtpu: 0.0.40
codegen_flags: <defaults>
</compile_context>

<pallas_src>
import functools

import jax
import jax.numpy as jnp
from jax import lax
from jax.experimental import pallas as pl
from jax.experimental.pallas import tpu as pltpu


def _spatial_attention_kernel(w_ref, x_ref, o_ref, sum_acc, max_acc, *,
                              c_total, height, width, kh, kw, pad):
    c_idx = pl.program_id(1)

    @pl.when(c_idx == 0)
    def _init():
        sum_acc[...] = jnp.zeros_like(sum_acc)
        max_acc[...] = jnp.full_like(max_acc, -jnp.inf)

    # (block_c, H, W) tile of x; accumulate with elementwise VPU add/max so the
    # steady-state loop stays hidden under the HBM DMA stream.
    x_blk = x_ref[0].astype(jnp.float32)
    sum_acc[...] += jnp.sum(x_blk, axis=0)
    max_acc[...] = jnp.maximum(max_acc[...], jnp.max(x_blk, axis=0))

    @pl.when(c_idx == pl.num_programs(1) - 1)
    def _finalize():
        avg = sum_acc[...] * (1.0 / c_total)          # true mean over all C
        mx = max_acc[...]

        def pad2d(a):  # zero-pad both spatial dims by `pad` (conv padding)
            zc = jnp.zeros((height, pad), jnp.float32)
            a = jnp.concatenate([zc, a, zc], axis=1)
            zr = jnp.zeros((pad, width + 2 * pad), jnp.float32)
            return jnp.concatenate([zr, a, zr], axis=0)

        planes = (pad2d(avg), pad2d(mx))              # conv input channels 0, 1
        acc = jnp.zeros((height, width), jnp.float32)
        for ci in range(2):
            pln = planes[ci]
            for i in range(kh):
                for j in range(kw):
                    wv = w_ref[(ci * kh + i) * kw + j]   # scalar from SMEM
                    acc = acc + wv * pln[i:i + height, j:j + width]
        o_ref[0] = jax.nn.sigmoid(acc).astype(o_ref.dtype)


def spatial_attention(x, conv_w, *, block_c=None,
                      vmem_block_bytes=2 * 1024 * 1024):
    """x: (N, C, H, W); conv_w: (1, 2, k, k) = Conv2d(2, 1, k, pad=k//2) weight."""
    n, c, h, w = x.shape
    _, two, kh, kw = conv_w.shape
    assert two == 2 and kh == kw and kh % 2 == 1
    pad = kh // 2

    if block_c is None:
        # Largest divisor of C whose x-block stays <= ~2 MiB (safe for the
        # default scoped-VMEM limit on every TPU generation, incl. v7x 64 MiB).
        cap = max(1, vmem_block_bytes // (h * w * jnp.dtype(x.dtype).itemsize))
        block_c = 1
        for cand in range(min(c, cap), 0, -1):
            if c % cand == 0:
                block_c = cand
                break
    assert c % block_c == 0
    grid = (n, c // block_c)

    w_flat = conv_w.astype(jnp.float32).reshape(-1)   # (2*kh*kw,), OIHW order

    kernel = functools.partial(
        _spatial_attention_kernel,
        c_total=c, height=h, width=w, kh=kh, kw=kw, pad=pad)

    itemsize = jnp.dtype(x.dtype).itemsize
    cost = pl.CostEstimate(
        flops=2 * n * c * h * w + 2 * n * 2 * kh * kw * h * w,
        transcendentals=n * h * w,
        bytes_accessed=n * c * h * w * itemsize + n * h * w * itemsize
        + 2 * kh * kw * 4,
    )

    out = pl.pallas_call(
        kernel,
        out_shape=jax.ShapeDtypeStruct((n, h, w), x.dtype),
        grid_spec=pltpu.PrefetchScalarGridSpec(
            num_scalar_prefetch=0,
            grid=grid,
            in_specs=[
                # 2*k*k conv weights, resident in SMEM for the whole call.
                pl.BlockSpec(memory_space=pltpu.MemorySpace.SMEM),
                # streaming channel tiles of x (auto double-buffered by Pallas).
                pl.BlockSpec((1, block_c, h, w), lambda ni, ci: (ni, ci, 0, 0)),
            ],
            out_specs=pl.BlockSpec((1, h, w), lambda ni, ci: (ni, 0, 0)),
            scratch_shapes=[
                pltpu.VMEM((h, w), jnp.float32),   # running channel sum
                pltpu.VMEM((h, w), jnp.float32),   # running channel max
            ],
        ),
        compiler_params=pltpu.CompilerParams(
            dimension_semantics=("parallel", "arbitrary")),
        cost_estimate=cost,
    )(w_flat, x)
    return out.reshape(n, 1, h, w)


if __name__ == "__main__":
    key = jax.random.PRNGKey(0)
    kx, kw_ = jax.random.split(key)

    N, C, H, W = 2, 64, 16, 16
    K = 7  # kernel_size=7, padding=3, bias=False

    x = jax.random.normal(kx, (N, C, H, W), dtype=jnp.float32)
    conv_w = jax.random.normal(kw_, (1, 2, K, K), dtype=jnp.float32) * 0.1

    # Exercise the multi-step channel reduction (4 grid steps over C)...
    out = spatial_attention(x, conv_w, block_c=16)
    jax.block_until_ready(out)
    # ...and the default auto-sized channel tiling.
    out_auto = spatial_attention(x, conv_w)
    jax.block_until_ready(out_auto)

    # Pure-JAX reference of the PyTorch forward.
    avg = x.mean(axis=1, keepdims=True)
    mx = x.max(axis=1, keepdims=True)
    cat = jnp.concatenate([avg, mx], axis=1)
    conv = lax.conv_general_dilated(
        cat, conv_w, window_strides=(1, 1),
        padding=((K // 2, K // 2), (K // 2, K // 2)),
        dimension_numbers=("NCHW", "OIHW", "NCHW"))
    ref = jax.nn.sigmoid(conv)

    assert out.shape == (N, 1, H, W)
    assert jnp.allclose(out, ref, atol=1e-5, rtol=1e-5)
    assert jnp.allclose(out_auto, ref, atol=1e-5, rtol=1e-5)

    print("KERNEL_OK")
</pallas_src>

<mosaic_0001>
module attributes {stable_mosaic.version = 11 : i64} {
  func.func @_spatial_attention_kernel(%arg0: i32, %arg1: i32, %arg2: memref<98xf32, #tpu.memory_space<smem>>, %arg3: memref<1x16x16x16xf32, #tpu.memory_space<vmem>>, %arg4: memref<1x16x16xf32, #tpu.memory_space<vmem>>, %arg5: memref<16x16xf32, #tpu.memory_space<vmem>>, %arg6: memref<16x16xf32, #tpu.memory_space<vmem>>) attributes {dimension_semantics = [#tpu.dimension_semantics<parallel>, #tpu.dimension_semantics<arbitrary>], iteration_bounds = array<i64: 2, 4>, scalar_prefetch = 0 : i64, scratch_operands = 2 : i64, tpu.core_type = #tpu.core_type<tc>, window_params = [{transform_indices = @transform_0, window_bounds = array<i64: 98>}, {transform_indices = @transform_1, window_bounds = array<i64: 1, 16, 16, 16>}, {transform_indices = @transform_2, window_bounds = array<i64: 1, 16, 16>}]} {
    %c0_i32 = arith.constant 0 : i32
    %0 = arith.cmpi eq, %arg1, %c0_i32 : i32
    %1 = arith.extui %0 : i1 to i32
    %c0_i32_0 = arith.constant 0 : i32
    %2 = arith.cmpi ne, %1, %c0_i32_0 : i32
    scf.if %2 {
      %cst_14 = arith.constant 0.000000e+00 : f32
      %16 = vector.broadcast %cst_14 : f32 to vector<16x16xf32>
      %c0_15 = arith.constant 0 : index
      %c0_16 = arith.constant 0 : index
      %17 = vector.load %arg5[%c0_15, %c0_16] : memref<16x16xf32, #tpu.memory_space<vmem>>, vector<16x16xf32>
      tpu.vector_store %arg5[%c0_15, %c0_16], %16 {strides = array<i32>} : memref<16x16xf32, #tpu.memory_space<vmem>>, vector<16x16xf32>,
      %cst_17 = arith.constant 0xFF800000 : f32
      %18 = vector.broadcast %cst_17 : f32 to vector<16x16xf32>
      %c0_18 = arith.constant 0 : index
      %c0_19 = arith.constant 0 : index
      %19 = vector.load %arg6[%c0_18, %c0_19] : memref<16x16xf32, #tpu.memory_space<vmem>>, vector<16x16xf32>
      tpu.vector_store %arg6[%c0_18, %c0_19], %18 {strides = array<i32>} : memref<16x16xf32, #tpu.memory_space<vmem>>, vector<16x16xf32>,
    } else {
    }
    %c0 = arith.constant 0 : index
    %c0_1 = arith.constant 0 : index
    %c0_2 = arith.constant 0 : index
    %c0_3 = arith.constant 0 : index
    %3 = vector.load %arg3[%c0, %c0_1, %c0_2, %c0_3] : memref<1x16x16x16xf32, #tpu.memory_space<vmem>>, vector<1x16x16x16xf32>
    %4 = vector.shape_cast %3 : vector<1x16x16x16xf32> to vector<16x16x16xf32>
    %c0_4 = arith.constant 0 : index
    %c0_5 = arith.constant 0 : index
    %5 = vector.load %arg5[%c0_4, %c0_5] : memref<16x16xf32, #tpu.memory_space<vmem>>, vector<16x16xf32>
    %cst = arith.constant dense<0.000000e+00> : vector<16x16xf32>
    %6 = vector.multi_reduction <add>, %4, %cst [0] : vector<16x16x16xf32> to vector<16x16xf32>
    %7 = arith.addf %5, %6 : vector<16x16xf32>
    %c0_6 = arith.constant 0 : index
    %c0_7 = arith.constant 0 : index
    %8 = vector.load %arg5[%c0_6, %c0_7] : memref<16x16xf32, #tpu.memory_space<vmem>>, vector<16x16xf32>
    tpu.vector_store %arg5[%c0_6, %c0_7], %7 {strides = array<i32>} : memref<16x16xf32, #tpu.memory_space<vmem>>, vector<16x16xf32>,
    %c0_8 = arith.constant 0 : index
    %c0_9 = arith.constant 0 : index
    %9 = vector.load %arg6[%c0_8, %c0_9] : memref<16x16xf32, #tpu.memory_space<vmem>>, vector<16x16xf32>
    %cst_10 = arith.constant dense<0xFF800000> : vector<16x16xf32>
    %10 = vector.multi_reduction <maximumf>, %4, %cst_10 [0] : vector<16x16x16xf32> to vector<16x16xf32>
    %11 = arith.maximumf %9, %10 : vector<16x16xf32>
    %c0_11 = arith.constant 0 : index
    %c0_12 = arith.constant 0 : index
    %12 = vector.load %arg6[%c0_11, %c0_12] : memref<16x16xf32, #tpu.memory_space<vmem>>, vector<16x16xf32>
    tpu.vector_store %arg6[%c0_11, %c0_12], %11 {strides = array<i32>} : memref<16x16xf32, #tpu.memory_space<vmem>>, vector<16x16xf32>,
    %c3_i32 = arith.constant 3 : i32
    %13 = arith.cmpi eq, %arg1, %c3_i32 : i32
    %14 = arith.extui %13 : i1 to i32
    %c0_i32_13 = arith.constant 0 : i32
    %15 = arith.cmpi ne, %14, %c0_i32_13 : i32
    scf.if %15 {
      %c0_14 = arith.constant 0 : index
      %c0_15 = arith.constant 0 : index
      %16 = vector.load %arg5[%c0_14, %c0_15] : memref<16x16xf32, #tpu.memory_space<vmem>>, vector<16x16xf32>
      %cst_16 = arith.constant 1.562500e-02 : f32
      %17 = vector.broadcast %cst_16 : f32 to vector<16x16xf32>
      %18 = arith.mulf %16, %17 : vector<16x16xf32>
      %c0_17 = arith.constant 0 : index
      %c0_18 = arith.constant 0 : index
      %19 = vector.load %arg6[%c0_17, %c0_18] : memref<16x16xf32, #tpu.memory_space<vmem>>, vector<16x16xf32>
      %cst_19 = arith.constant 0.000000e+00 : f32
      %20 = vector.broadcast %cst_19 : f32 to vector<16x3xf32>
      %21 = tpu.concatenate %20, %18, %20 in 1 : vector<16x3xf32>, vector<16x16xf32>, vector<16x3xf32> -> vector<16x22xf32>
      %cst_20 = arith.constant 0.000000e+00 : f32
      %22 = vector.broadcast %cst_20 : f32 to vector<3x22xf32>
      %23 = tpu.concatenate %22, %21, %22 in 0 : vector<3x22xf32>, vector<16x22xf32>, vector<3x22xf32> -> vector<22x22xf32>
      %cst_21 = arith.constant 0.000000e+00 : f32
      %24 = vector.broadcast %cst_21 : f32 to vector<16x3xf32>
      %25 = tpu.concatenate %24, %19, %24 in 1 : vector<16x3xf32>, vector<16x16xf32>, vector<16x3xf32> -> vector<16x22xf32>
      %cst_22 = arith.constant 0.000000e+00 : f32
      %26 = vector.broadcast %cst_22 : f32 to vector<3x22xf32>
      %27 = tpu.concatenate %26, %25, %26 in 0 : vector<3x22xf32>, vector<16x22xf32>, vector<3x22xf32> -> vector<22x22xf32>
      %cst_23 = arith.constant 0.000000e+00 : f32
      %28 = vector.broadcast %cst_23 : f32 to vector<16x16xf32>
      %c0_24 = arith.constant 0 : index
      %29 = memref.load %arg2[%c0_24] : memref<98xf32, #tpu.memory_space<smem>>
      %30 = vector.extract_strided_slice %23 {offsets = [0, 0], sizes = [16, 16], strides = [1, 1]} : vector<22x22xf32> to vector<16x16xf32>
      %31 = vector.broadcast %29 : f32 to vector<16x16xf32>
      %32 = arith.mulf %31, %30 : vector<16x16xf32>
      %33 = arith.addf %28, %32 : vector<16x16xf32>
      %c1 = arith.constant 1 : index
      %34 = memref.load %arg2[%c1] : memref<98xf32, #tpu.memory_space<smem>>
      %35 = vector.extract_strided_slice %23 {offsets = [0, 1], sizes = [16, 16], strides = [1, 1]} : vector<22x22xf32> to vector<16x16xf32>
      %36 = vector.broadcast %34 : f32 to vector<16x16xf32>
      %37 = arith.mulf %36, %35 : vector<16x16xf32>
      %38 = arith.addf %33, %37 : vector<16x16xf32>
      %c2 = arith.constant 2 : index
      %39 = memref.load %arg2[%c2] : memref<98xf32, #tpu.memory_space<smem>>
      %40 = vector.extract_strided_slice %23 {offsets = [0, 2], sizes = [16, 16], strides = [1, 1]} : vector<22x22xf32> to vector<16x16xf32>
      %41 = vector.broadcast %39 : f32 to vector<16x16xf32>
      %42 = arith.mulf %41, %40 : vector<16x16xf32>
      %43 = arith.addf %38, %42 : vector<16x16xf32>
      %c3 = arith.constant 3 : index
      %44 = memref.load %arg2[%c3] : memref<98xf32, #tpu.memory_space<smem>>
      %45 = vector.extract_strided_slice %23 {offsets = [0, 3], sizes = [16, 16], strides = [1, 1]} : vector<22x22xf32> to vector<16x16xf32>
      %46 = vector.broadcast %44 : f32 to vector<16x16xf32>
      %47 = arith.mulf %46, %45 : vector<16x16xf32>
      %48 = arith.addf %43, %47 : vector<16x16xf32>
      %c4 = arith.constant 4 : index
      %49 = memref.load %arg2[%c4] : memref<98xf32, #tpu.memory_space<smem>>
      %50 = vector.extract_strided_slice %23 {offsets = [0, 4], sizes = [16, 16], strides = [1, 1]} : vector<22x22xf32> to vector<16x16xf32>
      %51 = vector.broadcast %49 : f32 to vector<16x16xf32>
      %52 = arith.mulf %51, %50 : vector<16x16xf32>
      %53 = arith.addf %48, %52 : vector<16x16xf32>
      %c5 = arith.constant 5 : index
      %54 = memref.load %arg2[%c5] : memref<98xf32, #tpu.memory_space<smem>>
      %55 = vector.extract_strided_slice %23 {offsets = [0, 5], sizes = [16, 16], strides = [1, 1]} : vector<22x22xf32> to vector<16x16xf32>
      %56 = vector.broadcast %54 : f32 to vector<16x16xf32>
      %57 = arith.mulf %56, %55 : vector<16x16xf32>
      %58 = arith.addf %53, %57 : vector<16x16xf32>
      %c6 = arith.constant 6 : index
      %59 = memref.load %arg2[%c6] : memref<98xf32, #tpu.memory_space<smem>>
      %60 = vector.extract_strided_slice %23 {offsets = [0, 6], sizes = [16, 16], strides = [1, 1]} : vector<22x22xf32> to vector<16x16xf32>
      %61 = vector.broadcast %59 : f32 to vector<16x16xf32>
      %62 = arith.mulf %61, %60 : vector<16x16xf32>
      %63 = arith.addf %58, %62 : vector<16x16xf32>
      %c7 = arith.constant 7 : index
      %64 = memref.load %arg2[%c7] : memref<98xf32, #tpu.memory_space<smem>>
      %65 = vector.extract_strided_slice %23 {offsets = [1, 0], sizes = [16, 16], strides = [1, 1]} : vector<22x22xf32> to vector<16x16xf32>
      %66 = vector.broadcast %64 : f32 to vector<16x16xf32>
      %67 = arith.mulf %66, %65 : vector<16x16xf32>
      %68 = arith.addf %63, %67 : vector<16x16xf32>
      %c8 = arith.constant 8 : index
      %69 = memref.load %arg2[%c8] : memref<98xf32, #tpu.memory_space<smem>>
      %70 = vector.extract_strided_slice %23 {offsets = [1, 1], sizes = [16, 16], strides = [1, 1]} : vector<22x22xf32> to vector<16x16xf32>
      %71 = vector.broadcast %69 : f32 to vector<16x16xf32>
      %72 = arith.mulf %71, %70 : vector<16x16xf32>
      %73 = arith.addf %68, %72 : vector<16x16xf32>
      %c9 = arith.constant 9 : index
      %74 = memref.load %arg2[%c9] : memref<98xf32, #tpu.memory_space<smem>>
      %75 = vector.extract_strided_slice %23 {offsets = [1, 2], sizes = [16, 16], strides = [1, 1]} : vector<22x22xf32> to vector<16x16xf32>
      %76 = vector.broadcast %74 : f32 to vector<16x16xf32>
      %77 = arith.mulf %76, %75 : vector<16x16xf32>
      %78 = arith.addf %73, %77 : vector<16x16xf32>
      %c10 = arith.constant 10 : index
      %79 = memref.load %arg2[%c10] : memref<98xf32, #tpu.memory_space<smem>>
      %80 = vector.extract_strided_slice %23 {offsets = [1, 3], sizes = [16, 16], strides = [1, 1]} : vector<22x22xf32> to vector<16x16xf32>
      %81 = vector.broadcast %79 : f32 to vector<16x16xf32>
      %82 = arith.mulf %81, %80 : vector<16x16xf32>
      %83 = arith.addf %78, %82 : vector<16x16xf32>
      %c11 = arith.constant 11 : index
      %84 = memref.load %arg2[%c11] : memref<98xf32, #tpu.memory_space<smem>>
      %85 = vector.extract_strided_slice %23 {offsets = [1, 4], sizes = [16, 16], strides = [1, 1]} : vector<22x22xf32> to vector<16x16xf32>
      %86 = vector.broadcast %84 : f32 to vector<16x16xf32>
      %87 = arith.mulf %86, %85 : vector<16x16xf32>
      %88 = arith.addf %83, %87 : vector<16x16xf32>
      %c12 = arith.constant 12 : index
      %89 = memref.load %arg2[%c12] : memref<98xf32, #tpu.memory_space<smem>>
      %90 = vector.extract_strided_slice %23 {offsets = [1, 5], sizes = [16, 16], strides = [1, 1]} : vector<22x22xf32> to vector<16x16xf32>
      %91 = vector.broadcast %89 : f32 to vector<16x16xf32>
      %92 = arith.mulf %91, %90 : vector<16x16xf32>
      %93 = arith.addf %88, %92 : vector<16x16xf32>
      %c13 = arith.constant 13 : index
      %94 = memref.load %arg2[%c13] : memref<98xf32, #tpu.memory_space<smem>>
      %95 = vector.extract_strided_slice %23 {offsets = [1, 6], sizes = [16, 16], strides = [1, 1]} : vector<22x22xf32> to vector<16x16xf32>
      %96 = vector.broadcast %94 : f32 to vector<16x16xf32>
      %97 = arith.mulf %96, %95 : vector<16x16xf32>
      %98 = arith.addf %93, %97 : vector<16x16xf32>
      %c14 = arith.constant 14 : index
      %99 = memref.load %arg2[%c14] : memref<98xf32, #tpu.memory_space<smem>>
      %100 = vector.extract_strided_slice %23 {offsets = [2, 0], sizes = [16, 16], strides = [1, 1]} : vector<22x22xf32> to vector<16x16xf32>
      %101 = vector.broadcast %99 : f32 to vector<16x16xf32>
      %102 = arith.mulf %101, %100 : vector<16x16xf32>
      %103 = arith.addf %98, %102 : vector<16x16xf32>
      %c15 = arith.constant 15 : index
      %104 = memref.load %arg2[%c15] : memref<98xf32, #tpu.memory_space<smem>>
      %105 = vector.extract_strided_slice %23 {offsets = [2, 1], sizes = [16, 16], strides = [1, 1]} : vector<22x22xf32> to vector<16x16xf32>
      %106 = vector.broadcast %104 : f32 to vector<16x16xf32>
      %107 = arith.mulf %106, %105 : vector<16x16xf32>
      %108 = arith.addf %103, %107 : vector<16x16xf32>
      %c16 = arith.constant 16 : index
      %109 = memref.load %arg2[%c16] : memref<98xf32, #tpu.memory_space<smem>>
      %110 = vector.extract_strided_slice %23 {offsets = [2, 2], sizes = [16, 16], strides = [1, 1]} : vector<22x22xf32> to vector<16x16xf32>
      %111 = vector.broadcast %109 : f32 to vector<16x16xf32>
      %112 = arith.mulf %111, %110 : vector<16x16xf32>
      %113 = arith.addf %108, %112 : vector<16x16xf32>
      %c17 = arith.constant 17 : index
      %114 = memref.load %arg2[%c17] : memref<98xf32, #tpu.memory_space<smem>>
      %115 = vector.extract_strided_slice %23 {offsets = [2, 3], sizes = [16, 16], strides = [1, 1]} : vector<22x22xf32> to vector<16x16xf32>
      %116 = vector.broadcast %114 : f32 to vector<16x16xf32>
      %117 = arith.mulf %116, %115 : vector<16x16xf32>
      %118 = arith.addf %113, %117 : vector<16x16xf32>
      %c18 = arith.constant 18 : index
      %119 = memref.load %arg2[%c18] : memref<98xf32, #tpu.memory_space<smem>>
      %120 = vector.extract_strided_slice %23 {offsets = [2, 4], sizes = [16, 16], strides = [1, 1]} : vector<22x22xf32> to vector<16x16xf32>
      %121 = vector.broadcast %119 : f32 to vector<16x16xf32>
      %122 = arith.mulf %121, %120 : vector<16x16xf32>
      %123 = arith.addf %118, %122 : vector<16x16xf32>
      %c19 = arith.constant 19 : index
      %124 = memref.load %arg2[%c19] : memref<98xf32, #tpu.memory_space<smem>>
      %125 = vector.extract_strided_slice %23 {offsets = [2, 5], sizes = [16, 16], strides = [1, 1]} : vector<22x22xf32> to vector<16x16xf32>
      %126 = vector.broadcast %124 : f32 to vector<16x16xf32>
      %127 = arith.mulf %126, %125 : vector<16x16xf32>
      %128 = arith.addf %123, %127 : vector<16x16xf32>
      %c20 = arith.constant 20 : index
      %129 = memref.load %arg2[%c20] : memref<98xf32, #tpu.memory_space<smem>>
      %130 = vector.extract_strided_slice %23 {offsets = [2, 6], sizes = [16, 16], strides = [1, 1]} : vector<22x22xf32> to vector<16x16xf32>
      %131 = vector.broadcast %129 : f32 to vector<16x16xf32>
      %132 = arith.mulf %131, %130 : vector<16x16xf32>
      %133 = arith.addf %128, %132 : vector<16x16xf32>
      %c21 = arith.constant 21 : index
      %134 = memref.load %arg2[%c21] : memref<98xf32, #tpu.memory_space<smem>>
      %135 = vector.extract_strided_slice %23 {offsets = [3, 0], sizes = [16, 16], strides = [1, 1]} : vector<22x22xf32> to vector<16x16xf32>
      %136 = vector.broadcast %134 : f32 to vector<16x16xf32>
      %137 = arith.mulf %136, %135 : vector<16x16xf32>
      %138 = arith.addf %133, %137 : vector<16x16xf32>
      %c22 = arith.constant 22 : index
      %139 = memref.load %arg2[%c22] : memref<98xf32, #tpu.memory_space<smem>>
      %140 = vector.extract_strided_slice %23 {offsets = [3, 1], sizes = [16, 16], strides = [1, 1]} : vector<22x22xf32> to vector<16x16xf32>
      %141 = vector.broadcast %139 : f32 to vector<16x16xf32>
      %142 = arith.mulf %141, %140 : vector<16x16xf32>
      %143 = arith.addf %138, %142 : vector<16x16xf32>
      %c23 = arith.constant 23 : index
      %144 = memref.load %arg2[%c23] : memref<98xf32, #tpu.memory_space<smem>>
      %145 = vector.extract_strided_slice %23 {offsets = [3, 2], sizes = [16, 16], strides = [1, 1]} : vector<22x22xf32> to vector<16x16xf32>
      %146 = vector.broadcast %144 : f32 to vector<16x16xf32>
      %147 = arith.mulf %146, %145 : vector<16x16xf32>
      %148 = arith.addf %143, %147 : vector<16x16xf32>
      %c24 = arith.constant 24 : index
      %149 = memref.load %arg2[%c24] : memref<98xf32, #tpu.memory_space<smem>>
      %150 = vector.extract_strided_slice %23 {offsets = [3, 3], sizes = [16, 16], strides = [1, 1]} : vector<22x22xf32> to vector<16x16xf32>
      %151 = vector.broadcast %149 : f32 to vector<16x16xf32>
      %152 = arith.mulf %151, %150 : vector<16x16xf32>
      %153 = arith.addf %148, %152 : vector<16x16xf32>
      %c25 = arith.constant 25 : index
      %154 = memref.load %arg2[%c25] : memref<98xf32, #tpu.memory_space<smem>>
      %155 = vector.extract_strided_slice %23 {offsets = [3, 4], sizes = [16, 16], strides = [1, 1]} : vector<22x22xf32> to vector<16x16xf32>
      %156 = vector.broadcast %154 : f32 to vector<16x16xf32>
      %157 = arith.mulf %156, %155 : vector<16x16xf32>
      %158 = arith.addf %153, %157 : vector<16x16xf32>
      %c26 = arith.constant 26 : index
      %159 = memref.load %arg2[%c26] : memref<98xf32, #tpu.memory_space<smem>>
      %160 = vector.extract_strided_slice %23 {offsets = [3, 5], sizes = [16, 16], strides = [1, 1]} : vector<22x22xf32> to vector<16x16xf32>
      %161 = vector.broadcast %159 : f32 to vector<16x16xf32>
      %162 = arith.mulf %161, %160 : vector<16x16xf32>
      %163 = arith.addf %158, %162 : vector<16x16xf32>
      %c27 = arith.constant 27 : index
      %164 = memref.load %arg2[%c27] : memref<98xf32, #tpu.memory_space<smem>>
      %165 = vector.extract_strided_slice %23 {offsets = [3, 6], sizes = [16, 16], strides = [1, 1]} : vector<22x22xf32> to vector<16x16xf32>
      %166 = vector.broadcast %164 : f32 to vector<16x16xf32>
      %167 = arith.mulf %166, %165 : vector<16x16xf32>
      %168 = arith.addf %163, %167 : vector<16x16xf32>
      %c28 = arith.constant 28 : index
      %169 = memref.load %arg2[%c28] : memref<98xf32, #tpu.memory_space<smem>>
      %170 = vector.extract_strided_slice %23 {offsets = [4, 0], sizes = [16, 16], strides = [1, 1]} : vector<22x22xf32> to vector<16x16xf32>
      %171 = vector.broadcast %169 : f32 to vector<16x16xf32>
      %172 = arith.mulf %171, %170 : vector<16x16xf32>
      %173 = arith.addf %168, %172 : vector<16x16xf32>
      %c29 = arith.constant 29 : index
      %174 = memref.load %arg2[%c29] : memref<98xf32, #tpu.memory_space<smem>>
      %175 = vector.extract_strided_slice %23 {offsets = [4, 1], sizes = [16, 16], strides = [1, 1]} : vector<22x22xf32> to vector<16x16xf32>
      %176 = vector.broadcast %174 : f32 to vector<16x16xf32>
      %177 = arith.mulf %176, %175 : vector<16x16xf32>
      %178 = arith.addf %173, %177 : vector<16x16xf32>
      %c30 = arith.constant 30 : index
      %179 = memref.load %arg2[%c30] : memref<98xf32, #tpu.memory_space<smem>>
      %180 = vector.extract_strided_slice %23 {offsets = [4, 2], sizes = [16, 16], strides = [1, 1]} : vector<22x22xf32> to vector<16x16xf32>
      %181 = vector.broadcast %179 : f32 to vector<16x16xf32>
      %182 = arith.mulf %181, %180 : vector<16x16xf32>
      %183 = arith.addf %178, %182 : vector<16x16xf32>
      %c31 = arith.constant 31 : index
      %184 = memref.load %arg2[%c31] : memref<98xf32, #tpu.memory_space<smem>>
      %185 = vector.extract_strided_slice %23 {offsets = [4, 3], sizes = [16, 16], strides = [1, 1]} : vector<22x22xf32> to vector<16x16xf32>
      %186 = vector.broadcast %184 : f32 to vector<16x16xf32>
      %187 = arith.mulf %186, %185 : vector<16x16xf32>
      %188 = arith.addf %183, %187 : vector<16x16xf32>
      %c32 = arith.constant 32 : index
      %189 = memref.load %arg2[%c32] : memref<98xf32, #tpu.memory_space<smem>>
      %190 = vector.extract_strided_slice %23 {offsets = [4, 4], sizes = [16, 16], strides = [1, 1]} : vector<22x22xf32> to vector<16x16xf32>
      %191 = vector.broadcast %189 : f32 to vector<16x16xf32>
      %192 = arith.mulf %191, %190 : vector<16x16xf32>
      %193 = arith.addf %188, %192 : vector<16x16xf32>
      %c33 = arith.constant 33 : index
      %194 = memref.load %arg2[%c33] : memref<98xf32, #tpu.memory_space<smem>>
      %195 = vector.extract_strided_slice %23 {offsets = [4, 5], sizes = [16, 16], strides = [1, 1]} : vector<22x22xf32> to vector<16x16xf32>
      %196 = vector.broadcast %194 : f32 to vector<16x16xf32>
      %197 = arith.mulf %196, %195 : vector<16x16xf32>
      %198 = arith.addf %193, %197 : vector<16x16xf32>
      %c34 = arith.constant 34 : index
      %199 = memref.load %arg2[%c34] : memref<98xf32, #tpu.memory_space<smem>>
      %200 = vector.extract_strided_slice %23 {offsets = [4, 6], sizes = [16, 16], strides = [1, 1]} : vector<22x22xf32> to vector<16x16xf32>
      %201 = vector.broadcast %199 : f32 to vector<16x16xf32>
      %202 = arith.mulf %201, %200 : vector<16x16xf32>
      %203 = arith.addf %198, %202 : vector<16x16xf32>
      %c35 = arith.constant 35 : index
      %204 = memref.load %arg2[%c35] : memref<98xf32, #tpu.memory_space<smem>>
      %205 = vector.extract_strided_slice %23 {offsets = [5, 0], sizes = [16, 16], strides = [1, 1]} : vector<22x22xf32> to vector<16x16xf32>
      %206 = vector.broadcast %204 : f32 to vector<16x16xf32>
      %207 = arith.mulf %206, %205 : vector<16x16xf32>
      %208 = arith.addf %203, %207 : vector<16x16xf32>
      %c36 = arith.constant 36 : index
      %209 = memref.load %arg2[%c36] : memref<98xf32, #tpu.memory_space<smem>>
      %210 = vector.extract_strided_slice %23 {offsets = [5, 1], sizes = [16, 16], strides = [1, 1]} : vector<22x22xf32> to vector<16x16xf32>
      %211 = vector.broadcast %209 : f32 to vector<16x16xf32>
      %212 = arith.mulf %211, %210 : vector<16x16xf32>
      %213 = arith.addf %208, %212 : vector<16x16xf32>
      %c37 = arith.constant 37 : index
      %214 = memref.load %arg2[%c37] : memref<98xf32, #tpu.memory_space<smem>>
      %215 = vector.extract_strided_slice %23 {offsets = [5, 2], sizes = [16, 16], strides = [1, 1]} : vector<22x22xf32> to vector<16x16xf32>
      %216 = vector.broadcast %214 : f32 to vector<16x16xf32>
      %217 = arith.mulf %216, %215 : vector<16x16xf32>
      %218 = arith.addf %213, %217 : vector<16x16xf32>
      %c38 = arith.constant 38 : index
      %219 = memref.load %arg2[%c38] : memref<98xf32, #tpu.memory_space<smem>>
      %220 = vector.extract_strided_slice %23 {offsets = [5, 3], sizes = [16, 16], strides = [1, 1]} : vector<22x22xf32> to vector<16x16xf32>
      %221 = vector.broadcast %219 : f32 to vector<16x16xf32>
      %222 = arith.mulf %221, %220 : vector<16x16xf32>
      %223 = arith.addf %218, %222 : vector<16x16xf32>
      %c39 = arith.constant 39 : index
      %224 = memref.load %arg2[%c39] : memref<98xf32, #tpu.memory_space<smem>>
      %225 = vector.extract_strided_slice %23 {offsets = [5, 4], sizes = [16, 16], strides = [1, 1]} : vector<22x22xf32> to vector<16x16xf32>
      %226 = vector.broadcast %224 : f32 to vector<16x16xf32>
      %227 = arith.mulf %226, %225 : vector<16x16xf32>
      %228 = arith.addf %223, %227 : vector<16x16xf32>
      %c40 = arith.constant 40 : index
      %229 = memref.load %arg2[%c40] : memref<98xf32, #tpu.memory_space<smem>>
      %230 = vector.extract_strided_slice %23 {offsets = [5, 5], sizes = [16, 16], strides = [1, 1]} : vector<22x22xf32> to vector<16x16xf32>
      %231 = vector.broadcast %229 : f32 to vector<16x16xf32>
      %232 = arith.mulf %231, %230 : vector<16x16xf32>
      %233 = arith.addf %228, %232 : vector<16x16xf32>
      %c41 = arith.constant 41 : index
      %234 = memref.load %arg2[%c41] : memref<98xf32, #tpu.memory_space<smem>>
      %235 = vector.extract_strided_slice %23 {offsets = [5, 6], sizes = [16, 16], strides = [1, 1]} : vector<22x22xf32> to vector<16x16xf32>
      %236 = vector.broadcast %234 : f32 to vector<16x16xf32>
      %237 = arith.mulf %236, %235 : vector<16x16xf32>
      %238 = arith.addf %233, %237 : vector<16x16xf32>
      %c42 = arith.constant 42 : index
      %239 = memref.load %arg2[%c42] : memref<98xf32, #tpu.memory_space<smem>>
      %240 = vector.extract_strided_slice %23 {offsets = [6, 0], sizes = [16, 16], strides = [1, 1]} : vector<22x22xf32> to vector<16x16xf32>
      %241 = vector.broadcast %239 : f32 to vector<16x16xf32>
      %242 = arith.mulf %241, %240 : vector<16x16xf32>
      %243 = arith.addf %238, %242 : vector<16x16xf32>
      %c43 = arith.constant 43 : index
      %244 = memref.load %arg2[%c43] : memref<98xf32, #tpu.memory_space<smem>>
      %245 = vector.extract_strided_slice %23 {offsets = [6, 1], sizes = [16, 16], strides = [1, 1]} : vector<22x22xf32> to vector<16x16xf32>
      %246 = vector.broadcast %244 : f32 to vector<16x16xf32>
      %247 = arith.mulf %246, %245 : vector<16x16xf32>
      %248 = arith.addf %243, %247 : vector<16x16xf32>
      %c44 = arith.constant 44 : index
      %249 = memref.load %arg2[%c44] : memref<98xf32, #tpu.memory_space<smem>>
      %250 = vector.extract_strided_slice %23 {offsets = [6, 2], sizes = [16, 16], strides = [1, 1]} : vector<22x22xf32> to vector<16x16xf32>
      %251 = vector.broadcast %249 : f32 to vector<16x16xf32>
      %252 = arith.mulf %251, %250 : vector<16x16xf32>
      %253 = arith.addf %248, %252 : vector<16x16xf32>
      %c45 = arith.constant 45 : index
      %254 = memref.load %arg2[%c45] : memref<98xf32, #tpu.memory_space<smem>>
      %255 = vector.extract_strided_slice %23 {offsets = [6, 3], sizes = [16, 16], strides = [1, 1]} : vector<22x22xf32> to vector<16x16xf32>
      %256 = vector.broadcast %254 : f32 to vector<16x16xf32>
      %257 = arith.mulf %256, %255 : vector<16x16xf32>
      %258 = arith.addf %253, %257 : vector<16x16xf32>
      %c46 = arith.constant 46 : index
      %259 = memref.load %arg2[%c46] : memref<98xf32, #tpu.memory_space<smem>>
      %260 = vector.extract_strided_slice %23 {offsets = [6, 4], sizes = [16, 16], strides = [1, 1]} : vector<22x22xf32> to vector<16x16xf32>
      %261 = vector.broadcast %259 : f32 to vector<16x16xf32>
      %262 = arith.mulf %261, %260 : vector<16x16xf32>
      %263 = arith.addf %258, %262 : vector<16x16xf32>
      %c47 = arith.constant 47 : index
      %264 = memref.load %arg2[%c47] : memref<98xf32, #tpu.memory_space<smem>>
      %265 = vector.extract_strided_slice %23 {offsets = [6, 5], sizes = [16, 16], strides = [1, 1]} : vector<22x22xf32> to vector<16x16xf32>
      %266 = vector.broadcast %264 : f32 to vector<16x16xf32>
      %267 = arith.mulf %266, %265 : vector<16x16xf32>
      %268 = arith.addf %263, %267 : vector<16x16xf32>
      %c48 = arith.constant 48 : index
      %269 = memref.load %arg2[%c48] : memref<98xf32, #tpu.memory_space<smem>>
      %270 = vector.extract_strided_slice %23 {offsets = [6, 6], sizes = [16, 16], strides = [1, 1]} : vector<22x22xf32> to vector<16x16xf32>
      %271 = vector.broadcast %269 : f32 to vector<16x16xf32>
      %272 = arith.mulf %271, %270 : vector<16x16xf32>
      %273 = arith.addf %268, %272 : vector<16x16xf32>
      %c49 = arith.constant 49 : index
      %274 = memref.load %arg2[%c49] : memref<98xf32, #tpu.memory_space<smem>>
      %275 = vector.extract_strided_slice %27 {offsets = [0, 0], sizes = [16, 16], strides = [1, 1]} : vector<22x22xf32> to vector<16x16xf32>
      %276 = vector.broadcast %274 : f32 to vector<16x16xf32>
      %277 = arith.mulf %276, %275 : vector<16x16xf32>
      %278 = arith.addf %273, %277 : vector<16x16xf32>
      %c50 = arith.constant 50 : index
      %279 = memref.load %arg2[%c50] : memref<98xf32, #tpu.memory_space<smem>>
      %280 = vector.extract_strided_slice %27 {offsets = [0, 1], sizes = [16, 16], strides = [1, 1]} : vector<22x22xf32> to vector<16x16xf32>
      %281 = vector.broadcast %279 : f32 to vector<16x16xf32>
      %282 = arith.mulf %281, %280 : vector<16x16xf32>
      %283 = arith.addf %278, %282 : vector<16x16xf32>
      %c51 = arith.constant 51 : index
      %284 = memref.load %arg2[%c51] : memref<98xf32, #tpu.memory_space<smem>>
      %285 = vector.extract_strided_slice %27 {offsets = [0, 2], sizes = [16, 16], strides = [1, 1]} : vector<22x22xf32> to vector<16x16xf32>
      %286 = vector.broadcast %284 : f32 to vector<16x16xf32>
      %287 = arith.mulf %286, %285 : vector<16x16xf32>
      %288 = arith.addf %283, %287 : vector<16x16xf32>
      %c52 = arith.constant 52 : index
      %289 = memref.load %arg2[%c52] : memref<98xf32, #tpu.memory_space<smem>>
      %290 = vector.extract_strided_slice %27 {offsets = [0, 3], sizes = [16, 16], strides = [1, 1]} : vector<22x22xf32> to vector<16x16xf32>
      %291 = vector.broadcast %289 : f32 to vector<16x16xf32>
      %292 = arith.mulf %291, %290 : vector<16x16xf32>
      %293 = arith.addf %288, %292 : vector<16x16xf32>
      %c53 = arith.constant 53 : index
      %294 = memref.load %arg2[%c53] : memref<98xf32, #tpu.memory_space<smem>>
      %295 = vector.extract_strided_slice %27 {offsets = [0, 4], sizes = [16, 16], strides = [1, 1]} : vector<22x22xf32> to vector<16x16xf32>
      %296 = vector.broadcast %294 : f32 to vector<16x16xf32>
      %297 = arith.mulf %296, %295 : vector<16x16xf32>
      %298 = arith.addf %293, %297 : vector<16x16xf32>
      %c54 = arith.constant 54 : index
      %299 = memref.load %arg2[%c54] : memref<98xf32, #tpu.memory_space<smem>>
      %300 = vector.extract_strided_slice %27 {offsets = [0, 5], sizes = [16, 16], strides = [1, 1]} : vector<22x22xf32> to vector<16x16xf32>
      %301 = vector.broadcast %299 : f32 to vector<16x16xf32>
      %302 = arith.mulf %301, %300 : vector<16x16xf32>
      %303 = arith.addf %298, %302 : vector<16x16xf32>
      %c55 = arith.constant 55 : index
      %304 = memref.load %arg2[%c55] : memref<98xf32, #tpu.memory_space<smem>>
      %305 = vector.extract_strided_slice %27 {offsets = [0, 6], sizes = [16, 16], strides = [1, 1]} : vector<22x22xf32> to vector<16x16xf32>
      %306 = vector.broadcast %304 : f32 to vector<16x16xf32>
      %307 = arith.mulf %306, %305 : vector<16x16xf32>
      %308 = arith.addf %303, %307 : vector<16x16xf32>
      %c56 = arith.constant 56 : index
      %309 = memref.load %arg2[%c56] : memref<98xf32, #tpu.memory_space<smem>>
      %310 = vector.extract_strided_slice %27 {offsets = [1, 0], sizes = [16, 16], strides = [1, 1]} : vector<22x22xf32> to vector<16x16xf32>
      %311 = vector.broadcast %309 : f32 to vector<16x16xf32>
      %312 = arith.mulf %311, %310 : vector<16x16xf32>
      %313 = arith.addf %308, %312 : vector<16x16xf32>
      %c57 = arith.constant 57 : index
      %314 = memref.load %arg2[%c57] : memref<98xf32, #tpu.memory_space<smem>>
      %315 = vector.extract_strided_slice %27 {offsets = [1, 1], sizes = [16, 16], strides = [1, 1]} : vector<22x22xf32> to vector<16x16xf32>
      %316 = vector.broadcast %314 : f32 to vector<16x16xf32>
      %317 = arith.mulf %316, %315 : vector<16x16xf32>
      %318 = arith.addf %313, %317 : vector<16x16xf32>
      %c58 = arith.constant 58 : index
      %319 = memref.load %arg2[%c58] : memref<98xf32, #tpu.memory_space<smem>>
      %320 = vector.extract_strided_slice %27 {offsets = [1, 2], sizes = [16, 16], strides = [1, 1]} : vector<22x22xf32> to vector<16x16xf32>
      %321 = vector.broadcast %319 : f32 to vector<16x16xf32>
      %322 = arith.mulf %321, %320 : vector<16x16xf32>
      %323 = arith.addf %318, %322 : vector<16x16xf32>
      %c59 = arith.constant 59 : index
      %324 = memref.load %arg2[%c59] : memref<98xf32, #tpu.memory_space<smem>>
      %325 = vector.extract_strided_slice %27 {offsets = [1, 3], sizes = [16, 16], strides = [1, 1]} : vector<22x22xf32> to vector<16x16xf32>
      %326 = vector.broadcast %324 : f32 to vector<16x16xf32>
      %327 = arith.mulf %326, %325 : vector<16x16xf32>
      %328 = arith.addf %323, %327 : vector<16x16xf32>
      %c60 = arith.constant 60 : index
      %329 = memref.load %arg2[%c60] : memref<98xf32, #tpu.memory_space<smem>>
      %330 = vector.extract_strided_slice %27 {offsets = [1, 4], sizes = [16, 16], strides = [1, 1]} : vector<22x22xf32> to vector<16x16xf32>
      %331 = vector.broadcast %329 : f32 to vector<16x16xf32>
      %332 = arith.mulf %331, %330 : vector<16x16xf32>
      %333 = arith.addf %328, %332 : vector<16x16xf32>
      %c61 = arith.constant 61 : index
      %334 = memref.load %arg2[%c61] : memref<98xf32, #tpu.memory_space<smem>>
      %335 = vector.extract_strided_slice %27 {offsets = [1, 5], sizes = [16, 16], strides = [1, 1]} : vector<22x22xf32> to vector<16x16xf32>
      %336 = vector.broadcast %334 : f32 to vector<16x16xf32>
      %337 = arith.mulf %336, %335 : vector<16x16xf32>
      %338 = arith.addf %333, %337 : vector<16x16xf32>
      %c62 = arith.constant 62 : index
      %339 = memref.load %arg2[%c62] : memref<98xf32, #tpu.memory_space<smem>>
      %340 = vector.extract_strided_slice %27 {offsets = [1, 6], sizes = [16, 16], strides = [1, 1]} : vector<22x22xf32> to vector<16x16xf32>
      %341 = vector.broadcast %339 : f32 to vector<16x16xf32>
      %342 = arith.mulf %341, %340 : vector<16x16xf32>
      %343 = arith.addf %338, %342 : vector<16x16xf32>
      %c63 = arith.constant 63 : index
      %344 = memref.load %arg2[%c63] : memref<98xf32, #tpu.memory_space<smem>>
      %345 = vector.extract_strided_slice %27 {offsets = [2, 0], sizes = [16, 16], strides = [1, 1]} : vector<22x22xf32> to vector<16x16xf32>
      %346 = vector.broadcast %344 : f32 to vector<16x16xf32>
      %347 = arith.mulf %346, %345 : vector<16x16xf32>
      %348 = arith.addf %343, %347 : vector<16x16xf32>
      %c64 = arith.constant 64 : index
      %349 = memref.load %arg2[%c64] : memref<98xf32, #tpu.memory_space<smem>>
      %350 = vector.extract_strided_slice %27 {offsets = [2, 1], sizes = [16, 16], strides = [1, 1]} : vector<22x22xf32> to vector<16x16xf32>
      %351 = vector.broadcast %349 : f32 to vector<16x16xf32>
      %352 = arith.mulf %351, %350 : vector<16x16xf32>
      %353 = arith.addf %348, %352 : vector<16x16xf32>
      %c65 = arith.constant 65 : index
      %354 = memref.load %arg2[%c65] : memref<98xf32, #tpu.memory_space<smem>>
      %355 = vector.extract_strided_slice %27 {offsets = [2, 2], sizes = [16, 16], strides = [1, 1]} : vector<22x22xf32> to vector<16x16xf32>
      %356 = vector.broadcast %354 : f32 to vector<16x16xf32>
      %357 = arith.mulf %356, %355 : vector<16x16xf32>
      %358 = arith.addf %353, %357 : vector<16x16xf32>
      %c66 = arith.constant 66 : index
      %359 = memref.load %arg2[%c66] : memref<98xf32, #tpu.memory_space<smem>>
      %360 = vector.extract_strided_slice %27 {offsets = [2, 3], sizes = [16, 16], strides = [1, 1]} : vector<22x22xf32> to vector<16x16xf32>
      %361 = vector.broadcast %359 : f32 to vector<16x16xf32>
      %362 = arith.mulf %361, %360 : vector<16x16xf32>
      %363 = arith.addf %358, %362 : vector<16x16xf32>
      %c67 = arith.constant 67 : index
      %364 = memref.load %arg2[%c67] : memref<98xf32, #tpu.memory_space<smem>>
      %365 = vector.extract_strided_slice %27 {offsets = [2, 4], sizes = [16, 16], strides = [1, 1]} : vector<22x22xf32> to vector<16x16xf32>
      %366 = vector.broadcast %364 : f32 to vector<16x16xf32>
      %367 = arith.mulf %366, %365 : vector<16x16xf32>
      %368 = arith.addf %363, %367 : vector<16x16xf32>
      %c68 = arith.constant 68 : index
      %369 = memref.load %arg2[%c68] : memref<98xf32, #tpu.memory_space<smem>>
      %370 = vector.extract_strided_slice %27 {offsets = [2, 5], sizes = [16, 16], strides = [1, 1]} : vector<22x22xf32> to vector<16x16xf32>
      %371 = vector.broadcast %369 : f32 to vector<16x16xf32>
      %372 = arith.mulf %371, %370 : vector<16x16xf32>
      %373 = arith.addf %368, %372 : vector<16x16xf32>
      %c69 = arith.constant 69 : index
      %374 = memref.load %arg2[%c69] : memref<98xf32, #tpu.memory_space<smem>>
      %375 = vector.extract_strided_slice %27 {offsets = [2, 6], sizes = [16, 16], strides = [1, 1]} : vector<22x22xf32> to vector<16x16xf32>
      %376 = vector.broadcast %374 : f32 to vector<16x16xf32>
      %377 = arith.mulf %376, %375 : vector<16x16xf32>
      %378 = arith.addf %373, %377 : vector<16x16xf32>
      %c70 = arith.constant 70 : index
      %379 = memref.load %arg2[%c70] : memref<98xf32, #tpu.memory_space<smem>>
      %380 = vector.extract_strided_slice %27 {offsets = [3, 0], sizes = [16, 16], strides = [1, 1]} : vector<22x22xf32> to vector<16x16xf32>
      %381 = vector.broadcast %379 : f32 to vector<16x16xf32>
      %382 = arith.mulf %381, %380 : vector<16x16xf32>
      %383 = arith.addf %378, %382 : vector<16x16xf32>
      %c71 = arith.constant 71 : index
      %384 = memref.load %arg2[%c71] : memref<98xf32, #tpu.memory_space<smem>>
      %385 = vector.extract_strided_slice %27 {offsets = [3, 1], sizes = [16, 16], strides = [1, 1]} : vector<22x22xf32> to vector<16x16xf32>
      %386 = vector.broadcast %384 : f32 to vector<16x16xf32>
      %387 = arith.mulf %386, %385 : vector<16x16xf32>
      %388 = arith.addf %383, %387 : vector<16x16xf32>
      %c72 = arith.constant 72 : index
      %389 = memref.load %arg2[%c72] : memref<98xf32, #tpu.memory_space<smem>>
      %390 = vector.extract_strided_slice %27 {offsets = [3, 2], sizes = [16, 16], strides = [1, 1]} : vector<22x22xf32> to vector<16x16xf32>
      %391 = vector.broadcast %389 : f32 to vector<16x16xf32>
      %392 = arith.mulf %391, %390 : vector<16x16xf32>
      %393 = arith.addf %388, %392 : vector<16x16xf32>
      %c73 = arith.constant 73 : index
      %394 = memref.load %arg2[%c73] : memref<98xf32, #tpu.memory_space<smem>>
      %395 = vector.extract_strided_slice %27 {offsets = [3, 3], sizes = [16, 16], strides = [1, 1]} : vector<22x22xf32> to vector<16x16xf32>
      %396 = vector.broadcast %394 : f32 to vector<16x16xf32>
      %397 = arith.mulf %396, %395 : vector<16x16xf32>
      %398 = arith.addf %393, %397 : vector<16x16xf32>
      %c74 = arith.constant 74 : index
      %399 = memref.load %arg2[%c74] : memref<98xf32, #tpu.memory_space<smem>>
      %400 = vector.extract_strided_slice %27 {offsets = [3, 4], sizes = [16, 16], strides = [1, 1]} : vector<22x22xf32> to vector<16x16xf32>
      %401 = vector.broadcast %399 : f32 to vector<16x16xf32>
      %402 = arith.mulf %401, %400 : vector<16x16xf32>
      %403 = arith.addf %398, %402 : vector<16x16xf32>
      %c75 = arith.constant 75 : index
      %404 = memref.load %arg2[%c75] : memref<98xf32, #tpu.memory_space<smem>>
      %405 = vector.extract_strided_slice %27 {offsets = [3, 5], sizes = [16, 16], strides = [1, 1]} : vector<22x22xf32> to vector<16x16xf32>
      %406 = vector.broadcast %404 : f32 to vector<16x16xf32>
      %407 = arith.mulf %406, %405 : vector<16x16xf32>
      %408 = arith.addf %403, %407 : vector<16x16xf32>
      %c76 = arith.constant 76 : index
      %409 = memref.load %arg2[%c76] : memref<98xf32, #tpu.memory_space<smem>>
      %410 = vector.extract_strided_slice %27 {offsets = [3, 6], sizes = [16, 16], strides = [1, 1]} : vector<22x22xf32> to vector<16x16xf32>
      %411 = vector.broadcast %409 : f32 to vector<16x16xf32>
      %412 = arith.mulf %411, %410 : vector<16x16xf32>
      %413 = arith.addf %408, %412 : vector<16x16xf32>
      %c77 = arith.constant 77 : index
      %414 = memref.load %arg2[%c77] : memref<98xf32, #tpu.memory_space<smem>>
      %415 = vector.extract_strided_slice %27 {offsets = [4, 0], sizes = [16, 16], strides = [1, 1]} : vector<22x22xf32> to vector<16x16xf32>
      %416 = vector.broadcast %414 : f32 to vector<16x16xf32>
      %417 = arith.mulf %416, %415 : vector<16x16xf32>
      %418 = arith.addf %413, %417 : vector<16x16xf32>
      %c78 = arith.constant 78 : index
      %419 = memref.load %arg2[%c78] : memref<98xf32, #tpu.memory_space<smem>>
      %420 = vector.extract_strided_slice %27 {offsets = [4, 1], sizes = [16, 16], strides = [1, 1]} : vector<22x22xf32> to vector<16x16xf32>
      %421 = vector.broadcast %419 : f32 to vector<16x16xf32>
      %422 = arith.mulf %421, %420 : vector<16x16xf32>
      %423 = arith.addf %418, %422 : vector<16x16xf32>
      %c79 = arith.constant 79 : index
      %424 = memref.load %arg2[%c79] : memref<98xf32, #tpu.memory_space<smem>>
      %425 = vector.extract_strided_slice %27 {offsets = [4, 2], sizes = [16, 16], strides = [1, 1]} : vector<22x22xf32> to vector<16x16xf32>
      %426 = vector.broadcast %424 : f32 to vector<16x16xf32>
      %427 = arith.mulf %426, %425 : vector<16x16xf32>
      %428 = arith.addf %423, %427 : vector<16x16xf32>
      %c80 = arith.constant 80 : index
      %429 = memref.load %arg2[%c80] : memref<98xf32, #tpu.memory_space<smem>>
      %430 = vector.extract_strided_slice %27 {offsets = [4, 3], sizes = [16, 16], strides = [1, 1]} : vector<22x22xf32> to vector<16x16xf32>
      %431 = vector.broadcast %429 : f32 to vector<16x16xf32>
      %432 = arith.mulf %431, %430 : vector<16x16xf32>
      %433 = arith.addf %428, %432 : vector<16x16xf32>
      %c81 = arith.constant 81 : index
      %434 = memref.load %arg2[%c81] : memref<98xf32, #tpu.memory_space<smem>>
      %435 = vector.extract_strided_slice %27 {offsets = [4, 4], sizes = [16, 16], strides = [1, 1]} : vector<22x22xf32> to vector<16x16xf32>
      %436 = vector.broadcast %434 : f32 to vector<16x16xf32>
      %437 = arith.mulf %436, %435 : vector<16x16xf32>
      %438 = arith.addf %433, %437 : vector<16x16xf32>
      %c82 = arith.constant 82 : index
      %439 = memref.load %arg2[%c82] : memref<98xf32, #tpu.memory_space<smem>>
      %440 = vector.extract_strided_slice %27 {offsets = [4, 5], sizes = [16, 16], strides = [1, 1]} : vector<22x22xf32> to vector<16x16xf32>
      %441 = vector.broadcast %439 : f32 to vector<16x16xf32>
      %442 = arith.mulf %441, %440 : vector<16x16xf32>
      %443 = arith.addf %438, %442 : vector<16x16xf32>
      %c83 = arith.constant 83 : index
      %444 = memref.load %arg2[%c83] : memref<98xf32, #tpu.memory_space<smem>>
      %445 = vector.extract_strided_slice %27 {offsets = [4, 6], sizes = [16, 16], strides = [1, 1]} : vector<22x22xf32> to vector<16x16xf32>
      %446 = vector.broadcast %444 : f32 to vector<16x16xf32>
      %447 = arith.mulf %446, %445 : vector<16x16xf32>
      %448 = arith.addf %443, %447 : vector<16x16xf32>
      %c84 = arith.constant 84 : index
      %449 = memref.load %arg2[%c84] : memref<98xf32, #tpu.memory_space<smem>>
      %450 = vector.extract_strided_slice %27 {offsets = [5, 0], sizes = [16, 16], strides = [1, 1]} : vector<22x22xf32> to vector<16x16xf32>
      %451 = vector.broadcast %449 : f32 to vector<16x16xf32>
      %452 = arith.mulf %451, %450 : vector<16x16xf32>
      %453 = arith.addf %448, %452 : vector<16x16xf32>
      %c85 = arith.constant 85 : index
      %454 = memref.load %arg2[%c85] : memref<98xf32, #tpu.memory_space<smem>>
      %455 = vector.extract_strided_slice %27 {offsets = [5, 1], sizes = [16, 16], strides = [1, 1]} : vector<22x22xf32> to vector<16x16xf32>
      %456 = vector.broadcast %454 : f32 to vector<16x16xf32>
      %457 = arith.mulf %456, %455 : vector<16x16xf32>
      %458 = arith.addf %453, %457 : vector<16x16xf32>
      %c86 = arith.constant 86 : index
      %459 = memref.load %arg2[%c86] : memref<98xf32, #tpu.memory_space<smem>>
      %460 = vector.extract_strided_slice %27 {offsets = [5, 2], sizes = [16, 16], strides = [1, 1]} : vector<22x22xf32> to vector<16x16xf32>
      %461 = vector.broadcast %459 : f32 to vector<16x16xf32>
      %462 = arith.mulf %461, %460 : vector<16x16xf32>
      %463 = arith.addf %458, %462 : vector<16x16xf32>
      %c87 = arith.constant 87 : index
      %464 = memref.load %arg2[%c87] : memref<98xf32, #tpu.memory_space<smem>>
      %465 = vector.extract_strided_slice %27 {offsets = [5, 3], sizes = [16, 16], strides = [1, 1]} : vector<22x22xf32> to vector<16x16xf32>
      %466 = vector.broadcast %464 : f32 to vector<16x16xf32>
      %467 = arith.mulf %466, %465 : vector<16x16xf32>
      %468 = arith.addf %463, %467 : vector<16x16xf32>
      %c88 = arith.constant 88 : index
      %469 = memref.load %arg2[%c88] : memref<98xf32, #tpu.memory_space<smem>>
      %470 = vector.extract_strided_slice %27 {offsets = [5, 4], sizes = [16, 16], strides = [1, 1]} : vector<22x22xf32> to vector<16x16xf32>
      %471 = vector.broadcast %469 : f32 to vector<16x16xf32>
      %472 = arith.mulf %471, %470 : vector<16x16xf32>
      %473 = arith.addf %468, %472 : vector<16x16xf32>
      %c89 = arith.constant 89 : index
      %474 = memref.load %arg2[%c89] : memref<98xf32, #tpu.memory_space<smem>>
      %475 = vector.extract_strided_slice %27 {offsets = [5, 5], sizes = [16, 16], strides = [1, 1]} : vector<22x22xf32> to vector<16x16xf32>
      %476 = vector.broadcast %474 : f32 to vector<16x16xf32>
      %477 = arith.mulf %476, %475 : vector<16x16xf32>
      %478 = arith.addf %473, %477 : vector<16x16xf32>
      %c90 = arith.constant 90 : index
      %479 = memref.load %arg2[%c90] : memref<98xf32, #tpu.memory_space<smem>>
      %480 = vector.extract_strided_slice %27 {offsets = [5, 6], sizes = [16, 16], strides = [1, 1]} : vector<22x22xf32> to vector<16x16xf32>
      %481 = vector.broadcast %479 : f32 to vector<16x16xf32>
      %482 = arith.mulf %481, %480 : vector<16x16xf32>
      %483 = arith.addf %478, %482 : vector<16x16xf32>
      %c91 = arith.constant 91 : index
      %484 = memref.load %arg2[%c91] : memref<98xf32, #tpu.memory_space<smem>>
      %485 = vector.extract_strided_slice %27 {offsets = [6, 0], sizes = [16, 16], strides = [1, 1]} : vector<22x22xf32> to vector<16x16xf32>
      %486 = vector.broadcast %484 : f32 to vector<16x16xf32>
      %487 = arith.mulf %486, %485 : vector<16x16xf32>
      %488 = arith.addf %483, %487 : vector<16x16xf32>
      %c92 = arith.constant 92 : index
      %489 = memref.load %arg2[%c92] : memref<98xf32, #tpu.memory_space<smem>>
      %490 = vector.extract_strided_slice %27 {offsets = [6, 1], sizes = [16, 16], strides = [1, 1]} : vector<22x22xf32> to vector<16x16xf32>
      %491 = vector.broadcast %489 : f32 to vector<16x16xf32>
      %492 = arith.mulf %491, %490 : vector<16x16xf32>
      %493 = arith.addf %488, %492 : vector<16x16xf32>
      %c93 = arith.constant 93 : index
      %494 = memref.load %arg2[%c93] : memref<98xf32, #tpu.memory_space<smem>>
      %495 = vector.extract_strided_slice %27 {offsets = [6, 2], sizes = [16, 16], strides = [1, 1]} : vector<22x22xf32> to vector<16x16xf32>
      %496 = vector.broadcast %494 : f32 to vector<16x16xf32>
      %497 = arith.mulf %496, %495 : vector<16x16xf32>
      %498 = arith.addf %493, %497 : vector<16x16xf32>
      %c94 = arith.constant 94 : index
      %499 = memref.load %arg2[%c94] : memref<98xf32, #tpu.memory_space<smem>>
      %500 = vector.extract_strided_slice %27 {offsets = [6, 3], sizes = [16, 16], strides = [1, 1]} : vector<22x22xf32> to vector<16x16xf32>
      %501 = vector.broadcast %499 : f32 to vector<16x16xf32>
      %502 = arith.mulf %501, %500 : vector<16x16xf32>
      %503 = arith.addf %498, %502 : vector<16x16xf32>
      %c95 = arith.constant 95 : index
      %504 = memref.load %arg2[%c95] : memref<98xf32, #tpu.memory_space<smem>>
      %505 = vector.extract_strided_slice %27 {offsets = [6, 4], sizes = [16, 16], strides = [1, 1]} : vector<22x22xf32> to vector<16x16xf32>
      %506 = vector.broadcast %504 : f32 to vector<16x16xf32>
      %507 = arith.mulf %506, %505 : vector<16x16xf32>
      %508 = arith.addf %503, %507 : vector<16x16xf32>
      %c96 = arith.constant 96 : index
      %509 = memref.load %arg2[%c96] : memref<98xf32, #tpu.memory_space<smem>>
      %510 = vector.extract_strided_slice %27 {offsets = [6, 5], sizes = [16, 16], strides = [1, 1]} : vector<22x22xf32> to vector<16x16xf32>
      %511 = vector.broadcast %509 : f32 to vector<16x16xf32>
      %512 = arith.mulf %511, %510 : vector<16x16xf32>
      %513 = arith.addf %508, %512 : vector<16x16xf32>
      %c97 = arith.constant 97 : index
      %514 = memref.load %arg2[%c97] : memref<98xf32, #tpu.memory_space<smem>>
      %515 = vector.extract_strided_slice %27 {offsets = [6, 6], sizes = [16, 16], strides = [1, 1]} : vector<22x22xf32> to vector<16x16xf32>
      %516 = vector.broadcast %514 : f32 to vector<16x16xf32>
      %517 = arith.mulf %516, %515 : vector<16x16xf32>
      %518 = arith.addf %513, %517 : vector<16x16xf32>
      %519 = arith.negf %518 : vector<16x16xf32>
      %520 = math.exp %519 : vector<16x16xf32>
      %cst_25 = arith.constant 1.000000e+00 : f32
      %521 = vector.broadcast %cst_25 : f32 to vector<16x16xf32>
      %522 = arith.addf %521, %520 : vector<16x16xf32>
      %523 = arith.divf %521, %522 : vector<16x16xf32>
      %c0_26 = arith.constant 0 : index
      %c0_27 = arith.constant 0 : index
      %c0_28 = arith.constant 0 : index
      %524 = vector.load %arg4[%c0_26, %c0_27, %c0_28] : memref<1x16x16xf32, #tpu.memory_space<vmem>>, vector<1x16x16xf32>
      %525 = vector.shape_cast %524 : vector<1x16x16xf32> to vector<16x16xf32>
      %526 = vector.shape_cast %523 : vector<16x16xf32> to vector<1x16x16xf32>
      tpu.vector_store %arg4[%c0_26, %c0_27, %c0_28], %526 {strides = array<i32>} : memref<1x16x16xf32, #tpu.memory_space<vmem>>, vector<1x16x16xf32>,
    } else {
    }
    return
  }
  func.func @transform_0(%arg0: i32, %arg1: i32) -> i32 {
    %c0_i32 = arith.constant 0 : i32
    %c0_i32_0 = arith.constant 0 : i32
    return %c0_i32 : i32
  }
  func.func @transform_1(%arg0: i32, %arg1: i32) -> (i32, i32, i32, i32) {
    %c0_i32 = arith.constant 0 : i32
    %c0_i32_0 = arith.constant 0 : i32
    %c0_i32_1 = arith.constant 0 : i32
    return %arg0, %arg1, %c0_i32, %c0_i32_0 : i32, i32, i32, i32
  }
  func.func @transform_2(%arg0: i32, %arg1: i32) -> (i32, i32, i32) {
    %c0_i32 = arith.constant 0 : i32
    %c0_i32_0 = arith.constant 0 : i32
    %c0_i32_1 = arith.constant 0 : i32
    return %arg0, %c0_i32, %c0_i32_0 : i32, i32, i32
  }
}

</mosaic_0001>

<bundles_post_ra>
// kernel: tpu_custom_call.1
= control target key start
LH: loop header
LB: loop body
LE: loop exit
PB: predicated region body
PF: predicated region fallthrough
CT: control target
= control target key end

     0   :  { %7 = vsyncpa [#allocation6], 0  ;;  %s3941_s0 = inlined_call_operand.vmem [shape: f32[98], index: 0, kind: input, shape index: {}]   ;;  %s3942_s1 = inlined_call_operand.vmem [shape: f32[2,64,16,16], index: 1, kind: input, shape index: {}]   ;;  %s3943_s2 = inlined_call_operand.hbm [shape: f32[2,16,16], index: 2, kind: output, shape index: {}]  }
   0x1   :  { %8 = vsyncpa [#allocation5], 0 }
   0x2   :  { %10 = vsyncpa [#allocation5 + $0x1], 0  ;;  %s2835_s9 = smov 0   ;;  %s2837_s10 = smov 0  }
   0x3   :  { %s2839_s11 = smov 0   ;;  %s2841_s12 = smov 0  }
   0x4   :  { %s2843_s13 = smov 0   ;;  %s2845_s14 = smov 0  }
   0x5   :  { %s2847_s15 = smov 0   ;;  %s2849_s16 = smov 0  }
   0x6 LB: > { %s2473_s17 = sadd.s32 4294967295, %s2806_s16   ;;  %s2474_s18 = sadd.s32 4294967294, %s2806_s16   ;;  %s2806_s16 = sphi %s2849_s16, %s16_s16   ;;  %s2802_s15 = sphi %s2847_s15, %s3952_s15   ;;  %s2798_s14 = sphi %s2845_s14, %s3951_s14   ;;  %s2794_s13 = sphi %s2843_s13, %s3950_s13   ;;  %s2790_s12 = sphi %s2841_s12, %s3949_s12   ;;  %s2786_s11 = sphi %s2839_s11, %s3948_s11   ;;  %s2782_s10 = sphi %s2837_s10, %s3947_s10   ;;  %s2778_s9 = sphi %s2835_s9, %s3946_s9  }
   0x7   : > { %s25_s19 = sadd.s32 1, %s2798_s14  ;;  %s28_s20 = sadd.s32 1, %s2802_s15 }
   0x8   : > { %p26_p0 = scmp.ge.s32.totalorder %s25_s19, 4  ;;  %s84_s21 = sadd.s32 1, %s2786_s11 }
   0x9   : > { %p94_p1 = scmp.ne.s32.totalorder %s2786_s11, %s2782_s10  ;;  %p95_p2 = scmp.eq.s32.totalorder %s2473_s17, 7 }
   0xa   : > { %s3954_s19 = smov (%p26_p0, %s25_s19), 0  ;;  %s3956_s20 = smov (!%p26_p0, %s28_s20), %s2802_s15 }
   0xb   : > { %p2885_p3 = por %p95_p2, %p94_p1  ;;  %p100_p4 = scmp.ne.s32.totalorder %s2782_s10, %s2778_s9 }
   0xc   : > { %p30_p5 = scmp.ge.s32.totalorder %s3956_s20, 2  ;;  %p101_p6 = scmp.eq.s32.totalorder %s2474_s18, 7 }
   0xd   : > { %p2475_p7 = scmp.ge.s32.totalorder %s2806_s16, 1  ;;  %p108_p8 = scmp.lt.s32.totalorder %s2806_s16, 9 }
   0xe   : > { %s3958_s20 = smov (%p30_p5, %s3956_s20), 0  ;;  %p2895_p9 = por %p101_p6, %p100_p4 }
   0xf   : > { %p109_p10 = pnand %p2475_p7, %p108_p8  ;;  %s81_s24 = ssub.s32 %s2802_s15, %s3958_s20 }
  0x10   : > { %p82_p11 = scmp.eq.s32.totalorder %s81_s24, 0  ;;  %p2606_p13 = scmp.eq.s32.totalorder %s2473_s17, 0 }
  0x11   : > { %p2598_p12 = pneg %p109_p10  ;;  %s120_s27 = sshll.u32 %s3941_s0, 4  ;;  %s121_s27 = int_to_ptr.vmem [resolvable:$true] %s120_s27 }
  0x12   : > { %s2905_s28 = scalar_select %p82_p11, %s2786_s11, %s84_s21  }
  0x13   : > { %p2599_p0 = pnand %p2606_p13, %p2598_p12  ;;  %s2808_s29 = smov [#allocation4]  }
  0x14   : > { %147 = sbr.rel (%p109_p10) target bundleno = 814 (0x32e), region = 28 }
  0x15   : > { %2601 = dma.vmem_to_smem (!%p2599_p0), %s121_s27, 16, %s2808_s29, [#allocation6]  }
  0x19   : > { %2769 = dma.done.wait (%p2606_p13), [#allocation6], 16  }
  0x1a   : > { %2771 = vsyncadd (%p2606_p13), [#allocation6], 4294967280 }
  0x1b   : > { %154 = sfence }
  0x1c   : > { %s173_s30 = sand.u32 1, %s2782_s10   ;;  %s2481_s3 = sshll.u32 %s2790_s12, 4 }
  0x1d   : > { %s2480_s4 = sshll.u32 %s173_s30, 4  ;;  %p177_p1 = scmp.lt.s32.totalorder %s2794_s13, 1 }
  0x1e   : > { %p179_p2 = scmp.lt.s32.totalorder %s2481_s3, 63  ;;  %s2918_s25 = scalar_lea.vmem [#allocation7], %s2480_s4 }
  0x1f   : > { %s178_s5 = scalar_select %p177_p1, %s2794_s13, 1 }
  0x20   : > { %s3960_s3 = smov (!%p179_p2, %s2481_s3), 63  ;;  %p2485_p4 = scmp.ne.s32.totalorder %s2790_s12, 0 }
  0x21   : > { %s2483_s6 = sshll.u32 %s178_s5, 7  ;;  %s2482_s7 = sshll.u32 %s3960_s3, 1 }
  0x22   : > { %s183_s8 = sadd.s32 %s2483_s6, %s2482_s7  ;;  %190 = sbr.rel (%p2485_p4) target bundleno = 44 (0x2c), region = 36 }
  0x23   : > { %s2484_s17 = sshll.u32 %s183_s8, 3 }
  0x24   : > { %s2916_s24 = scalar_lea.vmem %s3942_s1, %s2484_s17 }
  0x27   : > { %vm191_vm0 = vcmask 130048   ;;  %v2809_v0 = vmov 0.0   ;;  %v2810_v1 = vmov -inf  }
  0x28   : > { %192 = vst.msk [vmem:[#allocation2] sm:$0xff] %vm191_vm0, %v2809_v0 }
  0x29   : > { %193 = vst.msk [vmem:[#allocation2 + $0x8] sm:$0xff] %vm191_vm0, %v2809_v0 }
  0x2a   : > { %194 = vst.msk [vmem:[#allocation3] sm:$0xff] %vm191_vm0, %v2810_v1 }
  0x2b   : > { %195 = vst.msk [vmem:[#allocation3 + $0x8] sm:$0xff] %vm191_vm0, %v2810_v1 }
  0x2c PF: > { %v196_v2 = vld [vmem:[%s2916_s24] sm:$0xff]  ;;  %v2923_v3 = vld [vmem:[%s2916_s24 + $0x10] sm:$0xff]  ;;  %vm230_vm1 = vcmask 130048   ;;  %v2984_v29 = vld [vmem:[%s2916_s24 + $0x8] sm:$0xff]  ;;  %p2486_p5 = scmp.ne.s32.totalorder %s2790_s12, 3 }
  0x2d   : > { %v2926_v4 = vld [vmem:[%s2916_s24 + $0x20] sm:$0xff]  ;;  %v2929_v5 = vld [vmem:[%s2916_s24 + $0x30] sm:$0xff]  ;;  %v231_v8 = vsel %vm230_vm1, %v196_v2, 0.0  ;;  %v232_v9 = vsel %vm230_vm1, %v2923_v3, 0.0  ;;  %v199_v34 = vld [vmem:[%s2916_s24 + $0x18] sm:$0xff]  ;;  %v262_v37 = vsel %vm230_vm1, %v2984_v29, 0.0 }
  0x2e   : > { %v2932_v6 = vld [vmem:[%s2916_s24 + $0x40] sm:$0xff]  ;;  %v2935_v7 = vld [vmem:[%s2916_s24 + $0x50] sm:$0xff]  ;;  %v234_v10 = vsel %vm230_vm1, %v2926_v4, 0.0  ;;  %v233_v14 = vadd.f32 %v232_v9, %v231_v8  ;;  %v236_v18 = vsel %vm230_vm1, %v2929_v5, 0.0  ;;  %v2999_v35 = vld [vmem:[%s2916_s24 + $0x28] sm:$0xff]  ;;  %v263_v42 = vsel %vm230_vm1, %v199_v34, 0.0 }
  0x2f   : > { %v2943_v11 = vld [vmem:[%s2916_s24 + $0x60] sm:$0xff]  ;;  %v2946_v12 = vld [vmem:[%s2916_s24 + $0x70] sm:$0xff]  ;;  %v238_v21 = vsel %vm230_vm1, %v2932_v6, 0.0  ;;  %v240_v22 = vsel %vm230_vm1, %v2935_v7, 0.0  ;;  %v3002_v36 = vld [vmem:[%s2916_s24 + $0x38] sm:$0xff]  ;;  %v265_v43 = vsel %vm230_vm1, %v2999_v35, 0.0  ;;  %v264_v50 = vadd.f32 %v263_v42, %v262_v37 }
  0x30   : > { %v2949_v13 = vld [vmem:[%s2916_s24 + $0x80] sm:$0xff]  ;;  %v2952_v15 = vld [vmem:[%s2916_s24 + $0x90] sm:$0xff]  ;;  %v235_v20 = vadd.f32 %v234_v10, %v233_v14  ;;  %v242_v23 = vsel %vm230_vm1, %v2943_v11, 0.0  ;;  %v244_v26 = vsel %vm230_vm1, %v2946_v12, 0.0  ;;  %v3011_v39 = vld [vmem:[%s2916_s24 + $0x48] sm:$0xff]  ;;  %v267_v54 = vsel %vm230_vm1, %v3002_v36, 0.0 }
  0x31   : > { %v2955_v16 = vld [vmem:[%s2916_s24 + $0xa0] sm:$0xff]  ;;  %v2958_v17 = vld [vmem:[%s2916_s24 + $0xb0] sm:$0xff]  ;;  %v246_v27 = vsel %vm230_vm1, %v2949_v13, 0.0  ;;  %v248_v28 = vsel %vm230_vm1, %v2952_v15, 0.0  ;;  %v3014_v40 = vld [vmem:[%s2916_s24 + $0x58] sm:$0xff]  ;;  %v269_v55 = vsel %vm230_vm1, %v3011_v39, 0.0  ;;  %v266_v58 = vadd.f32 %v265_v43, %v264_v50 }
  0x32   : > { %v2963_v19 = vld [vmem:[%s2916_s24 + $0xc0] sm:$0xff]  ;;  %v2972_v24 = vld [vmem:[%s2916_s24 + $0xd0] sm:$0xff]  ;;  %v237_v31 = vadd.f32 %v236_v18, %v235_v20  ;;  %v2991_v32 = vsel %vm230_vm1, %v2955_v16, 0.0  ;;  %v2995_v33 = vsel %vm230_vm1, %v2958_v17, 0.0  ;;  %v3017_v41 = vld [vmem:[%s2916_s24 + $0x68] sm:$0xff]  ;;  %v299_v56 = vsel %vm230_vm1, %v196_v2, -inf }
  0x33   : > { %v2975_v25 = vld [vmem:[%s2916_s24 + $0xe0] sm:$0xff]  ;;  %v2987_v30 = vld [vmem:[%s2916_s24 + $0xf0] sm:$0xff]  ;;  %v3008_v38 = vsel %vm230_vm1, %v2963_v19, 0.0  ;;  %v3024_v45 = vsel %vm230_vm1, %v2972_v24, 0.0  ;;  %v3031_v47 = vld [vmem:[%s2916_s24 + $0x78] sm:$0xff]  ;;  %v271_v59 = vsel %vm230_vm1, %v3014_v40, 0.0  ;;  %v268_v2 = vadd.f32 %v267_v54, %v266_v58 }
  0x34   : > { %v239_v44 = vadd.f32 %v238_v21, %v237_v31  ;;  %v3028_v46 = vsel %vm230_vm1, %v2975_v25, 0.0  ;;  %v3034_v48 = vld [vmem:[%s2916_s24 + $0x88] sm:$0xff]  ;;  %v3037_v49 = vld [vmem:[%s2916_s24 + $0x98] sm:$0xff]  ;;  %v3041_v51 = vsel %vm230_vm1, %v2987_v30, 0.0  ;;  %v273_v60 = vsel %vm230_vm1, %v3017_v41, 0.0  ;;  %s2811_s26 = smov (!%p2486_p5), 3  }
  0x35   : > { %v3044_v52 = vld [vmem:[%s2916_s24 + $0xa8] sm:$0xff]  ;;  %v3047_v53 = vld [vmem:[%s2916_s24 + $0xb8] sm:$0xff]  ;;  %v275_v61 = vsel %vm230_vm1, %v3031_v47, 0.0  ;;  %v277_v62 = vsel %vm230_vm1, %v3034_v48, 0.0  ;;  %v279_v63 = vsel %vm230_vm1, %v3037_v49, 0.0  ;;  %v300_v9 = vsel %vm230_vm1, %v2923_v3, -inf }
  0x36   : > { %v241_v57 = vadd.f32 %v240_v22, %v239_v44  ;;  %v281_v0 = vsel %vm230_vm1, %v3044_v52, 0.0  ;;  %v3068_v8 = vsel %vm230_vm1, %v3047_v53, 0.0  ;;  %v301_v10 = vsel %vm230_vm1, %v2926_v4, -inf  ;;  %s2488_s27 = sld [smem:[#allocation4 + $0x2]] (!%p2486_p5)  ;;  %s2812_s3 = smov (!%p2486_p5), 126  }
  0x37   : > { %v303_v14 = vsel %vm230_vm1, %v2929_v5, -inf  ;;  %v305_v18 = vsel %vm230_vm1, %v2932_v6, -inf  ;;  %v307_v20 = vsel %vm230_vm1, %v2935_v7, -inf  ;;  %v270_v22 = vadd.f32 %v269_v55, %v268_v2  ;;  %s2487_s29 = sld [smem:[#allocation4 + $0x1]] (!%p2486_p5)  ;;  %s2813_s4 = smov (!%p2486_p5), 127  }
  0x38   : > { %v243_v1 = vadd.f32 %v242_v23, %v241_v57  ;;  %v302_v23 = vmax.f32 %v299_v56, %v301_v10  ;;  %v304_v31 = vmax.f32 %v300_v9, %v303_v14  ;;  %v309_v37 = vsel %vm230_vm1, %v2943_v11, -inf  ;;  %s2489_s12 = sld [smem:[#allocation4 + $0x3]] (!%p2486_p5)  ;;  %s2814_s7 = smov (!%p2486_p5), 125  }
  0x39   : > { %v311_v3 = vsel %vm230_vm1, %v2946_v12, -inf  ;;  %v313_v4 = vsel %vm230_vm1, %v2949_v13, -inf  ;;  %v315_v5 = vsel %vm230_vm1, %v2952_v15, -inf  ;;  %v272_v42 = vadd.f32 %v271_v59, %v270_v22  ;;  %s2491_s5 = sld [smem:[#allocation4 + $0x5]] (!%p2486_p5)  ;;  %s2815_s21 = smov (!%p2486_p5), 123  }
  0x3a   : > { %v245_v21 = vadd.f32 %v244_v26, %v243_v1  ;;  %v306_v43 = vmax.f32 %v302_v23, %v305_v18  ;;  %v308_v7 = vmax.f32 %v304_v31, %v307_v20  ;;  %v317_v26 = vsel %vm230_vm1, %v2955_v16, -inf  ;;  %v223_v18 = vld [vmem:[%s2916_s24 + $0xd8] sm:$0xff]  ;;  %s2490_s6 = sld [smem:[#allocation4 + $0x4]] (!%p2486_p5) }
  0x3b   : > { %v319_v44 = vsel %vm230_vm1, %v2958_v17, -inf  ;;  %v321_v11 = vsel %vm230_vm1, %v2963_v19, -inf  ;;  %v323_v12 = vsel %vm230_vm1, %v2972_v24, -inf  ;;  %v274_v50 = vadd.f32 %v273_v60, %v272_v42  ;;  %s3167_s8 = sld [smem:[#allocation4 + $0x6]] (!%p2486_p5) }
  0x3c   : > { %v247_v6 = vadd.f32 %v246_v27, %v245_v21  ;;  %v310_v54 = vmax.f32 %v306_v43, %v309_v37  ;;  %v312_v15 = vmax.f32 %v308_v7, %v311_v3  ;;  %v325_v27 = vsel %vm230_vm1, %v2975_v25, -inf  ;;  %v297_v21 = vld [vmem:[#allocation3] sm:$0xff]  ;;  %v225_v37 = vld [vmem:[%s2916_s24 + $0xe8] sm:$0xff]  ;;  %s2495_s17 = sld [smem:[#allocation4 + $0x9]] (!%p2486_p5) }
  0x3d   : > { %v327_v55 = vsel %vm230_vm1, %v2987_v30, -inf  ;;  %v330_v16 = vsel %vm230_vm1, %v2984_v29, -inf  ;;  %v331_v17 = vsel %vm230_vm1, %v199_v34, -inf  ;;  %v276_v56 = vadd.f32 %v275_v61, %v274_v50  ;;  %s2494_s18 = sld [smem:[#allocation4 + $0x8]] (!%p2486_p5) }
  0x3e   : > { %v249_v13 = vadd.f32 %v248_v28, %v247_v6  ;;  %v314_v24 = vmax.f32 %v310_v54, %v313_v4  ;;  %v316_v28 = vmax.f32 %v312_v15, %v315_v5  ;;  %v332_v57 = vsel %vm230_vm1, %v2999_v35, -inf  ;;  %v227_v4 = vld [vmem:[%s2916_s24 + $0xf8] sm:$0xff] }
  0x3f   : > { %v334_v25 = vsel %vm230_vm1, %v3002_v36, -inf  ;;  %v336_v30 = vsel %vm230_vm1, %v3011_v39, -inf  ;;  %v338_v29 = vsel %vm230_vm1, %v3014_v40, -inf  ;;  %v278_v58 = vadd.f32 %v277_v62, %v276_v56  ;;  %v221_v39 = vld [vmem:[%s2916_s24 + $0xc8] sm:$0xff]  ;;  %v298_v56 = vld [vmem:[#allocation3 + $0x8] sm:$0xff]  ;;  %s2816_s24 = smov (!%p2486_p5), 124  }
  0x40   : > { %v251_v19 = vadd.f32 %v2991_v32, %v249_v13  ;;  %v318_v32 = vmax.f32 %v314_v24, %v317_v26  ;;  %v320_v59 = vmax.f32 %v316_v28, %v319_v44  ;;  %v333_v60 = vmax.f32 %v330_v16, %v332_v57 }
  0x41   : > { %v335_v61 = vmax.f32 %v331_v17, %v334_v25  ;;  %v340_v35 = vsel %vm230_vm1, %v3017_v41, -inf  ;;  %v342_v36 = vsel %vm230_vm1, %v3031_v47, -inf  ;;  %v280_v2 = vadd.f32 %v279_v63, %v278_v58 }
  0x42   : > { %v253_v34 = vadd.f32 %v2995_v33, %v251_v19  ;;  %v322_v9 = vmax.f32 %v318_v32, %v321_v11  ;;  %v324_v40 = vmax.f32 %v320_v59, %v323_v12  ;;  %v337_v33 = vmax.f32 %v333_v60, %v336_v30 }
  0x43   : > { %v339_v62 = vmax.f32 %v335_v61, %v338_v29  ;;  %v344_v10 = vsel %vm230_vm1, %v3034_v48, -inf  ;;  %v346_v14 = vsel %vm230_vm1, %v3037_v49, -inf  ;;  %v282_v47 = vadd.f32 %v281_v0, %v280_v2  ;;  %v228_v0 = vld [vmem:[#allocation2] sm:$0xff] }
  0x44   : > { %v255_v1 = vadd.f32 %v3008_v38, %v253_v34  ;;  %v326_v20 = vmax.f32 %v322_v9, %v325_v27  ;;  %v328_v38 = vmax.f32 %v324_v40, %v327_v55  ;;  %v285_v63 = vsel %vm230_vm1, %v221_v39, 0.0  ;;  %v229_v55 = vld [vmem:[#allocation2 + $0x8] sm:$0xff] }
  0x45   : > { %v341_v22 = vmax.f32 %v337_v33, %v340_v35  ;;  %v343_v23 = vmax.f32 %v339_v62, %v342_v36  ;;  %v348_v31 = vsel %vm230_vm1, %v3044_v52, -inf  ;;  %v284_v49 = vadd.f32 %v3068_v8, %v282_v47 }
  0x46   : > { %v257_v41 = vadd.f32 %v3024_v45, %v255_v1  ;;  %v329_v3 = vmax.f32 %v326_v20, %v328_v38  ;;  %v350_v45 = vsel %vm230_vm1, %v3047_v53, -inf  ;;  %v287_v5 = vsel %vm230_vm1, %v223_v18, 0.0 }
  0x47   : > { %v345_v6 = vmax.f32 %v341_v22, %v344_v10  ;;  %v347_v42 = vmax.f32 %v343_v23, %v346_v14  ;;  %v352_v43 = vsel %vm230_vm1, %v221_v39, -inf  ;;  %v286_v52 = vadd.f32 %v285_v63, %v284_v49 }
  0x48   : > { %v259_v48 = vadd.f32 %v3028_v46, %v257_v41  ;;  %v361_v26 = vmax.f32 %v297_v21, %v329_v3  ;;  %v354_v46 = vsel %vm230_vm1, %v223_v18, -inf  ;;  %v289_v8 = vsel %vm230_vm1, %v225_v37, 0.0 }
  0x49   : > { %v349_v44 = vmax.f32 %v345_v6, %v348_v31  ;;  %v351_v11 = vmax.f32 %v347_v42, %v350_v45  ;;  %v288_v53 = vadd.f32 %v287_v5, %v286_v52  ;;  %v356_v13 = vsel %vm230_vm1, %v225_v37, -inf }
  0x4a   : > { %v261_v7 = vadd.f32 %v3041_v51, %v259_v48  ;;  %363 = vst.msk [vmem:[#allocation3] sm:$0xff] %vm230_vm1, %v361_v26  ;;  %v358_v50 = vsel %vm230_vm1, %v227_v4, -inf  ;;  %v291_v54 = vsel %vm230_vm1, %v227_v4, 0.0 }
  0x4b   : > { %v353_v15 = vmax.f32 %v349_v44, %v352_v43  ;;  %v355_v51 = vmax.f32 %v351_v11, %v354_v46  ;;  %v290_v27 = vadd.f32 %v289_v8, %v288_v53 }
  0x4c   : > { %v293_v12 = vadd.f32 %v261_v7, %v228_v0 }
  0x4d   : > { %v357_v16 = vmax.f32 %v353_v15, %v356_v13  ;;  %v359_v17 = vmax.f32 %v355_v51, %v358_v50  ;;  %v292_v19 = vadd.f32 %v291_v54, %v290_v27 }
  0x4e   : > { %295 = vst.msk [vmem:[#allocation2] sm:$0xff] %vm230_vm1, %v293_v12 }
  0x4f   : > { %v360_v24 = vmax.f32 %v357_v16, %v359_v17  ;;  %v294_v28 = vadd.f32 %v292_v19, %v229_v55  ;;  %368 = sbr.rel (%p2486_p5) target bundleno = 798 (0x31e), region = 40 }
  0x51   : > { %v362_v57 = vmax.f32 %v298_v56, %v360_v24  ;;  %296 = vst.msk [vmem:[#allocation2 + $0x8] sm:$0xff] %vm230_vm1, %v294_v28 }
  0x53   : > { %364 = vst.msk [vmem:[#allocation3 + $0x8] sm:$0xff] %vm230_vm1, %v362_v57 }
  0x54   : > { %v373_v30 = vld [vmem:[#allocation3] sm:$0xff]  ;;  %vm383_vm2 = vcmask 23552   ;;  %vm386_vm3 = vcmask 154624   ;;  %vm391_vm4 = vcmask 1042432   ;;  %v443_v36 = vstv %s2488_s27  ;;  %s2817_s27 = smov 122  }
  0x55   : > { %v369_v25 = vld [vmem:[#allocation2] sm:$0xff]  ;;  %402 = vrot.lane.b32.xlu1 %v373_v30, %s2811_s26  ;;  %v429_v1 = vstv %s2487_s29  ;;  %v457_v41 = vstv %s2489_s12  ;;  %v485_v38 = vstv %s2491_s5  ;;  %vm520_vm5 = vcmask 1046528   ;;  %s2498_s29 = sld [smem:[#allocation4 + $0xc]] }
  0x56   : > { %v371_v29 = vmul.f32 0.015625, %v369_v25  ;;  %v471_v63 = vstv %s2490_s6  ;;  %v499_v31 = vstv %s3167_s8  ;;  %v552_v49 = vstv %s2495_s17  ;;  %s2497_s12 = sld [smem:[#allocation4 + $0xb]] }
  0x57   : > { %v531_v3 = vstv %s2494_s18  ;;  %s2499_s5 = sld [smem:[#allocation4 + $0xd]]  ;;  %vm664_vm6 = vcmask 1045504   ;;  %vm808_vm7 = vcmask 1044480   ;;  %vm952_vm8 = vcmask 1043456  }
  0x58   : > { %377 = vrot.lane.b32.xlu0 %v371_v29, %s2811_s26  ;;  %v370_v34 = vld [vmem:[#allocation2 + $0x8] sm:$0xff]  ;;  %s2502_s6 = sld [smem:[#allocation4 + $0x10]]  ;;  %vm1239_vm9 = vcmask 1041408  }
  0x59   : > { %v372_v32 = vmul.f32 0.015625, %v370_v34  ;;  %s2501_s8 = sld [smem:[#allocation4 + $0xf]] }
  0x5a   : > { %v374_v58 = vld [vmem:[#allocation3 + $0x8] sm:$0xff]  ;;  %s2503_s17 = sld [smem:[#allocation4 + $0x11]] }
  0x5b   : > { %v615_v55 = vstv %s2498_s29  ;;  %s2505_s18 = sld [smem:[#allocation4 + $0x13]] }
  0x5c   : > { %v594_v17 = vstv %s2497_s12  ;;  %s2506_s29 = sld [smem:[#allocation4 + $0x14]] }
  0x5d   : > { %404 = vrot.lane.b32.xlu1 %v374_v58, %s2811_s26  ;;  %s2509_s12 = sld [smem:[#allocation4 + $0x17]] }
  0x60   : > { %379 = vrot.lane.b32.xlu0 %v372_v32, %s2811_s26  ;;  %s2496_s26 = sld [smem:[#allocation4 + $0xa]] }
  0x66   : > { %v573_v46 = vstv %s2496_s26  ;;  %s2504_s26 = sld [smem:[#allocation4 + $0x12]] }
  0xca   : > { %v378_v59 = vpop.permute.xlu0 %377 }
  0xcb   : > { %v384_v60 = vsel %vm383_vm2, 0.0, %v378_v59 }
  0xcc   : > { %v387_v61 = vsel %vm386_vm3, %v384_v60, 0.0 }
  0xcd   : > { %v392_v35 = vrot.slane %v387_v61, 5  ;;  %v636_v61 = vstv %s2499_s5  ;;  %s2508_s5 = sld [smem:[#allocation4 + $0x16]] }
  0xcf   : > { %v3150_v39 = vsel %vm391_vm4, 0.0, %v392_v35 }
  0xd0   : > { %v444_v2 = vmul.f32 %v443_v36, %v3150_v39  ;;  %v430_v9 = vmul.f32 %v429_v1, %v3150_v39  ;;  %v486_v21 = vmul.f32 %v485_v38, %v3150_v39  ;;  %v472_v22 = vmul.f32 %v471_v63, %v3150_v39 }
  0xd1   : > { %v458_v23 = vmul.f32 %v457_v41, %v3150_v39  ;;  %v553_v5 = vmul.f32 %v552_v49, %v3150_v39  ;;  %v532_v6 = vmul.f32 %v531_v3, %v3150_v39  ;;  %v500_v8 = vmul.f32 %v499_v31, %v3150_v39 }
  0xd2   : > { %448 = vrot.lane.b32.xlu0 %v444_v2, %s2812_s3  ;;  %434 = vrot.lane.b32.xlu2 %v430_v9, %s2813_s4  ;;  %v380_v40 = vpop.permute.xlu0 %379  ;;  %v616_v57 = vmul.f32 %v615_v55, %v3150_v39  ;;  %v595_v25 = vmul.f32 %v594_v17, %v3150_v39  ;;  %v574_v29 = vmul.f32 %v573_v46, %v3150_v39 }
  0xd3   : > { %v385_v33 = vsel %vm383_vm2, 0.0, %v380_v40  ;;  %v559_v52 = vrot.slane %v553_v5, 1  ;;  %v538_v26 = vrot.slane %v532_v6, 1 }
  0xd4   : > { %v388_v62 = vsel %vm386_vm3, %v385_v33, 0.0  ;;  %v622_v58 = vrot.slane %v616_v57, 1  ;;  %v601_v32 = vrot.slane %v595_v25, 1  ;;  %v580_v60 = vrot.slane %v574_v29, 1 }
  0xd5   : > { %v393_v10 = vrot.slane %v388_v62, 5  ;;  %v780_v57 = vstv %s2506_s29  ;;  %s2515_s29 = sld [smem:[#allocation4 + $0x1d]] }
  0xd7   : > { %v3159_v14 = vsel %vm391_vm4, %v392_v35, %v393_v10  ;;  %v3187_v7 = vsel %vm391_vm4, %v393_v10, 0.0 }
  0xd8   : > { %v431_v18 = vmul.f32 %v429_v1, %v3159_v14  ;;  %v459_v47 = vmul.f32 %v457_v41, %v3159_v14  ;;  %v445_v20 = vmul.f32 %v443_v36, %v3159_v14  ;;  %v501_v48 = vmul.f32 %v499_v31, %v3159_v14 }
  0xd9   : > { %v487_v37 = vmul.f32 %v485_v38, %v3159_v14  ;;  %v473_v45 = vmul.f32 %v471_v63, %v3159_v14  ;;  %v554_v0 = vmul.f32 %v552_v49, %v3159_v14  ;;  %v533_v4 = vmul.f32 %v531_v3, %v3159_v14 }
  0xda   : > { %464 = vrot.lane.b32.xlu0 %v459_v47, %s2814_s7  ;;  %450 = vrot.lane.b32.xlu1 %v445_v20, %s2812_s3  ;;  %v575_v44 = vmul.f32 %v573_v46, %v3159_v14  ;;  %v576_v53 = vmul.f32 %v573_v46, %v3187_v7  ;;  %v555_v13 = vmul.f32 %v552_v49, %v3187_v7  ;;  %v675_v47 = vstv %s2501_s8  ;;  %s2512_s8 = sld [smem:[#allocation4 + $0x1a]] }
  0xdb   : > { %436 = vrot.lane.b32.xlu2 %v431_v18, %s2813_s4  ;;  %v560_v42 = vrot.slane %v554_v0, 1  ;;  %v539_v43 = vrot.slane %v533_v4, 1  ;;  %v534_v50 = vmul.f32 %v531_v3, %v3187_v7  ;;  %v617_v16 = vmul.f32 %v615_v55, %v3159_v14 }
  0xdc   : > { %v581_v54 = vrot.slane %v575_v44, 1  ;;  %v583_v15 = vrot.slane %v576_v53, 1  ;;  %v562_v51 = vrot.slane %v555_v13, 1  ;;  %v596_v24 = vmul.f32 %v594_v17, %v3159_v14 }
  0xdd   : > { %v561_v11 = vsel %vm520_vm5, %v559_v52, %v560_v42  ;;  %v540_v12 = vsel %vm520_vm5, %v538_v26, %v539_v43  ;;  %v541_v27 = vrot.slane %v534_v50, 1  ;;  %v623_v30 = vrot.slane %v617_v16, 1 }
  0xde   : > { %v584_v19 = vsel %vm520_vm5, %v581_v54, %v583_v15  ;;  %v563_v56 = vsel %vm520_vm5, %v560_v42, %v562_v51  ;;  %v602_v34 = vrot.slane %v596_v24, 1  ;;  %v638_v36 = vmul.f32 %v636_v61, %v3159_v14 }
  0xdf   : > { %v542_v28 = vsel %vm520_vm5, %v539_v43, %v541_v27  ;;  %v624_v59 = vsel %vm520_vm5, %v622_v58, %v623_v30  ;;  %v639_v1 = vmul.f32 %v636_v61, %v3187_v7  ;;  %v618_v2 = vmul.f32 %v615_v55, %v3187_v7 }
  0xe0   : > { %v603_v35 = vsel %vm520_vm5, %v601_v32, %v602_v34  ;;  %v582_v9 = vsel %vm520_vm5, %v580_v60, %v581_v54  ;;  %v597_v40 = vmul.f32 %v594_v17, %v3187_v7  ;;  %v644_v33 = vrot.slane %v638_v36, 1 }
  0xe1   : > { %v646_v62 = vrot.slane %v639_v1, 1  ;;  %v625_v10 = vrot.slane %v618_v2, 1  ;;  %v696_v18 = vstv %s2502_s6  ;;  %v676_v31 = vmul.f32 %v675_v47, %v3150_v39  ;;  %s2510_s6 = sld [smem:[#allocation4 + $0x18]] }
  0xe2   : > { %490 = vrot.lane.b32.xlu0 %v486_v21, %s2815_s21  ;;  %476 = vrot.lane.b32.xlu1 %v472_v22, %s2816_s24  ;;  %v604_v41 = vrot.slane %v597_v40, 1  ;;  %v698_v63 = vmul.f32 %v696_v18, %v3159_v14  ;;  %v677_v21 = vmul.f32 %v675_v47, %v3159_v14  ;;  %v717_v0 = vstv %s2503_s17  ;;  %s2511_s17 = sld [smem:[#allocation4 + $0x19]] }
  0xe3   : > { %462 = vrot.lane.b32.xlu2 %v458_v23, %s2814_s7  ;;  %v647_v20 = vsel %vm520_vm5, %v644_v33, %v646_v62  ;;  %v626_v38 = vsel %vm520_vm5, %v623_v30, %v625_v10  ;;  %v697_v23 = vmul.f32 %v696_v18, %v3150_v39  ;;  %v719_v5 = vmul.f32 %v717_v0, %v3159_v14 }
  0xe4   : > { %v605_v22 = vsel %vm520_vm5, %v602_v34, %v604_v41  ;;  %v683_v49 = vrot.slane %v677_v21, 2  ;;  %v720_v43 = vmul.f32 %v717_v0, %v3187_v7  ;;  %v699_v52 = vmul.f32 %v696_v18, %v3187_v7 }
  0xe5   : > { %v703_v3 = vrot.slane %v697_v23, 2  ;;  %v678_v46 = vmul.f32 %v675_v47, %v3187_v7  ;;  %v759_v53 = vstv %s2505_s18  ;;  %v738_v13 = vstv %s2504_s26  ;;  %s2513_s18 = sld [smem:[#allocation4 + $0x1b]] }
  0xe6   : > { %v727_v44 = vrot.slane %v720_v43, 2  ;;  %v761_v15 = vmul.f32 %v759_v53, %v3159_v14  ;;  %v740_v51 = vmul.f32 %v738_v13, %v3159_v14  ;;  %v760_v55 = vmul.f32 %v759_v53, %v3150_v39  ;;  %s2516_s26 = sld [smem:[#allocation4 + $0x1e]] }
  0xe7   : > { %v739_v16 = vmul.f32 %v738_v13, %v3150_v39  ;;  %v718_v17 = vmul.f32 %v717_v0, %v3150_v39  ;;  %v782_v30 = vmul.f32 %v780_v57, %v3159_v14  ;;  %v783_v58 = vmul.f32 %v780_v57, %v3187_v7 }
  0xe8   : > { %v766_v24 = vrot.slane %v760_v55, 2  ;;  %v762_v32 = vmul.f32 %v759_v53, %v3187_v7  ;;  %v741_v60 = vmul.f32 %v738_v13, %v3187_v7  ;;  %v840_v2 = vstv %s2509_s12  ;;  %v3291_v13 = vpop.permute.xlu1 %402  ;;  %s2517_s12 = sld [smem:[#allocation4 + $0x1f]] }
  0xe9   : > { %v724_v25 = vrot.slane %v718_v17, 2  ;;  %v842_v62 = vmul.f32 %v840_v2, %v3159_v14  ;;  %v841_v18 = vmul.f32 %v840_v2, %v3150_v39  ;;  %v843_v0 = vmul.f32 %v840_v2, %v3187_v7 }
  0xea   : > { %506 = vrot.lane.b32.xlu0 %v501_v48, %s2817_s27  ;;  %492 = vrot.lane.b32.xlu1 %v487_v37, %s2815_s21  ;;  %v637_v48 = vmul.f32 %v636_v61, %v3150_v39  ;;  %v704_v37 = vrot.slane %v698_v63, 2  ;;  %v788_v61 = vrot.slane %v782_v30, 2  ;;  %v769_v36 = vrot.slane %v762_v32, 2 }
  0xeb   : > { %478 = vrot.lane.b32.xlu2 %v473_v45, %s2816_s24  ;;  %v682_v45 = vrot.slane %v676_v31, 2  ;;  %v748_v1 = vrot.slane %v741_v60, 2  ;;  %v848_v63 = vrot.slane %v842_v62, 3  ;;  %v861_v31 = vstv %s2510_s6  ;;  %s2519_s6 = sld [smem:[#allocation4 + $0x21]] }
  0xec   : > { %v643_v4 = vrot.slane %v637_v48, 1  ;;  %v705_v6 = vsel %vm664_vm6, %v703_v3, %v704_v37  ;;  %v984_v2 = vstv %s2516_s26  ;;  %s2523_s26 = sld [smem:[#allocation4 + $0x25]] }
  0xed   : > { %v684_v42 = vsel %vm664_vm6, %v682_v45, %v683_v49  ;;  %v864_v45 = vmul.f32 %v861_v31, %v3187_v7  ;;  %v986_v62 = vmul.f32 %v984_v2, %v3159_v14 }
  0xee   : > { %v645_v26 = vsel %vm520_vm5, %v643_v4, %v644_v33 }
  0xef   : > { %v871_v43 = vrot.slane %v864_v45, 3 }
  0xf0   : > { %v3312_v32 = vpop.permute.xlu1 %404 }
  0xf2   : > { %564 = vrot.lane.b32.xlu0 %v561_v11, %s2812_s3  ;;  %543 = vrot.lane.b32.xlu1 %v540_v12, %s2813_s4  ;;  %v706_v11 = vrot.slane %v699_v52, 2  ;;  %v685_v12 = vrot.slane %v678_v46, 2  ;;  %v850_v52 = vrot.slane %v843_v0, 3  ;;  %v903_v46 = vstv %s2512_s8  ;;  %s2518_s8 = sld [smem:[#allocation4 + $0x20]] }
  0xf3   : > { %504 = vrot.lane.b32.xlu2 %v500_v8, %s2817_s27  ;;  %v725_v8 = vrot.slane %v719_v5, 2 }
  0xf4   : > { %v707_v54 = vsel %vm664_vm6, %v704_v37, %v706_v11  ;;  %v686_v27 = vsel %vm664_vm6, %v683_v49, %v685_v12  ;;  %v863_v37 = vmul.f32 %v861_v31, %v3159_v14  ;;  %v851_v11 = vsel %vm808_vm7, %v848_v63, %v850_v52 }
  0xf5   : > { %v728_v50 = vsel %vm664_vm6, %v725_v8, %v727_v44  ;;  %v905_v12 = vmul.f32 %v903_v46, %v3159_v14 }
  0xf7   : > { %v911_v55 = vrot.slane %v905_v12, 3 }
  0xfa   : > { %587 = vrot.lane.b32.xlu0 %v584_v19, %s2814_s7  ;;  %566 = vrot.lane.b32.xlu1 %v563_v56, %s2812_s3  ;;  %v767_v19 = vrot.slane %v761_v15, 2  ;;  %v746_v56 = vrot.slane %v740_v51, 2  ;;  %v862_v51 = vmul.f32 %v861_v31, %v3150_v39 }
  0xfb   : > { %545 = vrot.lane.b32.xlu2 %v542_v28, %s2813_s4  ;;  %v745_v28 = vrot.slane %v739_v16, 2 }
  0xfc   : > { %v768_v29 = vsel %vm664_vm6, %v766_v24, %v767_v19  ;;  %v770_v33 = vsel %vm664_vm6, %v767_v19, %v769_v36  ;;  %v749_v41 = vsel %vm664_vm6, %v746_v56, %v748_v1  ;;  %v868_v24 = vrot.slane %v862_v51, 3 }
  0xfd   : > { %v747_v34 = vsel %vm664_vm6, %v745_v28, %v746_v56  ;;  %v924_v56 = vstv %s2513_s18  ;;  %s2493_s18 = sld [smem:[#allocation4 + $0x7]] }
  0xfe   : > { %v926_v28 = vmul.f32 %v924_v56, %v3159_v14  ;;  %v927_v30 = vmul.f32 %v924_v56, %v3187_v7 }
 0x102   : > { %627 = vrot.lane.b32.xlu0 %v624_v59, %s2815_s21  ;;  %606 = vrot.lane.b32.xlu1 %v603_v35, %s2816_s24  ;;  %v726_v59 = vsel %vm664_vm6, %v724_v25, %v725_v8  ;;  %v790_v35 = vrot.slane %v783_v58, 2  ;;  %v882_v8 = vstv %s2511_s17  ;;  %s2520_s17 = sld [smem:[#allocation4 + $0x22]] }
 0x103   : > { %585 = vrot.lane.b32.xlu2 %v582_v9, %s2814_s7  ;;  %v819_v9 = vstv %s2508_s5  ;;  %v884_v53 = vmul.f32 %v882_v8, %v3159_v14  ;;  %v883_v15 = vmul.f32 %v882_v8, %v3150_v39  ;;  %v885_v58 = vmul.f32 %v882_v8, %v3187_v7  ;;  %s3320_s5 = sld [smem:[#allocation4]] }
 0x104   : > { %v791_v40 = vsel %vm664_vm6, %v788_v61, %v790_v35  ;;  %v821_v10 = vmul.f32 %v819_v9, %v3159_v14  ;;  %v820_v47 = vmul.f32 %v819_v9, %v3150_v39  ;;  %v822_v5 = vmul.f32 %v819_v9, %v3187_v7 }
 0x105   : > { %v890_v16 = vrot.slane %v884_v53, 3  ;;  %v889_v19 = vrot.slane %v883_v15, 3  ;;  %v934_v35 = vrot.slane %v927_v30, 3  ;;  %v892_v1 = vrot.slane %v885_v58, 3 }
 0x106   : > { %v827_v21 = vrot.slane %v821_v10, 3  ;;  %v826_v23 = vrot.slane %v820_v47, 3  ;;  %v963_v9 = vstv %s2515_s29  ;;  %s2522_s29 = sld [smem:[#allocation4 + $0x24]] }
 0x107   : > { %v891_v25 = vsel %vm808_vm7, %v889_v19, %v890_v16  ;;  %v965_v10 = vmul.f32 %v963_v9, %v3159_v14  ;;  %v964_v47 = vmul.f32 %v963_v9, %v3150_v39  ;;  %v1026_v19 = vstv %s2518_s8  ;;  %s2525_s8 = sld [smem:[#allocation4 + $0x27]] }
 0x108   : > { %v828_v3 = vsel %vm808_vm7, %v826_v23, %v827_v21  ;;  %v992_v23 = vrot.slane %v986_v62, 4  ;;  %v513_v62 = vstv %s2493_s18  ;;  %s2530_s18 = sld [smem:[#allocation4 + $0x2c]] }
 0x109   : > { %v971_v31 = vrot.slane %v965_v10, 4 }
 0x10a   : > { %650 = vrot.lane.b32.xlu0 %v647_v20, %s2817_s27  ;;  %629 = vrot.lane.b32.xlu1 %v626_v38, %s2815_s21  ;;  %v781_v38 = vmul.f32 %v780_v57, %v3150_v39 }
 0x10b   : > { %608 = vrot.lane.b32.xlu2 %v605_v22, %s2816_s24  ;;  %v847_v22 = vrot.slane %v841_v18, 3  ;;  %v985_v18 = vmul.f32 %v984_v2, %v3150_v39 }
 0x10c   : > { %v787_v48 = vrot.slane %v781_v38, 2 }
 0x10d   : > { %v849_v49 = vsel %vm808_vm7, %v847_v22, %v848_v63 }
 0x10e   : > { %v789_v4 = vsel %vm664_vm6, %v787_v48, %v788_v61  ;;  %v932_v61 = vrot.slane %v926_v28, 3  ;;  %v991_v48 = vrot.slane %v985_v18, 4 }
 0x112   : > { %708 = vrot.lane.b32.xlu0 %v705_v6, %s2812_s3  ;;  %687 = vrot.lane.b32.xlu1 %v684_v42, %s2813_s4  ;;  %v869_v42 = vrot.slane %v863_v37, 3  ;;  %v970_v37 = vrot.slane %v964_v47, 4 }
 0x113   : > { %648 = vrot.lane.b32.xlu2 %v645_v26, %s2817_s27  ;;  %v829_v26 = vrot.slane %v822_v5, 3  ;;  %v993_v5 = vsel %vm952_vm8, %v991_v48, %v992_v23 }
 0x114   : > { %v872_v44 = vsel %vm808_vm7, %v869_v42, %v871_v43  ;;  %v423_v43 = vstv %s3320_s5  ;;  %s2500_s5 = sld [smem:[#allocation4 + $0xe]] }
 0x115   : > { %v424_v53 = vmul.f32 %v423_v43, %v3150_v39  ;;  %v425_v51 = vmul.f32 %v423_v43, %v3159_v14 }
 0x11a   : > { %731 = vrot.lane.b32.xlu0 %v728_v50, %s2814_s7  ;;  %710 = vrot.lane.b32.xlu1 %v707_v54, %s2812_s3  ;;  %v830_v50 = vsel %vm808_vm7, %v827_v21, %v829_v26  ;;  %v904_v54 = vmul.f32 %v903_v46, %v3150_v39  ;;  %v925_v21 = vmul.f32 %v924_v56, %v3150_v39 }
 0x11b   : > { %689 = vrot.lane.b32.xlu2 %v686_v27, %s2813_s4  ;;  %v966_v26 = vmul.f32 %v963_v9, %v3187_v7 }
 0x11c   : > { %v910_v17 = vrot.slane %v904_v54, 3 }
 0x11d   : > { %v973_v54 = vrot.slane %v966_v26, 4 }
 0x11e   : > { %v912_v57 = vsel %vm808_vm7, %v910_v17, %v911_v55  ;;  %v1047_v17 = vstv %s2519_s6  ;;  %s2526_s6 = sld [smem:[#allocation4 + $0x28]] }
 0x11f   : > { %v1049_v28 = vmul.f32 %v1047_v17, %v3159_v14  ;;  %v1048_v30 = vmul.f32 %v1047_v17, %v3150_v39 }
 0x122   : > { %771 = vrot.lane.b32.xlu0 %v768_v29, %s2815_s21  ;;  %750 = vrot.lane.b32.xlu1 %v747_v34, %s2816_s24  ;;  %v906_v29 = vmul.f32 %v903_v46, %v3187_v7  ;;  %v870_v34 = vsel %vm808_vm7, %v868_v24, %v869_v42  ;;  %v972_v42 = vsel %vm952_vm8, %v970_v37, %v971_v31 }
 0x123   : > { %729 = vrot.lane.b32.xlu2 %v726_v59, %s2814_s7  ;;  %v514_v37 = vmul.f32 %v513_v62, %v3150_v39 }
 0x124   : > { %v913_v36 = vrot.slane %v906_v29, 3  ;;  %v1027_v29 = vmul.f32 %v1026_v19, %v3150_v39 }
 0x12a   : > { %794 = vrot.lane.b32.xlu0 %v791_v40, %s2817_s27  ;;  %773 = vrot.lane.b32.xlu1 %v770_v33, %s2815_s21  ;;  %v935_v40 = vsel %vm808_vm7, %v932_v61, %v934_v35  ;;  %v914_v33 = vsel %vm808_vm7, %v911_v55, %v913_v36  ;;  %v1055_v35 = vrot.slane %v1049_v28, 4 }
 0x12b   : > { %752 = vrot.lane.b32.xlu2 %v749_v41, %s2816_s24  ;;  %v893_v41 = vsel %vm808_vm7, %v890_v16, %v892_v1  ;;  %v1068_v1 = vstv %s2520_s17  ;;  %s3419_s17 = sld [smem:[#allocation4 + $0x29]] }
 0x12c   : > { %v3272_v20 = vpop.permute.xlu2 %434  ;;  %v1071_v47 = vmul.f32 %v1068_v1, %v3187_v7 }
 0x12d   : > { %v440_v15 = vadd.f32 %v3272_v20, %v424_v53  ;;  %v974_v20 = vsel %vm952_vm8, %v971_v31, %v973_v54 }
 0x132   : > { %852 = vrot.lane.b32.xlu0 %v849_v49, %s2812_s3  ;;  %831 = vrot.lane.b32.xlu1 %v828_v3, %s2813_s4  ;;  %v1005_v49 = vstv %s2517_s12  ;;  %v931_v3 = vrot.slane %v925_v21, 3  ;;  %s2524_s12 = sld [smem:[#allocation4 + $0x26]] }
 0x133   : > { %792 = vrot.lane.b32.xlu2 %v789_v4, %s2817_s27  ;;  %v3332_v45 = vmul.f32 %v1005_v49, %v3159_v14  ;;  %v1008_v0 = vmul.f32 %v1005_v49, %v3187_v7  ;;  %v987_v4 = vmul.f32 %v984_v2, %v3187_v7  ;;  %v1006_v58 = vmul.f32 %v1005_v49, %v3150_v39 }
 0x134   : > { %v933_v52 = vsel %vm808_vm7, %v931_v3, %v932_v61  ;;  %v516_v49 = vmul.f32 %v513_v62, %v3187_v7 }
 0x135   : > { %v3285_v6 = vpop.permute.xlu2 %436  ;;  %v994_v12 = vrot.slane %v987_v4, 4  ;;  %v1012_v10 = vrot.slane %v1006_v58, 4 }
 0x136   : > { %v441_v56 = vadd.f32 %v3285_v6, %v425_v51 }
 0x137   : > { %v995_v16 = vsel %vm952_vm8, %v992_v23, %v994_v12  ;;  %v1029_v23 = vmul.f32 %v1026_v19, %v3187_v7  ;;  %v1106_v12 = vstv %s2522_s29  ;;  %s2531_s29 = sld [smem:[#allocation4 + $0x2d]] }
 0x138   : > { %v3392_v51 = vmul.f32 %v1106_v12, %v3159_v14 }
 0x139   : > { %v1036_v26 = vrot.slane %v1029_v23, 4 }
 0x13a   : > { %875 = vrot.lane.b32.xlu0 %v872_v44, %s2814_s7  ;;  %854 = vrot.lane.b32.xlu1 %v851_v11, %s2812_s3  ;;  %v1013_v44 = vrot.slane %v3332_v45, 4  ;;  %v1015_v11 = vrot.slane %v1008_v0, 4 }
 0x13b   : > { %833 = vrot.lane.b32.xlu2 %v830_v50, %s2813_s4 }
 0x13c   : > { %v1016_v55 = vsel %vm952_vm8, %v1013_v44, %v1015_v11  ;;  %v1014_v21 = vsel %vm952_vm8, %v1012_v10, %v1013_v44  ;;  %v524_v44 = vrot.slane %v516_v49, 1  ;;  %v657_v49 = vstv %s2500_s5  ;;  %s2533_s5 = sld [smem:[#allocation4 + $0x2f]] }
 0x13d   : > { %v3300_v27 = vpop.permute.xlu2 %462 }
 0x142   : > { %915 = vrot.lane.b32.xlu0 %v912_v57, %s2815_s21  ;;  %894 = vrot.lane.b32.xlu1 %v891_v25, %s2816_s24  ;;  %v3355_v57 = vmul.f32 %v1026_v19, %v3159_v14  ;;  %v1107_v19 = vmul.f32 %v1106_v12, %v3150_v39 }
 0x143   : > { %873 = vrot.lane.b32.xlu2 %v870_v34, %s2814_s7 }
 0x144   : > { %v449_v59 = vpop.permute.xlu0 %448  ;;  %v1034_v36 = vrot.slane %v3355_v57, 4  ;;  %v1113_v58 = vrot.slane %v1107_v19, 5 }
 0x145   : > { %v3314_v60 = vpop.permute.xlu2 %478  ;;  %v454_v24 = vadd.f32 %v449_v59, %v440_v15 }
 0x147   : > { %v468_v59 = vadd.f32 %v3300_v27, %v454_v24 }
 0x14a   : > { %938 = vrot.lane.b32.xlu0 %v935_v40, %s2817_s27  ;;  %917 = vrot.lane.b32.xlu1 %v914_v33, %s2815_s21  ;;  %v1054_v40 = vrot.slane %v1048_v30, 4  ;;  %v1033_v33 = vrot.slane %v1027_v29, 4 }
 0x14b   : > { %896 = vrot.lane.b32.xlu2 %v893_v41, %s2816_s24  ;;  %v3369_v41 = vmul.f32 %v1068_v1, %v3159_v14 }
 0x14c   : > { %v451_v38 = vpop.permute.xlu1 %450  ;;  %v465_v63 = vpop.permute.xlu0 %464  ;;  %v1056_v18 = vsel %vm952_vm8, %v1054_v40, %v1055_v35  ;;  %v1035_v27 = vsel %vm952_vm8, %v1033_v33, %v1034_v36 }
 0x14d   : > { %v3329_v22 = vpop.permute.xlu2 %504  ;;  %v455_v25 = vadd.f32 %v451_v38, %v441_v56  ;;  %v1050_v38 = vmul.f32 %v1047_v17, %v3187_v7 }
 0x14f   : > { %v469_v2 = vadd.f32 %v465_v63, %v455_v25  ;;  %v515_v63 = vmul.f32 %v513_v62, %v3159_v14  ;;  %v1057_v43 = vrot.slane %v1050_v38, 4 }
 0x151   : > { %v483_v31 = vadd.f32 %v3314_v60, %v469_v2  ;;  %v1058_v15 = vsel %vm952_vm8, %v1055_v35, %v1057_v43 }
 0x152   : > { %996 = vrot.lane.b32.xlu0 %v993_v5, %s2812_s3  ;;  %975 = vrot.lane.b32.xlu1 %v972_v42, %s2813_s4  ;;  %v1076_v5 = vrot.slane %v3369_v41, 4  ;;  %v1078_v42 = vrot.slane %v1071_v47, 4  ;;  %v1109_v41 = vmul.f32 %v1106_v12, %v3187_v7 }
 0x153   : > { %936 = vrot.lane.b32.xlu2 %v933_v52, %s2817_s27  ;;  %v522_v52 = vrot.slane %v515_v63, 1 }
 0x154   : > { %v477_v46 = vpop.permute.xlu1 %476  ;;  %v491_v8 = vpop.permute.xlu0 %490  ;;  %v1079_v54 = vsel %vm952_vm8, %v1076_v5, %v1078_v42 }
 0x155   : > { %v3346_v50 = vpop.permute.xlu2 %545  ;;  %v482_v9 = vadd.f32 %v477_v46, %v468_v59  ;;  %v1127_v46 = vstv %s2523_s26  ;;  %v525_v56 = vsel %vm520_vm5, %v522_v52, %v524_v44  ;;  %v1148_v59 = vstv %s2524_s12  ;;  %s2529_s26 = sld [smem:[#allocation4 + $0x2b]] }
 0x156   : > { %v1129_v11 = vmul.f32 %v1127_v46, %v3159_v14  ;;  %v3406_v2 = vmul.f32 %v1148_v59, %v3159_v14  ;;  %v1130_v62 = vmul.f32 %v1127_v46, %v3187_v7  ;;  %s2507_s12 = sld [smem:[#allocation4 + $0x15]] }
 0x157   : > { %v496_v48 = vadd.f32 %v491_v8, %v482_v9  ;;  %v521_v8 = vrot.slane %v514_v37, 1  ;;  %v1151_v9 = vmul.f32 %v1148_v59, %v3187_v7 }
 0x158   : > { %v1135_v57 = vrot.slane %v1129_v11, 5  ;;  %v1156_v63 = vrot.slane %v3406_v2, 5  ;;  %v1137_v23 = vrot.slane %v1130_v62, 5 }
 0x159   : > { %v510_v60 = vadd.f32 %v3329_v22, %v496_v48  ;;  %v1037_v22 = vsel %vm952_vm8, %v1034_v36, %v1036_v26  ;;  %v658_v26 = vmul.f32 %v657_v49, %v3150_v39 }
 0x15a   : > { %1019 = vrot.lane.b32.xlu0 %v1016_v55, %s2814_s7  ;;  %998 = vrot.lane.b32.xlu1 %v995_v16, %s2812_s3  ;;  %v523_v55 = vsel %vm520_vm5, %v521_v8, %v522_v52  ;;  %v1128_v16 = vmul.f32 %v1127_v46, %v3150_v39 }
 0x15b   : > { %977 = vrot.lane.b32.xlu2 %v974_v20, %s2813_s4  ;;  %v528_v17 = vadd.f32 %v523_v55, %v510_v60  ;;  %v1069_v20 = vmul.f32 %v1068_v1, %v3150_v39  ;;  %v665_v19 = vrot.slane %v658_v26, 2 }
 0x15c   : > { %v493_v6 = vpop.permute.xlu1 %492  ;;  %v507_v34 = vpop.permute.xlu0 %506 }
 0x15d   : > { %v3365_v61 = vpop.permute.xlu2 %585  ;;  %v497_v0 = vadd.f32 %v493_v6, %v483_v31  ;;  %v1114_v6 = vrot.slane %v3392_v51, 5  ;;  %v1075_v36 = vrot.slane %v1069_v20, 4  ;;  %v1116_v31 = vrot.slane %v1109_v41, 5 }
 0x15e   : > { %v1149_v51 = vmul.f32 %v1148_v59, %v3150_v39 }
 0x15f   : > { %v511_v53 = vadd.f32 %v507_v34, %v497_v0  ;;  %v1134_v34 = vrot.slane %v1128_v16, 5  ;;  %v1115_v33 = vsel %vm391_vm4, %v1113_v58, %v1114_v6  ;;  %v1077_v10 = vsel %vm952_vm8, %v1075_v36, %v1076_v5 }
 0x160   : > { %v660_v0 = vmul.f32 %v657_v49, %v3187_v7  ;;  %v1169_v5 = vstv %s2525_s8  ;;  %v1117_v60 = vsel %vm391_vm4, %v1114_v6, %v1116_v31  ;;  %s2534_s8 = sld [smem:[#allocation4 + $0x30]] }
 0x161   : > { %v529_v25 = vadd.f32 %v525_v56, %v511_v53  ;;  %v1136_v35 = vsel %vm391_vm4, %v1134_v34, %v1135_v57  ;;  %v3427_v52 = vmul.f32 %v1169_v5, %v3159_v14  ;;  %v1170_v11 = vmul.f32 %v1169_v5, %v3150_v39 }
 0x162   : > { %1059 = vrot.lane.b32.xlu0 %v1056_v18, %s2815_s21  ;;  %1038 = vrot.lane.b32.xlu1 %v1035_v27, %s2816_s24  ;;  %v1172_v2 = vmul.f32 %v1169_v5, %v3187_v7 }
 0x163   : > { %1017 = vrot.lane.b32.xlu2 %v1014_v21, %s2814_s7  ;;  %v550_v1 = vadd.f32 %v3346_v50, %v529_v25  ;;  %v1158_v21 = vrot.slane %v1151_v9, 5  ;;  %v1155_v25 = vrot.slane %v1149_v51, 5 }
 0x164   : > { %v544_v3 = vpop.permute.xlu1 %543  ;;  %v565_v45 = vpop.permute.xlu0 %564 }
 0x165   : > { %v3384_v4 = vpop.permute.xlu2 %608  ;;  %v549_v30 = vadd.f32 %v544_v3, %v528_v17  ;;  %v1190_v3 = vstv %s2526_s6  ;;  %v1159_v42 = vsel %vm391_vm4, %v1156_v63, %v1158_v21  ;;  %v1177_v17 = vrot.slane %v3427_v52, 5  ;;  %s2532_s6 = sld [smem:[#allocation4 + $0x2e]] }
 0x166   : > { %v1192_v43 = vmul.f32 %v1190_v3, %v3159_v14  ;;  %v1191_v46 = vmul.f32 %v1190_v3, %v3150_v39  ;;  %v1157_v36 = vsel %vm391_vm4, %v1155_v25, %v1156_v63  ;;  %v1271_v63 = vstv %s2530_s18  ;;  %s3509_s18 = sld [smem:[#allocation4 + $0x32]] }
 0x167   : > { %v570_v40 = vadd.f32 %v565_v45, %v549_v30  ;;  %v659_v45 = vmul.f32 %v657_v49, %v3159_v14 }
 0x168   : > { %v1198_v16 = vrot.slane %v1192_v43, 5  ;;  %v1197_v56 = vrot.slane %v1191_v46, 5 }
 0x169   : > { %v591_v50 = vadd.f32 %v3365_v61, %v570_v40  ;;  %v1138_v61 = vsel %vm391_vm4, %v1135_v57, %v1137_v23  ;;  %v666_v12 = vrot.slane %v659_v45, 2  ;;  %v1211_v57 = vstv %s3419_s17  ;;  %s3507_s17 = sld [smem:[#allocation4 + $0x33]] }
 0x16a   : > { %1082 = vrot.lane.b32.xlu0 %v1079_v54, %s2817_s27  ;;  %1061 = vrot.lane.b32.xlu1 %v1058_v15, %s2815_s21  ;;  %v668_v54 = vrot.slane %v660_v0, 2  ;;  %v3442_v30 = vmul.f32 %v1211_v57, %v3159_v14  ;;  %v1214_v6 = vmul.f32 %v1211_v57, %v3187_v7  ;;  %v1199_v58 = vsel %vm391_vm4, %v1197_v56, %v1198_v16 }
 0x16b   : > { %1040 = vrot.lane.b32.xlu2 %v1037_v22, %s2816_s24  ;;  %v1250_v23 = vstv %s2529_s26  ;;  %s3526_s26 = sld [smem:[#allocation4 + $0x34]] }
 0x16c   : > { %v567_v24 = vpop.permute.xlu1 %566  ;;  %v588_v28 = vpop.permute.xlu0 %587  ;;  %v669_v20 = vsel %vm664_vm6, %v666_v12, %v668_v54  ;;  %v1219_v62 = vrot.slane %v3442_v30, 5  ;;  %v1251_v45 = vmul.f32 %v1250_v23, %v3150_v39 }
 0x16d   : > { %v649_v29 = vpop.permute.xlu2 %648  ;;  %v571_v18 = vadd.f32 %v567_v24, %v550_v1 }
 0x16f   : > { %v592_v48 = vadd.f32 %v588_v28, %v571_v18  ;;  %v1176_v28 = vrot.slane %v1170_v11, 5 }
 0x171   : > { %v613_v8 = vadd.f32 %v3384_v4, %v592_v48  ;;  %v1178_v59 = vsel %vm391_vm4, %v1176_v28, %v1177_v17  ;;  %v1273_v48 = vmul.f32 %v1271_v63, %v3159_v14 }
 0x172   : > { %1139 = vrot.lane.b32.xlu0 %v1136_v35, %s2812_s3  ;;  %1118 = vrot.lane.b32.xlu1 %v1115_v33, %s2813_s4  ;;  %v667_v35 = vsel %vm664_vm6, %v665_v19, %v666_v12 }
 0x173   : > { %1080 = vrot.lane.b32.xlu2 %v1077_v10, %s2817_s27  ;;  %v1221_v10 = vrot.slane %v1214_v6, 5  ;;  %v1279_v52 = vrot.slane %v1273_v48, 6 }
 0x174   : > { %v607_v27 = vpop.permute.xlu1 %606  ;;  %v628_v47 = vpop.permute.xlu0 %627 }
 0x175   : > { %v690_v38 = vpop.permute.xlu2 %689  ;;  %v612_v37 = vadd.f32 %v607_v27, %v591_v50  ;;  %v1222_v21 = vsel %vm391_vm4, %v1219_v62, %v1221_v10 }
 0x177   : > { %v633_v44 = vadd.f32 %v628_v47, %v612_v37  ;;  %v1179_v47 = vrot.slane %v1172_v2, 5  ;;  %v1252_v37 = vmul.f32 %v1250_v23, %v3159_v14 }
 0x179   : > { %v654_v4 = vadd.f32 %v649_v29, %v633_v44  ;;  %v1193_v29 = vmul.f32 %v1190_v3, %v3187_v7  ;;  %v1180_v49 = vsel %vm391_vm4, %v1177_v17, %v1179_v47  ;;  %v1272_v3 = vmul.f32 %v1271_v63, %v3150_v39 }
 0x17a   : > { %1162 = vrot.lane.b32.xlu0 %v1159_v42, %s2814_s7  ;;  %1141 = vrot.lane.b32.xlu1 %v1138_v61, %s2812_s3  ;;  %v1212_v42 = vmul.f32 %v1211_v57, %v3150_v39  ;;  %v1258_v26 = vrot.slane %v1252_v37, 6  ;;  %v1292_v44 = vstv %s2531_s29  ;;  %s2514_s29 = sld [smem:[#allocation4 + $0x1c]] }
 0x17b   : > { %1120 = vrot.lane.b32.xlu2 %v1117_v60, %s2813_s4  ;;  %v672_v9 = vadd.f32 %v667_v35, %v654_v4  ;;  %v1200_v27 = vrot.slane %v1193_v29, 5  ;;  %v1278_v46 = vrot.slane %v1272_v3, 6  ;;  %v3467_v12 = vmul.f32 %v1292_v44, %v3159_v14 }
 0x17c   : > { %v630_v53 = vpop.permute.xlu1 %629  ;;  %v651_v15 = vpop.permute.xlu0 %650  ;;  %v1218_v11 = vrot.slane %v1212_v42, 5  ;;  %v1313_v29 = vstv %s2532_s6  ;;  %v1293_v47 = vmul.f32 %v1292_v44, %v3150_v39  ;;  %s3557_s6 = sld [smem:[#allocation4 + $0x37]] }
 0x17d   : > { %v634_v55 = vadd.f32 %v630_v53, %v613_v8  ;;  %v730_v22 = vpop.permute.xlu2 %729  ;;  %v1257_v8 = vrot.slane %v1251_v45, 6  ;;  %v1295_v53 = vmul.f32 %v1292_v44, %v3187_v7  ;;  %v1300_v56 = vrot.slane %v3467_v12, 6 }
 0x17e   : > { %v1299_v45 = vrot.slane %v1293_v47, 6  ;;  %v1410_v47 = vstv %s3526_s26  ;;  %s2521_s26 = sld [smem:[#allocation4 + $0x23]] }
 0x17f   : > { %v655_v24 = vadd.f32 %v651_v15, %v634_v55  ;;  %v1280_v15 = vsel %vm1239_vm9, %v1278_v46, %v1279_v52  ;;  %v1259_v51 = vsel %vm1239_vm9, %v1257_v8, %v1258_v26  ;;  %v1274_v55 = vmul.f32 %v1271_v63, %v3187_v7 }
 0x180   : > { %v1302_v4 = vrot.slane %v1295_v53, 6  ;;  %v1316_v46 = vmul.f32 %v1313_v29, %v3187_v7  ;;  %v408_v8 = vsel %vm383_vm2, 0.0, %v3291_v13 }
 0x181   : > { %v673_v34 = vadd.f32 %v669_v20, %v655_v24  ;;  %v1281_v57 = vrot.slane %v1274_v55, 6  ;;  %v801_v20 = vstv %s2507_s12  ;;  %s3538_s12 = sld [smem:[#allocation4 + $0x36]] }
 0x182   : > { %1202 = vrot.lane.b32.xlu0 %v1199_v58, %s2815_s21  ;;  %1181 = vrot.lane.b32.xlu1 %v1178_v59, %s2816_s24  ;;  %v803_v30 = vmul.f32 %v801_v20, %v3159_v14  ;;  %v804_v58 = vmul.f32 %v801_v20, %v3187_v7  ;;  %v1334_v59 = vstv %s2533_s5  ;;  %s3546_s5 = sld [smem:[#allocation4 + $0x35]] }
 0x183   : > { %v694_v1 = vadd.f32 %v690_v38, %v673_v34  ;;  %1160 = vrot.lane.b32.xlu2 %v1157_v36, %s2814_s7  ;;  %v1201_v38 = vsel %vm391_vm4, %v1198_v16, %v1200_v27  ;;  %v1253_v16 = vmul.f32 %v1250_v23, %v3187_v7  ;;  %v1303_v34 = vsel %vm1239_vm9, %v1300_v56, %v1302_v4 }
 0x184   : > { %v688_v40 = vpop.permute.xlu1 %687  ;;  %v709_v33 = vpop.permute.xlu0 %708  ;;  %v1282_v36 = vsel %vm1239_vm9, %v1279_v52, %v1281_v57  ;;  %v1336_v2 = vmul.f32 %v1334_v59, %v3159_v14  ;;  %v810_v10 = vrot.slane %v803_v30, 3  ;;  %v1337_v52 = vmul.f32 %v1334_v59, %v3187_v7 }
 0x185   : > { %v693_v41 = vadd.f32 %v688_v40, %v672_v9  ;;  %v753_v18 = vpop.permute.xlu2 %752  ;;  %v1260_v25 = vrot.slane %v1253_v16, 6  ;;  %v1315_v9 = vmul.f32 %v1313_v29, %v3159_v14  ;;  %v410_v16 = vsel %vm386_vm3, %v408_v8, 0.0 }
 0x186   : > { %v1342_v63 = vrot.slane %v1336_v2, 6  ;;  %v414_v13 = vrot.slane %v410_v16, 5  ;;  %v409_v57 = vsel %vm383_vm2, 0.0, %v3312_v32 }
 0x187   : > { %v714_v50 = vadd.f32 %v709_v33, %v693_v41  ;;  %v1261_v40 = vsel %vm1239_vm9, %v1258_v26, %v1260_v25  ;;  %v1335_v33 = vmul.f32 %v1334_v59, %v3150_v39  ;;  %v1321_v23 = vrot.slane %v1315_v9, 6 }
 0x188   : > { %v1396_v59 = vstv %s3507_s17  ;;  %s2543_s17 = sld [smem:[#allocation4 + $0x39]] }
 0x189   : > { %v735_v31 = vadd.f32 %v730_v22, %v714_v50  ;;  %v1220_v22 = vsel %vm391_vm4, %v1218_v11, %v1219_v62  ;;  %v1314_v62 = vmul.f32 %v1313_v29, %v3150_v39  ;;  %v1341_v48 = vrot.slane %v1335_v33, 6 }
 0x18a   : > { %1225 = vrot.lane.b32.xlu0 %v1222_v21, %s2817_s27  ;;  %1204 = vrot.lane.b32.xlu1 %v1201_v38, %s2815_s21  ;;  %v1382_v29 = vstv %s3509_s18  ;;  %s2545_s18 = sld [smem:[#allocation4 + $0x3b]] }
 0x18b   : > { %1183 = vrot.lane.b32.xlu2 %v1180_v49, %s2816_s24  ;;  %v1320_v37 = vrot.slane %v1314_v62, 6  ;;  %v1355_v49 = vstv %s2534_s8  ;;  %s2544_s8 = sld [smem:[#allocation4 + $0x3a]] }
 0x18c   : > { %v711_v0 = vpop.permute.xlu1 %710  ;;  %v732_v5 = vpop.permute.xlu0 %731  ;;  %v1356_v30 = vmul.f32 %v1355_v49, %v3150_v39 }
 0x18d   : > { %v715_v61 = vadd.f32 %v711_v0, %v694_v1  ;;  %v793_v43 = vpop.permute.xlu2 %792  ;;  %v802_v1 = vmul.f32 %v801_v20, %v3150_v39  ;;  %v1357_v0 = vmul.f32 %v1355_v49, %v3159_v14 }
 0x18e   : > { %v1362_v9 = vrot.slane %v1356_v30, 6 }
 0x18f   : > { %v736_v60 = vadd.f32 %v732_v5, %v715_v61  ;;  %v1358_v5 = vmul.f32 %v1355_v49, %v3187_v7  ;;  %v1343_v61 = vsel %vm1239_vm9, %v1341_v48, %v1342_v63 }
 0x191   : > { %v757_v54 = vadd.f32 %v753_v18, %v736_v60  ;;  %v812_v18 = vrot.slane %v804_v58, 3  ;;  %v1301_v60 = vsel %vm1239_vm9, %v1299_v45, %v1300_v56  ;;  %v1365_v55 = vrot.slane %v1358_v5, 6 }
 0x192   : > { %1283 = vrot.lane.b32.xlu0 %v1280_v15, %s2812_s3  ;;  %1262 = vrot.lane.b32.xlu1 %v1259_v51, %s2813_s4  ;;  %v1363_v51 = vrot.slane %v1357_v0, 6 }
 0x193   : > { %1223 = vrot.lane.b32.xlu2 %v1220_v22, %s2817_s27  ;;  %v813_v3 = vsel %vm808_vm7, %v810_v10, %v812_v18  ;;  %v1344_v22 = vrot.slane %v1337_v52, 6  ;;  %v1424_v52 = vstv %s3546_s5  ;;  %s2548_s5 = sld [smem:[#allocation4 + $0x3e]] }
 0x194   : > { %v751_v17 = vpop.permute.xlu1 %750  ;;  %v772_v19 = vpop.permute.xlu0 %771  ;;  %v1366_v4 = vsel %vm1239_vm9, %v1363_v51, %v1365_v55  ;;  %v1364_v33 = vsel %vm1239_vm9, %v1362_v9, %v1363_v51 }
 0x195   : > { %v756_v24 = vadd.f32 %v751_v17, %v735_v31  ;;  %v834_v28 = vpop.permute.xlu2 %833  ;;  %v809_v31 = vrot.slane %v802_v1, 3  ;;  %v1323_v17 = vrot.slane %v1316_v46, 6 }
 0x197   : > { %v777_v6 = vadd.f32 %v772_v19, %v756_v24  ;;  %v811_v26 = vsel %vm808_vm7, %v809_v31, %v810_v10  ;;  %v1345_v24 = vsel %vm1239_vm9, %v1342_v63, %v1344_v22 }
 0x199   : > { %v798_v35 = vadd.f32 %v793_v43, %v777_v6  ;;  %v1322_v43 = vsel %vm1239_vm9, %v1320_v37, %v1321_v23  ;;  %v3522_v6 = vsel %vm391_vm4, 0.0, %v414_v13 }
 0x19a   : > { %1306 = vrot.lane.b32.xlu0 %v1303_v34, %s2814_s7  ;;  %1285 = vrot.lane.b32.xlu1 %v1282_v36, %s2812_s3  ;;  %v1397_v32 = vmul.f32 %v1396_v59, %v3522_v6  ;;  %v1383_v2 = vmul.f32 %v1382_v29, %v3522_v6 }
 0x19b   : > { %1264 = vrot.lane.b32.xlu2 %v1261_v40, %s2813_s4  ;;  %v816_v44 = vadd.f32 %v811_v26, %v798_v35  ;;  %v3529_v35 = vsel %vm386_vm3, %v409_v57, 0.0 }
 0x19c   : > { %v774_v41 = vpop.permute.xlu1 %773  ;;  %v795_v27 = vpop.permute.xlu0 %794  ;;  %v415_v1 = vrot.slane %v3529_v35, 5 }
 0x19d   : > { %v778_v50 = vadd.f32 %v774_v41, %v757_v54  ;;  %v874_v21 = vpop.permute.xlu2 %873 }
 0x19e   : > { %v3543_v41 = vsel %vm391_vm4, %v414_v13, %v415_v1  ;;  %v1483_v13 = vstv %s2543_s17  ;;  %s2552_s17 = sld [smem:[#allocation4 + $0x42]] }
 0x19f   : > { %v799_v38 = vadd.f32 %v795_v27, %v778_v50  ;;  %v945_v50 = vstv %s2514_s29  ;;  %v1398_v31 = vmul.f32 %v1396_v59, %v3543_v41  ;;  %v1384_v37 = vmul.f32 %v1382_v29, %v3543_v41  ;;  %s2547_s29 = sld [smem:[#allocation4 + $0x3d]] }
 0x1a0   : > { %v947_v63 = vmul.f32 %v945_v50, %v3159_v14  ;;  %v946_v49 = vmul.f32 %v945_v50, %v3150_v39  ;;  %v1484_v30 = vmul.f32 %v1483_v13, %v3522_v6 }
 0x1a1   : > { %v817_v42 = vadd.f32 %v813_v3, %v799_v38  ;;  %v948_v38 = vmul.f32 %v945_v50, %v3187_v7 }
 0x1a2   : > { %1346 = vrot.lane.b32.xlu0 %v1343_v61, %s2815_s21  ;;  %1325 = vrot.lane.b32.xlu1 %v1322_v43, %s2816_s24  ;;  %v954_v3 = vrot.slane %v947_v63, 4  ;;  %v1438_v43 = vstv %s3538_s12  ;;  %s2546_s12 = sld [smem:[#allocation4 + $0x3c]] }
 0x1a3   : > { %v838_v11 = vadd.f32 %v834_v28, %v817_v42  ;;  %1304 = vrot.lane.b32.xlu2 %v1301_v60, %s2814_s7  ;;  %v1324_v28 = vsel %vm1239_vm9, %v1321_v23, %v1323_v17  ;;  %v1412_v23 = vmul.f32 %v1410_v47, %v3543_v41  ;;  %v956_v0 = vrot.slane %v948_v38, 4 }
 0x1a4   : > { %v832_v12 = vpop.permute.xlu1 %831  ;;  %v853_v53 = vpop.permute.xlu0 %852  ;;  %v953_v60 = vrot.slane %v946_v49, 4  ;;  %v1439_v8 = vmul.f32 %v1438_v43, %v3522_v6  ;;  %v1452_v17 = vstv %s3557_s6  ;;  %s2551_s6 = sld [smem:[#allocation4 + $0x41]] }
 0x1a5   : > { %v837_v54 = vadd.f32 %v832_v12, %v816_v44  ;;  %v897_v15 = vpop.permute.xlu2 %896  ;;  %v957_v46 = vsel %vm952_vm8, %v954_v3, %v956_v0  ;;  %v1425_v44 = vmul.f32 %v1424_v52, %v3522_v6  ;;  %v1411_v12 = vmul.f32 %v1410_v47, %v3522_v6 }
 0x1a6   : > { %v1089_v0 = vstv %s2521_s26  ;;  %s2554_s26 = sld [smem:[#allocation4 + $0x44]] }
 0x1a7   : > { %v858_v19 = vadd.f32 %v853_v53, %v837_v54  ;;  %v955_v53 = vsel %vm952_vm8, %v953_v60, %v954_v3 }
 0x1a9   : > { %v879_v56 = vadd.f32 %v874_v21, %v858_v19  ;;  %v1504_v19 = vstv %s2544_s8  ;;  %s2550_s8 = sld [smem:[#allocation4 + $0x40]] }
 0x1aa   : > { %1369 = vrot.lane.b32.xlu0 %v1366_v4, %s2817_s27  ;;  %1348 = vrot.lane.b32.xlu1 %v1345_v24, %s2815_s21  ;;  %v1454_v4 = vmul.f32 %v1452_v17, %v3543_v41  ;;  %v1440_v24 = vmul.f32 %v1438_v43, %v3543_v41  ;;  %v1505_v57 = vmul.f32 %v1504_v19, %v3522_v6 }
 0x1ab   : > { %1327 = vrot.lane.b32.xlu2 %v1324_v28, %s2816_s24  ;;  %v1426_v28 = vmul.f32 %v1424_v52, %v3543_v41 }
 0x1ac   : > { %v855_v20 = vpop.permute.xlu1 %854  ;;  %v876_v25 = vpop.permute.xlu0 %875 }
 0x1ad   : > { %v859_v34 = vadd.f32 %v855_v20, %v838_v11  ;;  %v937_v58 = vpop.permute.xlu2 %936 }
 0x1af   : > { %v880_v36 = vadd.f32 %v876_v25, %v859_v34  ;;  %v1506_v25 = vmul.f32 %v1504_v19, %v3543_v41  ;;  %v1485_v34 = vmul.f32 %v1483_v13, %v3543_v41 }
 0x1b1   : > { %v901_v40 = vadd.f32 %v897_v15, %v880_v36  ;;  %v1511_v36 = vrot.slane %v1505_v57, 1 }
 0x1b2   : > { %1401 = vrot.lane.b32.xlu0 %v1397_v32, %s2812_s3  ;;  %1387 = vrot.lane.b32.xlu1 %v1383_v2, %s2813_s4  ;;  %v1525_v32 = vstv %s2545_s18  ;;  %s2528_s18 = sld [smem:[#allocation4 + $0x2a]] }
 0x1b3   : > { %1367 = vrot.lane.b32.xlu2 %v1364_v33, %s2817_s27  ;;  %v1490_v33 = vrot.slane %v1484_v30, 1  ;;  %v3587_v35 = vmul.f32 %v1525_v32, %v3543_v41 }
 0x1b4   : > { %v895_v62 = vpop.permute.xlu1 %894  ;;  %v916_v10 = vpop.permute.xlu0 %915 }
 0x1b5   : > { %v900_v18 = vadd.f32 %v895_v62, %v879_v56  ;;  %v978_v27 = vpop.permute.xlu2 %977  ;;  %v1491_v62 = vrot.slane %v1485_v34, 1  ;;  %v1533_v38 = vrot.slane %v3587_v35, 1 }
 0x1b7   : > { %v921_v21 = vadd.f32 %v916_v10, %v900_v18  ;;  %v1453_v18 = vmul.f32 %v1452_v17, %v3522_v6  ;;  %v1492_v50 = vsel %vm520_vm5, %v1490_v33, %v1491_v62 }
 0x1b9   : > { %v942_v48 = vadd.f32 %v937_v58, %v921_v21  ;;  %v3583_v58 = vsel %vm391_vm4, %v415_v1, 0.0 }
 0x1ba   : > { %1417 = vrot.lane.b32.xlu0 %v1412_v23, %s2814_s7  ;;  %1403 = vrot.lane.b32.xlu1 %v1398_v31, %s2812_s3  ;;  %v1528_v1 = vmul.f32 %v1525_v32, %v3583_v58  ;;  %v1507_v21 = vmul.f32 %v1504_v19, %v3583_v58  ;;  %v1486_v63 = vmul.f32 %v1483_v13, %v3583_v58 }
 0x1bb   : > { %1389 = vrot.lane.b32.xlu2 %v1384_v37, %s2813_s4  ;;  %v960_v54 = vadd.f32 %v955_v53, %v942_v48 }
 0x1bc   : > { %v918_v45 = vpop.permute.xlu1 %917  ;;  %v939_v5 = vpop.permute.xlu0 %938  ;;  %v1535_v48 = vrot.slane %v1528_v1, 1  ;;  %v1514_v3 = vrot.slane %v1507_v21, 1 }
 0x1bd   : > { %v922_v42 = vadd.f32 %v918_v45, %v901_v40  ;;  %v1018_v61 = vpop.permute.xlu2 %1017  ;;  %v1512_v40 = vrot.slane %v1506_v25, 1  ;;  %v1567_v45 = vstv %s2547_s29  ;;  %s2553_s29 = sld [smem:[#allocation4 + $0x43]] }
 0x1be   : > { %v1536_v52 = vsel %vm520_vm5, %v1533_v38, %v1535_v48  ;;  %v1568_v60 = vmul.f32 %v1567_v45, %v3522_v6 }
 0x1bf   : > { %v943_v26 = vadd.f32 %v939_v5, %v922_v42  ;;  %v1513_v47 = vsel %vm520_vm5, %v1511_v36, %v1512_v40  ;;  %v1493_v5 = vrot.slane %v1486_v63, 1  ;;  %v1546_v42 = vstv %s2546_s12  ;;  %s2555_s12 = sld [smem:[#allocation4 + $0x45]] }
 0x1c0   : > { %v1574_v17 = vrot.slane %v1568_v60, 1  ;;  %v1549_v33 = vmul.f32 %v1546_v42, %v3583_v58  ;;  %v1647_v63 = vstv %s2551_s6  ;;  %s2557_s6 = sld [smem:[#allocation4 + $0x47]] }
 0x1c1   : > { %v961_v11 = vadd.f32 %v957_v46, %v943_v26  ;;  %v1092_v26 = vmul.f32 %v1089_v0, %v3187_v7  ;;  %v1569_v46 = vmul.f32 %v1567_v45, %v3543_v41  ;;  %v1494_v53 = vsel %vm520_vm5, %v1491_v62, %v1493_v5 }
 0x1c2   : > { %1443 = vrot.lane.b32.xlu0 %v1439_v8, %s2815_s21  ;;  %1429 = vrot.lane.b32.xlu1 %v1425_v44, %s2816_s24  ;;  %v1515_v44 = vsel %vm520_vm5, %v1512_v40, %v1514_v3 }
 0x1c3   : > { %v982_v15 = vadd.f32 %v978_v27, %v961_v11  ;;  %1415 = vrot.lane.b32.xlu2 %v1411_v12, %s2814_s7  ;;  %v1547_v11 = vmul.f32 %v1546_v42, %v3522_v6  ;;  %v1548_v12 = vmul.f32 %v1546_v42, %v3543_v41  ;;  %v1575_v19 = vrot.slane %v1569_v46, 1 }
 0x1c4   : > { %v976_v51 = vpop.permute.xlu1 %975  ;;  %v997_v55 = vpop.permute.xlu0 %996 }
 0x1c5   : > { %v981_v22 = vadd.f32 %v976_v51, %v960_v54  ;;  %v1041_v16 = vpop.permute.xlu2 %1040  ;;  %v1526_v54 = vmul.f32 %v1525_v32, %v3522_v6  ;;  %v1576_v36 = vsel %vm520_vm5, %v1574_v17, %v1575_v19 }
 0x1c7   : > { %v1002_v56 = vadd.f32 %v997_v55, %v981_v22  ;;  %v1099_v22 = vrot.slane %v1092_v26, 5  ;;  %v1532_v57 = vrot.slane %v1526_v54, 1 }
 0x1c9   : > { %v1023_v20 = vadd.f32 %v1018_v61, %v1002_v56  ;;  %v1091_v61 = vmul.f32 %v1089_v0, %v3159_v14  ;;  %v1534_v40 = vsel %vm520_vm5, %v1532_v57, %v1533_v38 }
 0x1ca   : > { %1459 = vrot.lane.b32.xlu0 %v1454_v4, %s2817_s27  ;;  %1445 = vrot.lane.b32.xlu1 %v1440_v24, %s2815_s21  ;;  %v1553_v4 = vrot.slane %v1547_v11, 1  ;;  %v1554_v24 = vrot.slane %v1548_v12, 1 }
 0x1cb   : > { %1431 = vrot.lane.b32.xlu2 %v1426_v28, %s2816_s24  ;;  %v1097_v51 = vrot.slane %v1091_v61, 5  ;;  %v1588_v28 = vstv %s2548_s5  ;;  %s2558_s5 = sld [smem:[#allocation4 + $0x48]] }
 0x1cc   : > { %v999_v59 = vpop.permute.xlu1 %998  ;;  %v1020_v29 = vpop.permute.xlu0 %1019  ;;  %v1590_v34 = vmul.f32 %v1588_v28, %v3543_v41  ;;  %v1555_v32 = vsel %vm520_vm5, %v1553_v4, %v1554_v24  ;;  %v1589_v61 = vmul.f32 %v1588_v28, %v3522_v6 }
 0x1cd   : > { %v1003_v2 = vadd.f32 %v999_v59, %v982_v15  ;;  %v1081_v9 = vpop.permute.xlu2 %1080  ;;  %v1090_v15 = vmul.f32 %v1089_v0, %v3150_v39  ;;  %v1100_v30 = vsel %vm391_vm4, %v1097_v51, %v1099_v22  ;;  %v1591_v59 = vmul.f32 %v1588_v28, %v3583_v58 }
 0x1ce   : > { %v1596_v1 = vrot.slane %v1590_v34, 1  ;;  %v1595_v12 = vrot.slane %v1589_v61, 1  ;;  %v1232_v34 = vstv %s2528_s18  ;;  %s2560_s18 = sld [smem:[#allocation4 + $0x4a]] }
 0x1cf   : > { %v1024_v10 = vadd.f32 %v1020_v29, %v1003_v2  ;;  %v1096_v25 = vrot.slane %v1090_v15, 5  ;;  %v1570_v2 = vmul.f32 %v1567_v45, %v3583_v58 }
 0x1d1   : > { %v1045_v27 = vadd.f32 %v1041_v16, %v1024_v10  ;;  %v1577_v21 = vrot.slane %v1570_v2, 1 }
 0x1d2   : > { %1516 = vrot.lane.b32.xlu0 %v1513_v47, %s2812_s3  ;;  %1495 = vrot.lane.b32.xlu1 %v1492_v50, %s2813_s4 }
 0x1d3   : > { %1457 = vrot.lane.b32.xlu2 %v1453_v18, %s2817_s27  ;;  %v1578_v45 = vsel %vm520_vm5, %v1575_v19, %v1577_v21  ;;  %v1597_v19 = vsel %vm520_vm5, %v1595_v12, %v1596_v1 }
 0x1d4   : > { %v1039_v23 = vpop.permute.xlu1 %1038  ;;  %v1060_v31 = vpop.permute.xlu0 %1059 }
 0x1d5   : > { %v1044_v37 = vadd.f32 %v1039_v23, %v1023_v20  ;;  %v1121_v49 = vpop.permute.xlu2 %1120  ;;  %v1556_v23 = vrot.slane %v1549_v33, 1 }
 0x1d7   : > { %v1065_v43 = vadd.f32 %v1060_v31, %v1044_v37  ;;  %v1626_v31 = vstv %s2550_s8  ;;  %v1648_v37 = vmul.f32 %v1647_v63, %v3522_v6  ;;  %v1557_v42 = vsel %vm520_vm5, %v1554_v24, %v1556_v23  ;;  %s2559_s8 = sld [smem:[#allocation4 + $0x49]] }
 0x1d8   : > { %v1627_v0 = vmul.f32 %v1626_v31, %v3522_v6  ;;  %v1628_v5 = vmul.f32 %v1626_v31, %v3543_v41 }
 0x1d9   : > { %v1086_v8 = vadd.f32 %v1081_v9, %v1065_v43  ;;  %v1098_v9 = vsel %vm391_vm4, %v1096_v25, %v1097_v51  ;;  %v1654_v26 = vrot.slane %v1648_v37, 2  ;;  %v1650_v51 = vmul.f32 %v1647_v63, %v3583_v58 }
 0x1da   : > { %1539 = vrot.lane.b32.xlu0 %v1536_v52, %s2814_s7  ;;  %1518 = vrot.lane.b32.xlu1 %v1515_v44, %s2812_s3  ;;  %v1633_v44 = vrot.slane %v1627_v0, 2  ;;  %v1634_v11 = vrot.slane %v1628_v5, 2 }
 0x1db   : > { %1497 = vrot.lane.b32.xlu2 %v1494_v53, %s2813_s4  ;;  %v1103_v62 = vadd.f32 %v1098_v9, %v1086_v8  ;;  %v1668_v53 = vstv %s2552_s17  ;;  %v1657_v24 = vrot.slane %v1650_v51, 2  ;;  %v1235_v9 = vmul.f32 %v1232_v34, %v3187_v7  ;;  %s2561_s17 = sld [smem:[#allocation4 + $0x4b]] }
 0x1dc   : > { %v1062_v55 = vpop.permute.xlu1 %1061  ;;  %v1083_v16 = vpop.permute.xlu0 %1082  ;;  %v1635_v22 = vsel %vm664_vm6, %v1633_v44, %v1634_v11  ;;  %v1671_v17 = vmul.f32 %v1668_v53, %v3583_v58  ;;  %v1233_v7 = vmul.f32 %v1232_v34, %v3150_v39 }
 0x1dd   : > { %v1066_v13 = vadd.f32 %v1062_v55, %v1045_v27  ;;  %v1161_v56 = vpop.permute.xlu2 %1160  ;;  %v1598_v27 = vrot.slane %v1591_v59, 1 }
 0x1de   : > { %v1678_v25 = vrot.slane %v1671_v17, 2  ;;  %v1240_v0 = vrot.slane %v1233_v7, 6 }
 0x1df   : > { %v1087_v20 = vadd.f32 %v1083_v16, %v1066_v13  ;;  %v1599_v38 = vsel %vm520_vm5, %v1596_v1, %v1598_v27  ;;  %v3639_v16 = vmul.f32 %v1668_v53, %v3543_v41  ;;  %v1629_v13 = vmul.f32 %v1626_v31, %v3583_v58 }
 0x1e0   : > { %v1669_v1 = vmul.f32 %v1668_v53, %v3522_v6 }
 0x1e1   : > { %v1104_v29 = vadd.f32 %v1100_v30, %v1087_v20  ;;  %v1676_v20 = vrot.slane %v3639_v16, 2  ;;  %v1710_v30 = vstv %s2554_s26  ;;  %v1636_v59 = vrot.slane %v1629_v13, 2  ;;  %s3695_s26 = sld [smem:[#allocation4 + $0x31]] }
 0x1e2   : > { %1579 = vrot.lane.b32.xlu0 %v1576_v36, %s2815_s21  ;;  %1558 = vrot.lane.b32.xlu1 %v1555_v32, %s2816_s24  ;;  %v1234_v36 = vmul.f32 %v1232_v34, %v3159_v14  ;;  %v1712_v33 = vmul.f32 %v1710_v30, %v3543_v41  ;;  %v1790_v16 = vstv %s2558_s5  ;;  %s2564_s5 = sld [smem:[#allocation4 + $0x4e]] }
 0x1e3   : > { %v1125_v10 = vadd.f32 %v1121_v49, %v1104_v29  ;;  %1537 = vrot.lane.b32.xlu2 %v1534_v40, %s2814_s7  ;;  %v1649_v49 = vmul.f32 %v1647_v63, %v3543_v41  ;;  %v1689_v29 = vstv %s2553_s29  ;;  %v1711_v40 = vmul.f32 %v1710_v30, %v3522_v6  ;;  %s2562_s29 = sld [smem:[#allocation4 + $0x4c]] }
 0x1e4   : > { %v1119_v18 = vpop.permute.xlu1 %1118  ;;  %v1140_v35 = vpop.permute.xlu0 %1139  ;;  %v1637_v14 = vsel %vm664_vm6, %v1634_v11, %v1636_v59  ;;  %v1241_v27 = vrot.slane %v1234_v36, 6  ;;  %v1718_v23 = vrot.slane %v1712_v33, 2 }
 0x1e5   : > { %v1124_v47 = vadd.f32 %v1119_v18, %v1103_v62  ;;  %v1184_v50 = vpop.permute.xlu2 %1183  ;;  %v1655_v60 = vrot.slane %v1649_v49, 2  ;;  %v1690_v18 = vmul.f32 %v1689_v29, %v3522_v6  ;;  %v1717_v63 = vrot.slane %v1711_v40, 2 }
 0x1e6   : > { %v1731_v49 = vstv %s2555_s12  ;;  %s2565_s12 = sld [smem:[#allocation4 + $0x4f]] }
 0x1e7   : > { %v1145_v48 = vadd.f32 %v1140_v35, %v1124_v47  ;;  %v1656_v15 = vsel %vm664_vm6, %v1654_v26, %v1655_v60  ;;  %v1658_v2 = vsel %vm664_vm6, %v1655_v60, %v1657_v24  ;;  %v1691_v35 = vmul.f32 %v1689_v29, %v3543_v41 }
 0x1e8   : > { %v1733_v5 = vmul.f32 %v1731_v49, %v3543_v41  ;;  %v1713_v26 = vmul.f32 %v1710_v30, %v3583_v58  ;;  %v1242_v60 = vsel %vm1239_vm9, %v1240_v0, %v1241_v27  ;;  %v1792_v24 = vmul.f32 %v1790_v16, %v3543_v41 }
 0x1e9   : > { %v1166_v3 = vadd.f32 %v1161_v56, %v1145_v48  ;;  %v1697_v37 = vrot.slane %v1691_v35, 2  ;;  %v1732_v34 = vmul.f32 %v1731_v49, %v3522_v6  ;;  %v1832_v0 = vstv %s2560_s18  ;;  %s2567_s18 = sld [smem:[#allocation4 + $0x51]] }
 0x1ea   : > { %1602 = vrot.lane.b32.xlu0 %v1599_v38, %s2817_s27  ;;  %1581 = vrot.lane.b32.xlu1 %v1578_v45, %s2815_s21  ;;  %v1696_v38 = vrot.slane %v1690_v18, 2 }
 0x1eb   : > { %1560 = vrot.lane.b32.xlu2 %v1557_v42, %s2816_s24  ;;  %v1734_v42 = vmul.f32 %v1731_v49, %v3583_v58 }
 0x1ec   : > { %v1142_v43 = vpop.permute.xlu1 %1141  ;;  %v1163_v52 = vpop.permute.xlu0 %1162 }
 0x1ed   : > { %v1146_v46 = vadd.f32 %v1142_v43, %v1125_v10  ;;  %v1224_v8 = vpop.permute.xlu2 %1223  ;;  %v1679_v10 = vsel %vm664_vm6, %v1676_v20, %v1678_v25  ;;  %v1719_v43 = vsel %vm664_vm6, %v1717_v63, %v1718_v23 }
 0x1ef   : > { %v1167_v54 = vadd.f32 %v1163_v52, %v1146_v46  ;;  %v1698_v52 = vsel %vm664_vm6, %v1696_v38, %v1697_v37 }
 0x1f1   : > { %v1188_v55 = vadd.f32 %v1184_v50, %v1167_v54  ;;  %v1243_v50 = vrot.slane %v1235_v9, 6  ;;  %v1739_v54 = vrot.slane %v1733_v5, 2 }
 0x1f2   : > { %1659 = vrot.lane.b32.xlu0 %v1656_v15, %s2812_s3  ;;  %1638 = vrot.lane.b32.xlu1 %v1635_v22, %s2813_s4  ;;  %v1741_v15 = vrot.slane %v1734_v42, 2  ;;  %v1720_v22 = vrot.slane %v1713_v26, 2  ;;  %v1833_v26 = vmul.f32 %v1832_v0, %v3522_v6 }
 0x1f3   : > { %1600 = vrot.lane.b32.xlu2 %v1597_v19, %s2817_s27  ;;  %v1244_v39 = vsel %vm1239_vm9, %v1241_v27, %v1243_v50  ;;  %v1769_v19 = vstv %s2557_s6  ;;  %s2566_s6 = sld [smem:[#allocation4 + $0x50]] }
 0x1f4   : > { %v1182_v56 = vpop.permute.xlu1 %1181  ;;  %v1203_v4 = vpop.permute.xlu0 %1202 }
 0x1f5   : > { %v1187_v28 = vadd.f32 %v1182_v56, %v1166_v3  ;;  %v1265_v57 = vpop.permute.xlu2 %1264  ;;  %v1675_v3 = vrot.slane %v1669_v1, 2  ;;  %v1742_v56 = vsel %vm664_vm6, %v1739_v54, %v1741_v15  ;;  %v1793_v1 = vmul.f32 %v1790_v16, %v3583_v58 }
 0x1f7   : > { %v1208_v32 = vadd.f32 %v1203_v4, %v1187_v28  ;;  %v1677_v46 = vsel %vm664_vm6, %v1675_v3, %v1676_v20  ;;  %v1791_v4 = vmul.f32 %v1790_v16, %v3522_v6  ;;  %v1721_v28 = vsel %vm664_vm6, %v1718_v23, %v1720_v22 }
 0x1f8   : > { %v1771_v20 = vmul.f32 %v1769_v19, %v3543_v41  ;;  %v1800_v38 = vrot.slane %v1793_v1, 3  ;;  %v1853_v3 = vstv %s2561_s17  ;;  %v1839_v22 = vrot.slane %v1833_v26, 3  ;;  %s2568_s17 = sld [smem:[#allocation4 + $0x52]] }
 0x1f9   : > { %v1229_v62 = vadd.f32 %v1224_v8, %v1208_v32  ;;  %v1692_v8 = vmul.f32 %v1689_v29, %v3583_v58  ;;  %v1797_v36 = vrot.slane %v1791_v4, 3  ;;  %v1798_v32 = vrot.slane %v1792_v24, 3 }
 0x1fa   : > { %1682 = vrot.lane.b32.xlu0 %v1679_v10, %s2814_s7  ;;  %1661 = vrot.lane.b32.xlu1 %v1658_v2, %s2812_s3  ;;  %v1777_v33 = vrot.slane %v1771_v20, 3  ;;  %v1738_v10 = vrot.slane %v1732_v34, 2  ;;  %v1835_v34 = vmul.f32 %v1832_v0, %v3583_v58 }
 0x1fb   : > { %1640 = vrot.lane.b32.xlu2 %v1637_v14, %s2813_s4  ;;  %v1247_v44 = vadd.f32 %v1242_v60, %v1229_v62  ;;  %v1699_v17 = vrot.slane %v1692_v8, 2  ;;  %v1811_v62 = vstv %s2559_s8  ;;  %v1799_v7 = vsel %vm808_vm7, %v1797_v36, %v1798_v32  ;;  %s2542_s8 = sld [smem:[#allocation4 + $0x38]] }
 0x1fc   : > { %v1205_v47 = vpop.permute.xlu1 %1204  ;;  %v1226_v21 = vpop.permute.xlu0 %1225  ;;  %v1813_v35 = vmul.f32 %v1811_v62, %v3543_v41  ;;  %v1814_v14 = vmul.f32 %v1811_v62, %v3583_v58  ;;  %v1740_v50 = vsel %vm664_vm6, %v1738_v10, %v1739_v54  ;;  %v1801_v42 = vsel %vm808_vm7, %v1798_v32, %v1800_v38 }
 0x1fd   : > { %v1209_v31 = vadd.f32 %v1205_v47, %v1188_v55  ;;  %v1305_v48 = vpop.permute.xlu2 %1304  ;;  %v1700_v30 = vsel %vm664_vm6, %v1697_v37, %v1699_v17  ;;  %v1834_v60 = vmul.f32 %v1832_v0, %v3543_v41  ;;  %v1812_v8 = vmul.f32 %v1811_v62, %v3522_v6 }
 0x1fe   : > { %v1874_v54 = vstv %s2562_s29  ;;  %v1933_v10 = vstv %s2565_s12  ;;  %s2572_s29 = sld [smem:[#allocation4 + $0x56]] }
 0x1ff   : > { %v1230_v45 = vadd.f32 %v1226_v21, %v1209_v31  ;;  %v1772_v21 = vmul.f32 %v1769_v19, %v3583_v58  ;;  %v1819_v31 = vrot.slane %v1813_v35, 3  ;;  %v1840_v16 = vrot.slane %v1834_v60, 3  ;;  %s2571_s12 = sld [smem:[#allocation4 + $0x55]] }
 0x200   : > { %v1818_v17 = vrot.slane %v1812_v8, 3  ;;  %v1876_v4 = vmul.f32 %v1874_v54, %v3543_v41  ;;  %v1877_v24 = vmul.f32 %v1874_v54, %v3583_v58  ;;  %v1912_v35 = vstv %s2564_s5  ;;  %s2573_s5 = sld [smem:[#allocation4 + $0x57]] }
 0x201   : > { %v1248_v61 = vadd.f32 %v1244_v39, %v1230_v45  ;;  %v1779_v45 = vrot.slane %v1772_v21, 3  ;;  %v1841_v20 = vsel %vm808_vm7, %v1839_v22, %v1840_v16  ;;  %v1914_v21 = vmul.f32 %v1912_v35, %v3543_v41 }
 0x202   : > { %1722 = vrot.lane.b32.xlu0 %v1719_v43, %s2815_s21  ;;  %1701 = vrot.lane.b32.xlu1 %v1698_v52, %s2816_s24  ;;  %v1855_v52 = vmul.f32 %v1853_v3, %v3543_v41 }
 0x203   : > { %v1269_v11 = vadd.f32 %v1265_v57, %v1248_v61  ;;  %1680 = vrot.lane.b32.xlu2 %v1677_v46, %s2814_s7  ;;  %v1770_v57 = vmul.f32 %v1769_v19, %v3522_v6  ;;  %v1854_v61 = vmul.f32 %v1853_v3, %v3522_v6  ;;  %v1780_v46 = vsel %vm808_vm7, %v1777_v33, %v1779_v45 }
 0x204   : > { %v1263_v12 = vpop.permute.xlu1 %1262  ;;  %v1284_v53 = vpop.permute.xlu0 %1283 }
 0x205   : > { %v1268_v51 = vadd.f32 %v1263_v12, %v1247_v44  ;;  %v1328_v55 = vpop.permute.xlu2 %1327  ;;  %v1776_v40 = vrot.slane %v1770_v57, 3 }
 0x207   : > { %v1289_v13 = vadd.f32 %v1284_v53, %v1268_v51  ;;  %v1778_v27 = vsel %vm808_vm7, %v1776_v40, %v1777_v33  ;;  %v1860_v53 = vrot.slane %v1854_v61, 3 }
 0x209   : > { %v1310_v25 = vadd.f32 %v1305_v48, %v1289_v13  ;;  %v1821_v48 = vrot.slane %v1814_v14, 3 }
 0x20a   : > { %1745 = vrot.lane.b32.xlu0 %v1742_v56, %s2817_s27  ;;  %1724 = vrot.lane.b32.xlu1 %v1721_v28, %s2815_s21 }
 0x20b   : > { %1703 = vrot.lane.b32.xlu2 %v1700_v30, %s2816_s24  ;;  %v1822_v5 = vsel %vm808_vm7, %v1819_v31, %v1821_v48  ;;  %v1820_v30 = vsel %vm808_vm7, %v1818_v17, %v1819_v31  ;;  %v1875_v31 = vmul.f32 %v1874_v54, %v3522_v6  ;;  %v1996_v17 = vstv %s2568_s17  ;;  %s2575_s17 = sld [smem:[#allocation4 + $0x59]] }
 0x20c   : > { %v1286_v59 = vpop.permute.xlu1 %1285  ;;  %v1307_v29 = vpop.permute.xlu0 %1306 }
 0x20d   : > { %v1290_v2 = vadd.f32 %v1286_v59, %v1269_v11  ;;  %v1368_v9 = vpop.permute.xlu2 %1367  ;;  %v1376_v11 = vstv %s3695_s26  ;;  %s2569_s26 = sld [smem:[#allocation4 + $0x53]] }
 0x20e   : > { %v1378_v19 = vmul.f32 %v1376_v11, %v3543_v41  ;;  %v1377_v56 = vmul.f32 %v1376_v11, %v3522_v6  ;;  %v1915_v11 = vmul.f32 %v1912_v35, %v3583_v58 }
 0x20f   : > { %v1311_v18 = vadd.f32 %v1307_v29, %v1290_v2  ;;  %v1882_v2 = vrot.slane %v1876_v4, 3 }
 0x211   : > { %v1332_v47 = vadd.f32 %v1328_v55, %v1311_v18  ;;  %v1861_v55 = vrot.slane %v1855_v52, 3  ;;  %v1842_v18 = vrot.slane %v1835_v34, 3 }
 0x212   : > { %1802 = vrot.lane.b32.xlu0 %v1799_v7, %s2812_s3  ;;  %1781 = vrot.lane.b32.xlu1 %v1778_v27, %s2813_s4  ;;  %v1934_v7 = vmul.f32 %v1933_v10, %v3522_v6  ;;  %v1935_v27 = vmul.f32 %v1933_v10, %v3543_v41 }
 0x213   : > { %1743 = vrot.lane.b32.xlu2 %v1740_v50, %s2817_s27  ;;  %v1862_v57 = vsel %vm808_vm7, %v1860_v53, %v1861_v55  ;;  %v1913_v50 = vmul.f32 %v1912_v35, %v3522_v6 }
 0x214   : > { %v1326_v63 = vpop.permute.xlu1 %1325  ;;  %v1347_v23 = vpop.permute.xlu0 %1346 }
 0x215   : > { %v1331_v37 = vadd.f32 %v1326_v63, %v1310_v25  ;;  %v1390_v49 = vpop.permute.xlu2 %1389  ;;  %v1856_v25 = vmul.f32 %v1853_v3, %v3583_v58  ;;  %v1919_v0 = vrot.slane %v1913_v50, 4 }
 0x217   : > { %v1352_v39 = vadd.f32 %v1347_v23, %v1331_v37  ;;  %v1863_v62 = vrot.slane %v1856_v25, 3  ;;  %v1843_v23 = vsel %vm808_vm7, %v1840_v16, %v1842_v18  ;;  %v1940_v37 = vrot.slane %v1934_v7, 4 }
 0x218   : > { %v1466_v16 = vstv %s2542_s8  ;;  %v2017_v7 = vstv %s2569_s26  ;;  %s2574_s8 = sld [smem:[#allocation4 + $0x58]] }
 0x219   : > { %v1373_v43 = vadd.f32 %v1368_v9, %v1352_v39  ;;  %v1884_v9 = vrot.slane %v1877_v24, 3  ;;  %v1920_v39 = vrot.slane %v1914_v21, 4  ;;  %v1468_v24 = vmul.f32 %v1466_v16, %v3543_v41  ;;  %s2578_s26 = sld [smem:[#allocation4 + $0x5c]] }
 0x21a   : > { %1825 = vrot.lane.b32.xlu0 %v1822_v5, %s2814_s7  ;;  %1804 = vrot.lane.b32.xlu1 %v1801_v42, %s2812_s3  ;;  %v1954_v5 = vstv %s2566_s6  ;;  %v1881_v42 = vrot.slane %v1875_v31, 3  ;;  %s2549_s6 = sld [smem:[#allocation4 + $0x3f]] }
 0x21b   : > { %1783 = vrot.lane.b32.xlu2 %v1780_v46, %s2813_s4  ;;  %v1379_v59 = vadd.f32 %v1377_v56, %v1373_v43  ;;  %v1885_v1 = vsel %vm808_vm7, %v1882_v2, %v1884_v9  ;;  %v1936_v43 = vmul.f32 %v1933_v10, %v3583_v58  ;;  %v3734_v52 = vmul.f32 %v1954_v5, %v3543_v41 }
 0x21c   : > { %v1349_v44 = vpop.permute.xlu1 %1348  ;;  %v1370_v12 = vpop.permute.xlu0 %1369  ;;  %v1921_v60 = vsel %vm952_vm8, %v1919_v0, %v1920_v39  ;;  %v1957_v46 = vmul.f32 %v1954_v5, %v3583_v58  ;;  %v1474_v9 = vrot.slane %v1468_v24, 1 }
 0x21d   : > { %v1353_v15 = vadd.f32 %v1349_v44, %v1332_v47  ;;  %v1416_v51 = vpop.permute.xlu2 %1415  ;;  %v1864_v47 = vsel %vm808_vm7, %v1861_v55, %v1863_v62  ;;  %v1883_v44 = vsel %vm808_vm7, %v1881_v42, %v1882_v2 }
 0x21e   : > { %v1964_v22 = vrot.slane %v1957_v46, 4  ;;  %v2076_v46 = vstv %s2572_s29  ;;  %s2579_s29 = sld [smem:[#allocation4 + $0x5d]] }
 0x21f   : > { %v1374_v13 = vadd.f32 %v1370_v12, %v1353_v15  ;;  %v1943_v12 = vrot.slane %v1936_v43, 4  ;;  %v1962_v15 = vrot.slane %v3734_v52, 4 }
 0x221   : > { %v1380_v28 = vadd.f32 %v1378_v19, %v1374_v13  ;;  %v1922_v19 = vrot.slane %v1915_v11, 4  ;;  %v1975_v13 = vstv %s2567_s18  ;;  %s2576_s18 = sld [smem:[#allocation4 + $0x5a]] }
 0x222   : > { %1865 = vrot.lane.b32.xlu0 %v1862_v57, %s2815_s21  ;;  %1844 = vrot.lane.b32.xlu1 %v1841_v20, %s2816_s24  ;;  %v1997_v57 = vmul.f32 %v1996_v17, %v3522_v6  ;;  %v1998_v20 = vmul.f32 %v1996_v17, %v3543_v41  ;;  %v1976_v34 = vmul.f32 %v1975_v13, %v3522_v6 }
 0x223   : > { %1823 = vrot.lane.b32.xlu2 %v1820_v30, %s2814_s7  ;;  %v1394_v29 = vadd.f32 %v1390_v49, %v1380_v28  ;;  %v1941_v49 = vrot.slane %v1935_v27, 4  ;;  %v1469_v28 = vmul.f32 %v1466_v16, %v3583_v58  ;;  %v1965_v30 = vsel %vm952_vm8, %v1962_v15, %v1964_v22 }
 0x224   : > { %v1388_v36 = vpop.permute.xlu1 %1387  ;;  %v1402_v32 = vpop.permute.xlu0 %1401  ;;  %v2003_v62 = vrot.slane %v1997_v57, 4  ;;  %v2004_v10 = vrot.slane %v1998_v20, 4 }
 0x225   : > { %v1393_v40 = vadd.f32 %v1388_v36, %v1379_v59  ;;  %v1432_v33 = vpop.permute.xlu2 %1431  ;;  %v1942_v26 = vsel %vm952_vm8, %v1940_v37, %v1941_v49  ;;  %v1944_v4 = vsel %vm952_vm8, %v1941_v49, %v1943_v12  ;;  %v1977_v59 = vmul.f32 %v1975_v13, %v3543_v41 }
 0x226   : > { %v1955_v36 = vmul.f32 %v1954_v5, %v3522_v6  ;;  %v1999_v37 = vmul.f32 %v1996_v17, %v3583_v58  ;;  %v2018_v17 = vmul.f32 %v2017_v7, %v3522_v6 }
 0x227   : > { %v1407_v14 = vadd.f32 %v1402_v32, %v1393_v40  ;;  %v1467_v32 = vmul.f32 %v1466_v16, %v3522_v6  ;;  %v1476_v40 = vrot.slane %v1469_v28, 1 }
 0x228   : > { %v1961_v27 = vrot.slane %v1955_v36, 4 }
 0x229   : > { %v1421_v63 = vadd.f32 %v1416_v51, %v1407_v14  ;;  %v1982_v14 = vrot.slane %v1976_v34, 4  ;;  %v1477_v21 = vsel %vm520_vm5, %v1474_v9, %v1476_v40 }
 0x22a   : > { %1888 = vrot.lane.b32.xlu0 %v1885_v1, %s2817_s27  ;;  %1867 = vrot.lane.b32.xlu1 %v1864_v47, %s2815_s21  ;;  %v1983_v1 = vrot.slane %v1977_v59, 4  ;;  %v1473_v47 = vrot.slane %v1467_v32, 1  ;;  %v1963_v49 = vsel %vm952_vm8, %v1961_v27, %v1962_v15  ;;  %v2079_v59 = vmul.f32 %v2076_v46, %v3583_v58 }
 0x22b   : > { %1846 = vrot.lane.b32.xlu2 %v1843_v23, %s2816_s24  ;;  %v2020_v23 = vmul.f32 %v2017_v7, %v3583_v58 }
 0x22c   : > { %v1404_v48 = vpop.permute.xlu1 %1403  ;;  %v1418_v38 = vpop.permute.xlu0 %1417 }
 0x22d   : > { %v1408_v3 = vadd.f32 %v1404_v48, %v1394_v29  ;;  %v1458_v45 = vpop.permute.xlu2 %1457  ;;  %v1923_v29 = vsel %vm952_vm8, %v1920_v39, %v1922_v19  ;;  %v2005_v48 = vsel %vm952_vm8, %v2003_v62, %v2004_v10  ;;  %v2027_v43 = vrot.slane %v2020_v23, 4 }
 0x22e   : > { %v2086_v62 = vrot.slane %v2079_v59, 5 }
 0x22f   : > { %v1422_v61 = vadd.f32 %v1418_v38, %v1408_v3  ;;  %v1984_v38 = vsel %vm952_vm8, %v1982_v14, %v1983_v1  ;;  %v1475_v3 = vsel %vm520_vm5, %v1473_v47, %v1474_v9  ;;  %v2118_v47 = vstv %s2574_s8  ;;  %s2582_s8 = sld [smem:[#allocation4 + $0x60]] }
 0x231   : > { %v1436_v8 = vadd.f32 %v1432_v33, %v1422_v61 }
 0x232   : > { %1945 = vrot.lane.b32.xlu0 %v1942_v26, %s2812_s3  ;;  %1924 = vrot.lane.b32.xlu1 %v1921_v60, %s2813_s4  ;;  %v2006_v60 = vrot.slane %v1999_v37, 4  ;;  %v3797_v37 = vmul.f32 %v2118_v47, %v3543_v41 }
 0x233   : > { %1886 = vrot.lane.b32.xlu2 %v1883_v44, %s2817_s27  ;;  %v2055_v44 = vstv %s2571_s12  ;;  %s2580_s12 = sld [smem:[#allocation4 + $0x5e]] }
 0x234   : > { %v1430_v53 = vpop.permute.xlu1 %1429  ;;  %v1444_v54 = vpop.permute.xlu0 %1443  ;;  %v2007_v15 = vsel %vm952_vm8, %v2004_v10, %v2006_v60 }
 0x235   : > { %v1435_v51 = vadd.f32 %v1430_v53, %v1421_v63  ;;  %v1498_v55 = vpop.permute.xlu2 %1497  ;;  %v2019_v63 = vmul.f32 %v2017_v7, %v3543_v41  ;;  %v2077_v53 = vmul.f32 %v2076_v46, %v3522_v6 }
 0x237   : > { %v1449_v56 = vadd.f32 %v1444_v54, %v1435_v51  ;;  %v2025_v61 = vrot.slane %v2019_v63, 4  ;;  %v2078_v54 = vmul.f32 %v2076_v46, %v3543_v41  ;;  %v2056_v51 = vmul.f32 %v2055_v44, %v3522_v6 }
 0x238   : > { %v2126_v46 = vrot.slane %v3797_v37, 5 }
 0x239   : > { %v1463_v25 = vadd.f32 %v1458_v45, %v1449_v56  ;;  %v1978_v45 = vmul.f32 %v1975_v13, %v3583_v58  ;;  %v2028_v12 = vsel %vm952_vm8, %v2025_v61, %v2027_v43  ;;  %v2083_v56 = vrot.slane %v2077_v53, 5 }
 0x23a   : > { %1968 = vrot.lane.b32.xlu0 %v1965_v30, %s2814_s7  ;;  %1947 = vrot.lane.b32.xlu1 %v1944_v4, %s2812_s3  ;;  %v2084_v4 = vrot.slane %v2078_v54, 5  ;;  %v2062_v57 = vrot.slane %v2056_v51, 5  ;;  %v2097_v30 = vstv %s2573_s5  ;;  %s2556_s5 = sld [smem:[#allocation4 + $0x46]] }
 0x23b   : > { %1926 = vrot.lane.b32.xlu2 %v1923_v29, %s2813_s4  ;;  %v1480_v0 = vadd.f32 %v1475_v3, %v1463_v25  ;;  %v2024_v25 = vrot.slane %v2018_v17, 4  ;;  %v2099_v32 = vmul.f32 %v2097_v30, %v3543_v41 }
 0x23c   : > { %v1446_v2 = vpop.permute.xlu1 %1445  ;;  %v1460_v33 = vpop.permute.xlu0 %1459  ;;  %v2085_v29 = vsel %vm391_vm4, %v2083_v56, %v2084_v4  ;;  %v2087_v23 = vsel %vm391_vm4, %v2084_v4, %v2086_v62 }
 0x23d   : > { %v1450_v18 = vadd.f32 %v1446_v2, %v1436_v8  ;;  %v1538_v35 = vpop.permute.xlu2 %1537  ;;  %v1985_v8 = vrot.slane %v1978_v45, 4  ;;  %v2100_v2 = vmul.f32 %v2097_v30, %v3583_v58  ;;  %v2026_v40 = vsel %vm952_vm8, %v2024_v25, %v2025_v61 }
 0x23e   : > { %v2105_v7 = vrot.slane %v2099_v32, 5 }
 0x23f   : > { %v1464_v50 = vadd.f32 %v1460_v33, %v1450_v18  ;;  %v1986_v16 = vsel %vm952_vm8, %v1983_v1, %v1985_v8  ;;  %v2058_v33 = vmul.f32 %v2055_v44, %v3583_v58  ;;  %v2107_v27 = vrot.slane %v2100_v2, 5 }
 0x240   : > { %v2198_v2 = vstv %s2578_s26 }
 0x241   : > { %v1481_v31 = vadd.f32 %v1477_v21, %v1464_v50  ;;  %v2065_v50 = vrot.slane %v2058_v33, 5  ;;  %v2139_v21 = vstv %s2575_s17  ;;  %v2108_v3 = vsel %vm391_vm4, %v2105_v7, %v2107_v27  ;;  %s2583_s17 = sld [smem:[#allocation4 + $0x61]] }
 0x242   : > { %2008 = vrot.lane.b32.xlu0 %v2005_v48, %s2815_s21  ;;  %1987 = vrot.lane.b32.xlu1 %v1984_v38, %s2816_s24  ;;  %v2119_v38 = vmul.f32 %v2118_v47, %v3522_v6  ;;  %v2140_v45 = vmul.f32 %v2139_v21, %v3522_v6 }
 0x243   : > { %1966 = vrot.lane.b32.xlu2 %v1963_v49, %s2814_s7  ;;  %v1502_v39 = vadd.f32 %v1498_v55, %v1481_v31  ;;  %v2057_v55 = vmul.f32 %v2055_v44, %v3543_v41 }
 0x244   : > { %v1496_v5 = vpop.permute.xlu1 %1495  ;;  %v1517_v42 = vpop.permute.xlu0 %1516  ;;  %v2125_v60 = vrot.slane %v2119_v38, 5 }
 0x245   : > { %v1501_v52 = vadd.f32 %v1496_v5, %v1480_v0  ;;  %v1561_v26 = vpop.permute.xlu2 %1560  ;;  %v2063_v20 = vrot.slane %v2057_v55, 5  ;;  %v2141_v0 = vmul.f32 %v2139_v21, %v3543_v41  ;;  %v2098_v5 = vmul.f32 %v2097_v30, %v3522_v6 }
 0x247   : > { %v1522_v11 = vadd.f32 %v1517_v42, %v1501_v52  ;;  %v2064_v36 = vsel %vm391_vm4, %v2062_v57, %v2063_v20  ;;  %v2104_v53 = vrot.slane %v2098_v5, 5 }
 0x249   : > { %v1543_v22 = vadd.f32 %v1538_v35, %v1522_v11  ;;  %v1609_v35 = vstv %s2549_s6  ;;  %v2146_v11 = vrot.slane %v2140_v45, 5  ;;  %v2106_v4 = vsel %vm391_vm4, %v2104_v53, %v2105_v7  ;;  %s2581_s6 = sld [smem:[#allocation4 + $0x5f]] }
 0x24a   : > { %2031 = vrot.lane.b32.xlu0 %v2028_v12, %s2817_s27  ;;  %2010 = vrot.lane.b32.xlu1 %v2007_v15, %s2815_s21  ;;  %v1611_v31 = vmul.f32 %v1609_v35, %v3543_v41  ;;  %v1612_v48 = vmul.f32 %v1609_v35, %v3583_v58  ;;  %v1610_v42 = vmul.f32 %v1609_v35, %v3522_v6  ;;  %v2147_v12 = vrot.slane %v2141_v0, 5 }
 0x24b   : > { %1989 = vrot.lane.b32.xlu2 %v1986_v16, %s2816_s24  ;;  %v2160_v15 = vstv %s2576_s18  ;;  %v2142_v16 = vmul.f32 %v2139_v21, %v3583_v58 }
 0x24c   : > { %v1519_v19 = vpop.permute.xlu1 %1518  ;;  %v1540_v13 = vpop.permute.xlu0 %1539  ;;  %v1617_v43 = vrot.slane %v1611_v31, 2  ;;  %v1619_v52 = vrot.slane %v1612_v48, 2  ;;  %v1616_v54 = vrot.slane %v1610_v42, 2  ;;  %v2163_v56 = vmul.f32 %v2160_v15, %v3583_v58 }
 0x24d   : > { %v1523_v24 = vadd.f32 %v1519_v19, %v1502_v39  ;;  %v1601_v28 = vpop.permute.xlu2 %1600  ;;  %v2066_v39 = vsel %vm391_vm4, %v2063_v20, %v2065_v50  ;;  %v2148_v19 = vsel %vm391_vm4, %v2146_v11, %v2147_v12 }
 0x24e   : > { %v1620_v55 = vsel %vm664_vm6, %v1617_v43, %v1619_v52  ;;  %v2170_v32 = vrot.slane %v2163_v56, 5 }
 0x24f   : > { %v1544_v34 = vadd.f32 %v1540_v13, %v1523_v24  ;;  %v2162_v13 = vmul.f32 %v2160_v15, %v3543_v41  ;;  %v1618_v24 = vsel %vm664_vm6, %v1616_v54, %v1617_v43 }
 0x251   : > { %v1565_v9 = vadd.f32 %v1561_v26, %v1544_v34  ;;  %v2149_v34 = vrot.slane %v2142_v16, 5 }
 0x252   : > { %2088 = vrot.lane.b32.xlu0 %v2085_v29, %s2812_s3  ;;  %2067 = vrot.lane.b32.xlu1 %v2064_v36, %s2813_s4  ;;  %v2168_v36 = vrot.slane %v2162_v13, 5 }
 0x253   : > { %2029 = vrot.lane.b32.xlu2 %v2026_v40, %s2817_s27  ;;  %v2219_v40 = vstv %s2579_s29  ;;  %v2150_v62 = vsel %vm391_vm4, %v2147_v12, %v2149_v34 }
 0x254   : > { %v1559_v10 = vpop.permute.xlu1 %1558  ;;  %v1580_v18 = vpop.permute.xlu0 %1579  ;;  %v2171_v35 = vsel %vm391_vm4, %v2168_v36, %v2170_v32  ;;  %v2222_v0 = vmul.f32 %v2219_v40, %v3583_v58 }
 0x255   : > { %v1564_v14 = vadd.f32 %v1559_v10, %v1543_v22  ;;  %v1641_v1 = vpop.permute.xlu2 %1640  ;;  %v2127_v22 = vsel %vm391_vm4, %v2125_v60, %v2126_v46  ;;  %v2199_v10 = vmul.f32 %v2198_v2, %v3522_v6 }
 0x256   : > { %v2229_v60 = vrot.slane %v2222_v0, 6 }
 0x257   : > { %v1585_v63 = vadd.f32 %v1580_v18, %v1564_v14  ;;  %v2200_v18 = vmul.f32 %v2198_v2, %v3543_v41  ;;  %v2220_v14 = vmul.f32 %v2219_v40, %v3522_v6 }
 0x259   : > { %v1606_v49 = vadd.f32 %v1601_v28, %v1585_v63  ;;  %v2121_v28 = vmul.f32 %v2118_v47, %v3583_v58  ;;  %v2161_v47 = vmul.f32 %v2160_v15, %v3522_v6  ;;  %v2205_v63 = vrot.slane %v2199_v10, 6 }
 0x25a   : > { %2090 = vrot.lane.b32.xlu1 %v2087_v23, %s2812_s3  ;;  %2111 = vrot.lane.b32.xlu0 %v2108_v3, %s2814_s7  ;;  %v2206_v23 = vrot.slane %v2200_v18, 6  ;;  %v2226_v38 = vrot.slane %v2220_v14, 6  ;;  %v2240_v3 = vstv %s2580_s12  ;;  %v2261_v15 = vstv %s2581_s6 }
 0x25b   : > { %2069 = vrot.lane.b32.xlu2 %v2066_v39, %s2813_s4  ;;  %v1623_v57 = vadd.f32 %v1618_v24, %v1606_v49  ;;  %v2167_v49 = vrot.slane %v2161_v47, 5  ;;  %v2242_v42 = vmul.f32 %v2240_v3, %v3543_v41  ;;  %v2262_v13 = vmul.f32 %v2261_v15, %v3522_v6 }
 0x25c   : > { %v1582_v61 = vpop.permute.xlu1 %1581  ;;  %v1603_v26 = vpop.permute.xlu0 %1602  ;;  %v2207_v39 = vsel %vm1239_vm9, %v2205_v63, %v2206_v23  ;;  %v2263_v56 = vmul.f32 %v2261_v15, %v3543_v41 }
 0x25d   : > { %v1586_v8 = vadd.f32 %v1582_v61, %v1565_v9  ;;  %v1681_v44 = vpop.permute.xlu2 %1680  ;;  %v2128_v9 = vrot.slane %v2121_v28, 5  ;;  %v2243_v61 = vmul.f32 %v2240_v3, %v3583_v58  ;;  %v2169_v52 = vsel %vm391_vm4, %v2167_v49, %v2168_v36 }
 0x25e   : > { %v2248_v53 = vrot.slane %v2242_v42, 6  ;;  %v2268_v32 = vrot.slane %v2262_v13, 6 }
 0x25f   : > { %v1607_v51 = vadd.f32 %v1603_v26, %v1586_v8  ;;  %v2129_v27 = vsel %vm391_vm4, %v2126_v46, %v2128_v9  ;;  %v2201_v26 = vmul.f32 %v2198_v2, %v3583_v58  ;;  %v2250_v54 = vrot.slane %v2243_v61, 6 }
 0x260   : > { %v2269_v2 = vrot.slane %v2263_v56, 6 }
 0x261   : > { %v1624_v17 = vadd.f32 %v1620_v55, %v1607_v51  ;;  %v2208_v51 = vrot.slane %v2201_v26, 6  ;;  %v2282_v55 = vstv %s2582_s8  ;;  %v2251_v24 = vsel %vm1239_vm9, %v2248_v53, %v2250_v54 }
 0x262   : > { %2130 = vrot.lane.b32.xlu1 %v2127_v22, %s2816_s24  ;;  %2151 = vrot.lane.b32.xlu0 %v2148_v19, %s2815_s21  ;;  %v2283_v28 = vmul.f32 %v2282_v55, %v3522_v6 }
 0x263   : > { %2109 = vrot.lane.b32.xlu2 %v2106_v4, %s2814_s7  ;;  %v1645_v20 = vadd.f32 %v1641_v1, %v1624_v17  ;;  %v2221_v1 = vmul.f32 %v2219_v40, %v3543_v41 }
 0x264   : > { %v1639_v25 = vpop.permute.xlu1 %1638  ;;  %v1660_v30 = vpop.permute.xlu0 %1659 }
 0x265   : > { %v1644_v59 = vadd.f32 %v1639_v25, %v1623_v57  ;;  %v1704_v29 = vpop.permute.xlu2 %1703  ;;  %v2227_v37 = vrot.slane %v2221_v1, 6  ;;  %v2284_v57 = vmul.f32 %v2282_v55, %v3543_v41  ;;  %v2241_v25 = vmul.f32 %v2240_v3, %v3522_v6 }
 0x267   : > { %v1665_v33 = vadd.f32 %v1660_v30, %v1644_v59  ;;  %v2228_v5 = vsel %vm1239_vm9, %v2226_v38, %v2227_v37  ;;  %v2230_v16 = vsel %vm1239_vm9, %v2227_v37, %v2229_v60  ;;  %v2247_v10 = vrot.slane %v2241_v25, 6 }
 0x269   : > { %v1686_v7 = vadd.f32 %v1681_v44, %v1665_v33  ;;  %v1752_v44 = vstv %s2556_s5  ;;  %v2289_v33 = vrot.slane %v2283_v28, 6 }
 0x26a   : > { %2153 = vrot.lane.b32.xlu1 %v2150_v62, %s2815_s21  ;;  %2174 = vrot.lane.b32.xlu0 %v2171_v35, %s2817_s27  ;;  %v1754_v17 = vmul.f32 %v1752_v44, %v3543_v41  ;;  %v1755_v19 = vmul.f32 %v1752_v44, %v3583_v58  ;;  %v1753_v30 = vmul.f32 %v1752_v44, %v3522_v6  ;;  %v2290_v62 = vrot.slane %v2284_v57, 6 }
 0x26b   : > { %2132 = vrot.lane.b32.xlu2 %v2129_v27, %s2816_s24  ;;  %v2303_v35 = vstv %s2583_s17  ;;  %v2285_v27 = vmul.f32 %v2282_v55, %v3583_v58 }
 0x26c   : > { %v1662_v50 = vpop.permute.xlu1 %1661  ;;  %v1683_v21 = vpop.permute.xlu0 %1682  ;;  %v1760_v59 = vrot.slane %v1754_v17, 3  ;;  %v1759_v18 = vrot.slane %v1753_v30, 3  ;;  %v2306_v63 = vmul.f32 %v2303_v35, %v3583_v58 }
 0x26d   : > { %v1666_v31 = vadd.f32 %v1662_v50, %v1645_v20  ;;  %v1744_v48 = vpop.permute.xlu2 %1743  ;;  %v2209_v20 = vsel %vm1239_vm9, %v2206_v23, %v2208_v51  ;;  %v2291_v50 = vsel %vm1239_vm9, %v2289_v33, %v2290_v62  ;;  %v2249_v23 = vsel %vm1239_vm9, %v2247_v10, %v2248_v53 }
 0x26e   : > { %v2313_v42 = vrot.slane %v2306_v63, 6 }
 0x26f   : > { %v1687_v45 = vadd.f32 %v1683_v21, %v1666_v31  ;;  %v2305_v21 = vmul.f32 %v2303_v35, %v3543_v41  ;;  %v1761_v31 = vsel %vm808_vm7, %v1759_v18, %v1760_v59 }
 0x271   : > { %v1708_v43 = vadd.f32 %v1704_v29, %v1687_v45  ;;  %v1762_v29 = vrot.slane %v1755_v19, 3 }
 0x272   : > { %2210 = vrot.lane.b32.xlu1 %v2207_v39, %s2813_s4  ;;  %2231 = vrot.lane.b32.xlu0 %v2228_v5, %s2812_s3  ;;  %v2292_v39 = vrot.slane %v2285_v27, 6  ;;  %v2311_v5 = vrot.slane %v2305_v21, 6 }
 0x273   : > { %2172 = vrot.lane.b32.xlu2 %v2169_v52, %s2817_s27  ;;  %v1763_v1 = vsel %vm808_vm7, %v1760_v59, %v1762_v29 }
 0x274   : > { %v1702_v46 = vpop.permute.xlu1 %1701  ;;  %v1723_v8 = vpop.permute.xlu0 %1722  ;;  %v2293_v52 = vsel %vm1239_vm9, %v2290_v62, %v2292_v39  ;;  %v2314_v26 = vsel %vm1239_vm9, %v2311_v5, %v2313_v42 }
 0x275   : > { %v1707_v11 = vadd.f32 %v1702_v46, %v1686_v7  ;;  %v1784_v12 = vpop.permute.xlu2 %1783  ;;  %v2270_v7 = vsel %vm1239_vm9, %v2268_v32, %v2269_v2 }
 0x277   : > { %v1728_v22 = vadd.f32 %v1723_v8, %v1707_v11  ;;  %v2304_v8 = vmul.f32 %v2303_v35, %v3522_v6 }
 0x279   : > { %v1749_v4 = vadd.f32 %v1744_v48, %v1728_v22  ;;  %v2264_v48 = vmul.f32 %v2261_v15, %v3583_v58  ;;  %v2310_v54 = vrot.slane %v2304_v8, 6 }
 0x27a   : > { %2233 = vrot.lane.b32.xlu1 %v2230_v16, %s2812_s3  ;;  %2254 = vrot.lane.b32.xlu0 %v2251_v24, %s2814_s7  ;;  %s2563_s3 = sld [smem:[#allocation4 + $0x4d]] }
 0x27b   : > { %2212 = vrot.lane.b32.xlu2 %v2209_v20, %s2813_s4  ;;  %v1766_v38 = vadd.f32 %v1761_v31, %v1749_v4  ;;  %v2271_v61 = vrot.slane %v2264_v48, 6  ;;  %v2312_v55 = vsel %vm1239_vm9, %v2310_v54, %v2311_v5  ;;  %s2570_s4 = sld [smem:[#allocation4 + $0x54]] }
 0x27c   : > { %v1725_v34 = vpop.permute.xlu1 %1724  ;;  %v1746_v36 = vpop.permute.xlu0 %1745 }
 0x27d   : > { %v1729_v9 = vadd.f32 %v1725_v34, %v1708_v43  ;;  %v1824_v40 = vpop.permute.xlu2 %1823  ;;  %v2272_v46 = vsel %vm1239_vm9, %v2269_v2, %v2271_v61 }
 0x27f   : > { %v1750_v14 = vadd.f32 %v1746_v36, %v1729_v9 }
 0x280   : > { %v1895_v30 = vstv %s2563_s3 }
 0x281   : > { %v1767_v47 = vadd.f32 %v1763_v1, %v1750_v14  ;;  %v1897_v59 = vmul.f32 %v1895_v30, %v3543_v41  ;;  %v1896_v29 = vmul.f32 %v1895_v30, %v3522_v6  ;;  %v1898_v32 = vmul.f32 %v1895_v30, %v3583_v58 }
 0x282   : > { %2273 = vrot.lane.b32.xlu1 %v2270_v7, %s2816_s24  ;;  %2294 = vrot.lane.b32.xlu0 %v2291_v50, %s2815_s21 }
 0x283   : > { %2252 = vrot.lane.b32.xlu2 %v2249_v23, %s2814_s7  ;;  %v1788_v37 = vadd.f32 %v1784_v12, %v1767_v47  ;;  %v1903_v2 = vrot.slane %v1897_v59, 4  ;;  %v1902_v9 = vrot.slane %v1896_v29, 4  ;;  %v1905_v35 = vrot.slane %v1898_v32, 4  ;;  %s2577_s7 = sld [smem:[#allocation4 + $0x5b]] }
 0x284   : > { %v1782_v49 = vpop.permute.xlu1 %1781  ;;  %v1803_v3 = vpop.permute.xlu0 %1802 }
 0x285   : > { %v1787_v45 = vadd.f32 %v1782_v49, %v1766_v38  ;;  %v1847_v0 = vpop.permute.xlu2 %1846  ;;  %v1904_v14 = vsel %vm952_vm8, %v1902_v9, %v1903_v2  ;;  %v1906_v47 = vsel %vm952_vm8, %v1903_v2, %v1905_v35 }
 0x287   : > { %v1808_v43 = vadd.f32 %v1803_v3, %v1787_v45 }
 0x289   : > { %v1829_v60 = vadd.f32 %v1824_v40, %v1808_v43 }
 0x28a   : > { %2296 = vrot.lane.b32.xlu1 %v2293_v52, %s2815_s21  ;;  %2317 = vrot.lane.b32.xlu0 %v2314_v26, %s2817_s27 }
 0x28b   : > { %2275 = vrot.lane.b32.xlu2 %v2272_v46, %s2816_s24 }
 0x28c   : > { %v1805_v44 = vpop.permute.xlu1 %1804  ;;  %v1826_v11 = vpop.permute.xlu0 %1825 }
 0x28d   : > { %v1809_v12 = vadd.f32 %v1805_v44, %v1788_v37  ;;  %v1887_v53 = vpop.permute.xlu2 %1886 }
 0x28f   : > { %v1830_v15 = vadd.f32 %v1826_v11, %v1809_v12 }
 0x291   : > { %v1851_v51 = vadd.f32 %v1847_v0, %v1830_v15  ;;  %v2038_v0 = vstv %s2570_s4 }
 0x292   : > { %v2040_v42 = vmul.f32 %v2038_v0, %v3543_v41  ;;  %v2039_v61 = vmul.f32 %v2038_v0, %v3522_v6  ;;  %v2041_v26 = vmul.f32 %v2038_v0, %v3583_v58 }
 0x293   : > { %2315 = vrot.lane.b32.xlu2 %v2312_v55, %s2817_s27 }
 0x294   : > { %v1845_v22 = vpop.permute.xlu1 %1844  ;;  %v1866_v16 = vpop.permute.xlu0 %1865  ;;  %v2045_v46 = vrot.slane %v2039_v61, 5  ;;  %v2048_v54 = vrot.slane %v2041_v26, 5 }
 0x295   : > { %v1927_v17 = vpop.permute.xlu2 %1926  ;;  %v1850_v25 = vadd.f32 %v1845_v22, %v1829_v60  ;;  %v2046_v60 = vrot.slane %v2040_v42, 5 }
 0x297   : > { %v1871_v36 = vadd.f32 %v1866_v16, %v1850_v25  ;;  %v2047_v15 = vsel %vm391_vm4, %v2045_v46, %v2046_v60  ;;  %v2049_v16 = vsel %vm391_vm4, %v2046_v60, %v2048_v54 }
 0x299   : > { %v1892_v62 = vadd.f32 %v1887_v53, %v1871_v36 }
 0x29b   : > { %v1909_v7 = vadd.f32 %v1904_v14, %v1892_v62 }
 0x29c   : > { %v1868_v19 = vpop.permute.xlu1 %1867  ;;  %v1889_v13 = vpop.permute.xlu0 %1888 }
 0x29d   : > { %v1967_v56 = vpop.permute.xlu2 %1966  ;;  %v1872_v10 = vadd.f32 %v1868_v19, %v1851_v51 }
 0x29f   : > { %v1893_v1 = vadd.f32 %v1889_v13, %v1872_v10 }
 0x2a1   : > { %v1910_v63 = vadd.f32 %v1906_v47, %v1893_v1 }
 0x2a3   : > { %v1931_v48 = vadd.f32 %v1927_v17, %v1910_v63 }
 0x2a4   : > { %v1925_v4 = vpop.permute.xlu1 %1924  ;;  %v1946_v24 = vpop.permute.xlu0 %1945 }
 0x2a5   : > { %v1990_v28 = vpop.permute.xlu2 %1989  ;;  %v1930_v27 = vadd.f32 %v1925_v4, %v1909_v7 }
 0x2a7   : > { %v1951_v31 = vadd.f32 %v1946_v24, %v1930_v27 }
 0x2a9   : > { %v1972_v37 = vadd.f32 %v1967_v56, %v1951_v31 }
 0x2ac   : > { %v1948_v57 = vpop.permute.xlu1 %1947  ;;  %v1969_v20 = vpop.permute.xlu0 %1968 }
 0x2ad   : > { %v2030_v34 = vpop.permute.xlu2 %2029  ;;  %v1952_v38 = vadd.f32 %v1948_v57, %v1931_v48 }
 0x2af   : > { %v1973_v5 = vadd.f32 %v1969_v20, %v1952_v38 }
 0x2b1   : > { %v1994_v52 = vadd.f32 %v1990_v28, %v1973_v5 }
 0x2b4   : > { %v1988_v40 = vpop.permute.xlu1 %1987  ;;  %v2009_v33 = vpop.permute.xlu0 %2008 }
 0x2b5   : > { %v2070_v18 = vpop.permute.xlu2 %2069  ;;  %v1993_v45 = vadd.f32 %v1988_v40, %v1972_v37 }
 0x2b7   : > { %v2014_v43 = vadd.f32 %v2009_v33, %v1993_v45 }
 0x2b9   : > { %v2035_v11 = vadd.f32 %v2030_v34, %v2014_v43  ;;  %v2181_v34 = vstv %s2577_s7 }
 0x2ba   : > { %v2183_v29 = vmul.f32 %v2181_v34, %v3543_v41  ;;  %v2182_v36 = vmul.f32 %v2181_v34, %v3522_v6  ;;  %v2184_v40 = vmul.f32 %v2181_v34, %v3583_v58 }
 0x2bb   : > { %v2052_v55 = vadd.f32 %v2047_v15, %v2035_v11 }
 0x2bc   : > { %v2011_v50 = vpop.permute.xlu1 %2010  ;;  %v2032_v21 = vpop.permute.xlu0 %2031  ;;  %v2189_v33 = vrot.slane %v2183_v29, 6  ;;  %v2188_v62 = vrot.slane %v2182_v36, 6  ;;  %v2191_v1 = vrot.slane %v2184_v40, 6 }
 0x2bd   : > { %v2110_v23 = vpop.permute.xlu2 %2109  ;;  %v2015_v12 = vadd.f32 %v2011_v50, %v1994_v52 }
 0x2be   : > { %v2190_v7 = vsel %vm1239_vm9, %v2188_v62, %v2189_v33  ;;  %v2192_v41 = vsel %vm1239_vm9, %v2189_v33, %v2191_v1 }
 0x2bf   : > { %v2036_v51 = vadd.f32 %v2032_v21, %v2015_v12 }
 0x2c1   : > { %v2053_v13 = vadd.f32 %v2049_v16, %v2036_v51 }
 0x2c3   : > { %v2074_v4 = vadd.f32 %v2070_v18, %v2053_v13 }
 0x2c4   : > { %v2068_v49 = vpop.permute.xlu1 %2067  ;;  %v2089_v3 = vpop.permute.xlu0 %2088 }
 0x2c5   : > { %v2133_v39 = vpop.permute.xlu2 %2132  ;;  %v2073_v22 = vadd.f32 %v2068_v49, %v2052_v55 }
 0x2c7   : > { %v2094_v56 = vadd.f32 %v2089_v3, %v2073_v22 }
 0x2c9   : > { %v2115_v57 = vadd.f32 %v2110_v23, %v2094_v56 }
 0x2cc   : > { %v2091_v8 = vpop.permute.xlu1 %2090  ;;  %v2112_v44 = vpop.permute.xlu0 %2111 }
 0x2cd   : > { %v2173_v53 = vpop.permute.xlu2 %2172  ;;  %v2095_v28 = vadd.f32 %v2091_v8, %v2074_v4 }
 0x2cf   : > { %v2116_v59 = vadd.f32 %v2112_v44, %v2095_v28 }
 0x2d1   : > { %v2137_v2 = vadd.f32 %v2133_v39, %v2116_v59 }
 0x2d4   : > { %v2131_v17 = vpop.permute.xlu1 %2130  ;;  %v2152_v19 = vpop.permute.xlu0 %2151 }
 0x2d5   : > { %v2213_v24 = vpop.permute.xlu2 %2212  ;;  %v2136_v30 = vadd.f32 %v2131_v17, %v2115_v57 }
 0x2d7   : > { %v2157_v32 = vadd.f32 %v2152_v19, %v2136_v30 }
 0x2d9   : > { %v2178_v35 = vadd.f32 %v2173_v53, %v2157_v32 }
 0x2db   : > { %v2195_v47 = vadd.f32 %v2190_v7, %v2178_v35 }
 0x2dc   : > { %v2154_v20 = vpop.permute.xlu1 %2153  ;;  %v2175_v25 = vpop.permute.xlu0 %2174 }
 0x2dd   : > { %v2253_v9 = vpop.permute.xlu2 %2252  ;;  %v2158_v14 = vadd.f32 %v2154_v20, %v2137_v2 }
 0x2df   : > { %v2179_v27 = vadd.f32 %v2175_v25, %v2158_v14 }
 0x2e1   : > { %v2196_v63 = vadd.f32 %v2192_v41, %v2179_v27 }
 0x2e3   : > { %v2217_v58 = vadd.f32 %v2213_v24, %v2196_v63 }
 0x2e4   : > { %v2211_v10 = vpop.permute.xlu1 %2210  ;;  %v2232_v18 = vpop.permute.xlu0 %2231 }
 0x2e5   : > { %v2216_v50 = vadd.f32 %v2211_v10, %v2195_v47  ;;  %v2276_v23 = vpop.permute.xlu2 %2275 }
 0x2e7   : > { %v2237_v31 = vadd.f32 %v2232_v18, %v2216_v50 }
 0x2e9   : > { %v2258_v38 = vadd.f32 %v2253_v9, %v2237_v31 }
 0x2ec   : > { %v2234_v6 = vpop.permute.xlu1 %2233  ;;  %v2255_v21 = vpop.permute.xlu0 %2254 }
 0x2ed   : > { %v2238_v48 = vadd.f32 %v2234_v6, %v2217_v58  ;;  %v2316_v39 = vpop.permute.xlu2 %2315 }
 0x2ef   : > { %v2259_v45 = vadd.f32 %v2255_v21, %v2238_v48 }
 0x2f1   : > { %v2280_v61 = vadd.f32 %v2276_v23, %v2259_v45 }
 0x2f4   : > { %v2274_v37 = vpop.permute.xlu1 %2273  ;;  %v2295_v49 = vpop.permute.xlu0 %2294 }
 0x2f5   : > { %v2279_v3 = vadd.f32 %v2274_v37, %v2258_v38 }
 0x2f7   : > { %v2300_v0 = vadd.f32 %v2295_v49, %v2279_v3 }
 0x2f9   : > { %v2321_v5 = vadd.f32 %v2316_v39, %v2300_v0 }
 0x2fb   : > { %v2584_v42 = vmul.f32 -1.442695, %v2321_v5 }
 0x2fc   : > { %v2297_v43 = vpop.permute.xlu1 %2296  ;;  %v2318_v26 = vpop.permute.xlu0 %2317 }
 0x2fd   : > { %2685 = vpow2.f32 %v2584_v42  ;;  %v2301_v52 = vadd.f32 %v2297_v43, %v2280_v61 }
 0x2ff   : > { %v2322_v60 = vadd.f32 %v2318_v26, %v2301_v52 }
 0x301   : > { %v2585_v46 = vmul.f32 -1.442695, %v2322_v60 }
 0x303   : > { %v2686_v8 = vpop.eup %2685  ;;  %2687 = vpow2.f32 %v2585_v46 }
 0x304   : > { %v2329_v44 = vadd.f32 1.0, %v2686_v8 }
 0x306   : > { %2689 = vrcp.f32 %v2329_v44  ;;  %v2342_v51 = vand.u32 2147483648, %v2329_v44  ;;  %v2340_v22 = vand.u32 2147483647, %v2329_v44  ;;  %vm2336_vm11 = vweird.f32 %v2329_v44 }
 0x308   : > { %v2343_v13 = vor.u32 1.1754944e-38, %v2342_v51  ;;  %vm2341_vm13 = vcmp.eq.f32.partialorder %v2340_v22, 8.507059e+37 }
 0x309   : > { %v2688_v11 = vpop.eup %2687 }
 0x30a   : > { %v2330_v12 = vadd.f32 1.0, %v2688_v11 }
 0x30c   : > { %v2690_v53 = vpop.eup %2689  ;;  %2691 = vrcp.f32 %v2330_v12  ;;  %v2357_v28 = vand.u32 2147483648, %v2330_v12  ;;  %v2355_v20 = vand.u32 2147483647, %v2330_v12  ;;  %vm2351_vm15 = vweird.f32 %v2330_v12 }
 0x30d   : > { %v2332_v54 = vmul.f32 %v2690_v53, %v2329_v44  ;;  %vm2337_vm10 = vweird.f32 %v2690_v53 }
 0x30e   : > { %vm2338_vm12 = vmor %vm2336_vm11, %vm2337_vm10  ;;  %v2358_v30 = vor.u32 1.1754944e-38, %v2357_v28  ;;  %vm2356_vm2 = vcmp.eq.f32.partialorder %v2355_v20, 8.507059e+37 }
 0x30f   : > { %v2333_v15 = vsub.f32 1.0, %v2332_v54 }
 0x311   : > { %v2334_v55 = vmul.f32 %v2690_v53, %v2333_v15 }
 0x312   : > { %v2692_v16 = vpop.eup %2691 }
 0x313   : > { %v2335_v17 = vadd.f32 %v2690_v53, %v2334_v55  ;;  %v2347_v19 = vmul.f32 %v2692_v16, %v2330_v12  ;;  %vm2352_vm14 = vweird.f32 %v2692_v16 }
 0x314   : > { %vm2353_vm0 = vmor %vm2351_vm15, %vm2352_vm14 }
 0x315   : > { %v2339_v56 = vsel %vm2338_vm12, %v2690_v53, %v2335_v17  ;;  %v2348_v4 = vsub.f32 1.0, %v2347_v19 }
 0x316   : > { %v2344_v24 = vsel %vm2341_vm13, %v2343_v13, %v2339_v56 }
 0x317   : > { %2361 = vst.msk [vmem:[%s2918_s25] sm:$0xff] %vm230_vm1, %v2344_v24  ;;  %v2349_v57 = vmul.f32 %v2692_v16, %v2348_v4 }
 0x319   : > { %v2350_v25 = vadd.f32 %v2692_v16, %v2349_v57 }
 0x31b   : > { %v2354_v34 = vsel %vm2353_vm0, %v2692_v16, %v2350_v25 }
 0x31c   : > { %v2359_v59 = vsel %vm2356_vm2, %v2358_v30, %v2354_v34 }
 0x31d   : > { %2362 = vst.msk [vmem:[%s2918_s25 + $0x8] sm:$0xff] %vm230_vm1, %v2359_v59 }
 0x31e PF: > { %s2591_s21 = sshll.u32 %s2794_s13, 4  ;;  %s2376_s26 = sshll.u32 %s2918_s25, 4  ;;  %s2377_s26 = int_to_ptr.vmem [resolvable:$true] %s2376_s26 }
 0x31f   : > { %s2375_s18 = scalar_lea.hbm %s3943_s2, %s2591_s21  ;;  %s2364_s12 = scalar_lea.sflag [#allocation5], %s173_s30 }
 0x320   : > { %s2378_s29 = sshll.u32 %s2375_s18, 4  ;;  %s2728_s13 = scalar_lea.hbm %s3943_s2, 32  ;;  %s2379_s29 = int_to_ptr.hbm [resolvable:$true] %s2378_s29 }
 0x321   : > { %s2722_s5 = sshra.s32 %s2379_s29, 4  ;;  %s2723_s5 = int_to_ptr.hbm [resolvable:$true] %s2722_s5 }
 0x322   : > { %s2724_s6 = scalar_lea.hbm %s2723_s5, 16  ;;  %p2729_p10 = scmp.lt.s32.totalorder %s2723_s5, %s3943_s2 }
 0x323   : > { %p2725_p6 = scmp.ne.s32.totalorder %s2723_s5, %s2724_s6  ;;  %p2730_p11 = scmp.lt.s32.totalorder %s2728_s13, %s2724_s6 }
 0x325   : > { %p2726_p7 = pnand %p2725_p6, %p2885_p3  ;;  %p2731_p12 = por %p2730_p11, %p2729_p10 }
 0x327   : > { %p2727_p8 = pneg %p2726_p7 }
 0x329   : > { %p2732_p13 = pnand %p2731_p12, %p2727_p8 }
 0x32b   : > { %2735 = shalt.err (!%p2732_p13)
}
 0x32c   : > { %s2818_s30 = smov 128   ;;  %s2819_s25 = smov 8  }
 0x32d   : > { %2596 = dma.vmem_to_hbm [thread:$0]  (%p2885_p3), %s2377_s26, 256, %s2379_s29, %s2364_s12, %s2818_s30, %s2818_s30, %s2819_s25  }
 0x32e PF: > { %p2608_p0 = scmp.ge.s32.totalorder %s2806_s16, 2  ;;  %s2393_s7 = sand.u32 1, %s2778_s9  }
 0x32f   : > { %s2394_s21 = scalar_lea.sflag [#allocation5], %s2393_s7 }
 0x330   : > { %p2603_p1 = pnand %p2608_p0, %p2895_p9 }
 0x332   : > { %p2604_p2 = pneg %p2603_p1 }
 0x334   : > { %2773 = dma.done.wait (%p2604_p2), %s2394_s21, 256  }
 0x335   : > { %2775 = vsyncadd (%p2604_p2), %s2394_s21, 4294967040  ;;  %s16_s16 = sadd.s32 1, %s2806_s16   ;;  %s3946_s9 = smov %s2782_s10 }
 0x336   : > { %p13_p4 = scmp.ge.s32.totalorder %s16_s16, 10   ;;  %s3947_s10 = smov %s2786_s11 }
 0x337   : > { %s3948_s11 = smov %s2905_s28  ;;  %s3949_s12 = smov %s2798_s14 }
 0x338   : > { %s3950_s13 = smov %s2802_s15  ;;  %s3951_s14 = smov %s3954_s19 }
 0x339   : > { %s3952_s15 = smov %s3958_s20  ;;  %15 = sbr.rel (!%p13_p4) target bundleno = 6 (0x6), region = 76 }
 0x33e   :  { %2400 = vsyncpa [#allocation5], 1 }
 0x33f   :  { %2402 = vsyncpa [#allocation5 + $0x1], 1 }
 0x340   :  { %2403 = vsyncpa [#allocation6], 1 }
 0x341   :  { %2405 = vsyncpa [#allocation6 + $0x1], 1 }

</bundles_post_ra>
